<compile_context>
chip_gen: v7x
topology: tpu7x:2x2x1
jax: 0.10.0
libtpu: 0.0.40
codegen_flags: <defaults>
</compile_context>

<pallas_src>
import jax
import jax.numpy as jnp
from jax.experimental import pallas as pl
from jax.experimental.pallas import tpu as pltpu

EPS = 1e-5  # nn.BatchNorm2d default eps


def _vmem_capacity_bytes():
    """Physical VMEM per TensorCore (generation-aware); conservative fallback."""
    try:
        info = pltpu.get_tpu_info()
        for name in ("vmem_capacity_bytes", "vmem_size_bytes", "vmem_bytes"):
            v = getattr(info, name, None)
            if v is None:
                continue
            try:
                v = int(v)
            except Exception:
                continue
            if v > 0:
                return v
    except Exception:
        pass
    return 64 * 1024 * 1024  # v7x per-core VMEM (smallest of v5e/v6e/v7x)


# ----------------------------- Pallas kernel -------------------------------

def _make_block_kernel(*, stride, Ho, Wo, c_in, c_out, b_tile, has_proj):
    M = Ho * Wo
    BM = b_tile * M

    def kernel(x_ref, w1_ref, w2_ref, b1_ref, b2_ref, *rest):
        if has_proj:
            wd_ref, bd_ref, o_ref, y1p_ref = rest
        else:
            o_ref, y1p_ref = rest

        # ---- conv1 (+folded BN1 scale) as ONE deep-K bf16 matmul -----------
        if stride == 1:
            slabs = [x_ref[:, dy:dy + Ho, dx:dx + Wo, :].reshape(BM, c_in)
                     for dy in range(3) for dx in range(3)]
        else:
            # Space-to-depth input: the 3x3/stride-2 conv becomes a 2x2 conv
            # over 4*c_in channels (invalid phases have zero weight rows), so
            # every slab is a full-channel, lane-aligned slice.
            slabs = [x_ref[:, dr:dr + Ho, dc:dc + Wo, :].reshape(BM, 4 * c_in)
                     for dr in range(2) for dc in range(2)]
        p1 = jnp.concatenate(slabs, axis=-1)                  # bf16 (BM, K1)
        y1 = jnp.dot(p1, w1_ref[...], preferred_element_type=jnp.float32)
        y1 = jnp.maximum(y1 + b1_ref[...], 0.0)               # BN1 bias + ReLU

        # ---- conv1 activation stays in VMEM (bf16, zero-padded) ------------
        # Only the 1-wide border needs zeroing; the interior is fully
        # overwritten each grid step (safe under any core split of the grid).
        zr = jnp.zeros((b_tile, 1, Wo + 2, c_out), dtype=y1p_ref.dtype)
        zc = jnp.zeros((b_tile, Ho + 2, 1, c_out), dtype=y1p_ref.dtype)
        y1p_ref[:, 0:1, :, :] = zr
        y1p_ref[:, Ho + 1:Ho + 2, :, :] = zr
        y1p_ref[:, :, 0:1, :] = zc
        y1p_ref[:, :, Wo + 1:Wo + 2, :] = zc
        y1p_ref[:, 1:Ho + 1, 1:Wo + 1, :] = (
            y1.reshape(b_tile, Ho, Wo, c_out).astype(y1p_ref.dtype))

        # ---- conv2 (+folded BN2 scale) as ONE deep-K bf16 matmul -----------
        p2 = jnp.concatenate(
            [y1p_ref[:, dy:dy + Ho, dx:dx + Wo, :].reshape(BM, c_out)
             for dy in range(3) for dx in range(3)], axis=-1)
        y2 = jnp.dot(p2, w2_ref[...], preferred_element_type=jnp.float32)
        y2 = y2 + b2_ref[...]                                  # BN2 bias

        # ---- shortcut -------------------------------------------------------
        if has_proj:
            if stride == 1:
                xr = x_ref[:, 1:Ho + 1, 1:Wo + 1, :].reshape(BM, c_in)
            else:
                # 1x1/stride-2 == phase (1,1) of the s2d input; other phases
                # carry zero weight rows -> full-channel lane-aligned slab.
                xr = x_ref[:, 0:Ho, 0:Wo, :].reshape(BM, 4 * c_in)
            r = jnp.dot(xr, wd_ref[...], preferred_element_type=jnp.float32)
            r = r + bd_ref[...]
        else:
            # Identity shortcut (c_in == c_out, stride 1).  Residual is the
            # bf16-cast input (PyTorch keeps it f32) -- within tolerance here.
            r = x_ref[:, 1:Ho + 1, 1:Wo + 1, :].reshape(BM, c_in).astype(jnp.float32)

        o_ref[...] = jnp.maximum(r + y2, 0.0).astype(o_ref.dtype)

    return kernel


# ----------------------------- Wrapper --------------------------------------

def basic_block_pallas(x_nchw, params, *, is_downsample, nchw_f32_out=True):
    N, c_in, H, W = x_nchw.shape
    c_out = params["w1"].shape[-1]
    stride = 2 if is_downsample else 1
    has_proj = is_downsample or (c_in != c_out)
    Ho, Wo = H // stride, W // stride
    M = Ho * Wo
    assert H % stride == 0 and W % stride == 0
    assert Wo % 8 == 0           # keeps in-register row-merge reshapes layout-trivial

    # NCHW -> NHWC, zero-pad spatially, bf16.
    # TODO(synk): the pad + space-to-depth rearrangement runs wrapper-side in
    # XLA (one extra HBM round trip of the activation); could be fused
    # in-kernel with a manual DMA into a pre-zeroed VMEM region.
    x = jnp.transpose(x_nchw, (0, 2, 3, 1))
    xp = jnp.pad(x, ((0, 0), (1, 1), (1, 1), (0, 0)))
    if stride == 2:
        xin = xp.reshape(N, Ho + 1, 2, Wo + 1, 2, c_in)
        xin = xin.transpose(0, 1, 3, 2, 4, 5).reshape(N, Ho + 1, Wo + 1, 4 * c_in)
        c_in_eff = 4 * c_in
    else:
        xin = xp
        c_in_eff = c_in
    xin = xin.astype(jnp.bfloat16)
    Hi, Wi = xin.shape[1], xin.shape[2]

    # TODO(synk): BatchNorm is eval-mode only (running stats folded); training
    # mode batch statistics are not computed in-kernel.
    def fold(bn):
        s = (bn["gamma"] / jnp.sqrt(bn["var"] + EPS)).astype(jnp.float32)
        b = (bn["beta"] - bn["mean"] * s).astype(jnp.float32)
        return s, b

    s1, b1 = fold(params["bn1"])
    s2, b2 = fold(params["bn2"])

    w1 = params["w1"].astype(jnp.float32)     # (3,3,c_in,c_out) HWIO
    w2 = params["w2"].astype(jnp.float32)
    if stride == 2:
        # 3x3/stride-2 conv over the padded input == 2x2 conv over the
        # space-to-depth input with 4*c_in channels; out-of-range taps -> 0.
        w1s = jnp.zeros((2, 2, 2, 2, c_in, c_out), jnp.float32)
        for dr in range(2):
            for dc in range(2):
                for pr in range(2):
                    for pc in range(2):
                        ky, kx = 2 * dr + pr, 2 * dc + pc
                        if ky < 3 and kx < 3:
                            w1s = w1s.at[dr, dc, pr, pc].set(w1[ky, kx])
        w1m = w1s.reshape(16 * c_in, c_out)
    else:
        w1m = w1.reshape(9 * c_in, c_out)
    w2m = w2.reshape(9 * c_out, c_out)

    # Fold BN scales into the weight matrices (exact); kernel epilogue is
    # bias-add (+ReLU) only.
    w1m = (w1m * s1[None, :]).astype(jnp.bfloat16)
    w2m = (w2m * s2[None, :]).astype(jnp.bfloat16)
    b1r = b1.reshape(1, c_out)
    b2r = b2.reshape(1, c_out)

    args = [xin, w1m, w2m, b1r, b2r]
    if has_proj:
        sd, bd = fold(params["bnd"])
        wd = params["wd"].reshape(c_in, c_out).astype(jnp.float32)
        if stride == 2:
            wdm = jnp.zeros((4, c_in, c_out), jnp.float32).at[3].set(wd)
            wdm = wdm.reshape(4 * c_in, c_out)
        else:
            wdm = wd
        wdm = (wdm * sd[None, :]).astype(jnp.bfloat16)
        bdr = bd.reshape(1, c_out)
        args += [wdm, bdr]

    # --- generation-aware VMEM limit and batch-tile size --------------------
    vmem_cap = _vmem_capacity_bytes()
    vmem_limit = max(32 << 20, min(int(0.75 * vmem_cap), 100 << 20))
    K1 = w1m.shape[0]
    per_sample = (
        2 * Hi * Wi * c_in_eff * 2          # double-buffered bf16 input block
        + 2 * M * c_out * 2                  # double-buffered bf16 output block
        + (Ho + 2) * (Wo + 2) * c_out * 2    # bf16 conv1-activation scratch
        + M * (K1 + 9 * c_out) * 2           # p1 / p2 im2col temporaries
        + 4 * M * c_out * 4)                 # f32 matmul results / epilogue
    budget = int(0.6 * vmem_limit)
    b_tile = 1
    for bt in range(1, N + 1):
        if N % bt:
            continue
        if bt * per_sample > budget or bt * M > 4096:
            break
        b_tile = bt
    grid = (N // b_tile,)

    def full_spec(shape):
        nd = len(shape)
        return pl.BlockSpec(shape, lambda n, _nd=nd: (0,) * _nd)

    in_specs = [
        pl.BlockSpec((b_tile, Hi, Wi, c_in_eff), lambda n: (n, 0, 0, 0)),
        full_spec(w1m.shape), full_spec(w2m.shape),
        full_spec(b1r.shape), full_spec(b2r.shape)]
    if has_proj:
        in_specs += [full_spec(args[5].shape), full_spec(args[6].shape)]

    kernel = _make_block_kernel(stride=stride, Ho=Ho, Wo=Wo, c_in=c_in,
                                c_out=c_out, b_tile=b_tile, has_proj=has_proj)

    # TODO(synk): on v7x verify both TensorCores receive grid work; if one TC
    # idles, switch the batch axis to pltpu.CORE_PARALLEL.
    out = pl.pallas_call(
        kernel,
        out_shape=jax.ShapeDtypeStruct((N * M, c_out), jnp.bfloat16),
        grid=grid,
        in_specs=in_specs,
        out_specs=pl.BlockSpec((b_tile * M, c_out), lambda n: (n, 0)),
        scratch_shapes=[pltpu.VMEM((b_tile, Ho + 2, Wo + 2, c_out), jnp.bfloat16)],
        compiler_params=pltpu.CompilerParams(
            dimension_semantics=("parallel",),
            vmem_limit_bytes=vmem_limit),
    )(*args)

    out = out.reshape(N, Ho, Wo, c_out)          # NHWC bf16 (chainable)
    if nchw_f32_out:                             # parity with the PyTorch module
        out = out.astype(jnp.float32).transpose(0, 3, 1, 2)
    return out


# ----------------------------- Pure-JAX reference ---------------------------

def _conv_ref(x, w, stride, pad):
    return jax.lax.conv_general_dilated(
        x, w, window_strides=(stride, stride),
        padding=((pad, pad), (pad, pad)),
        dimension_numbers=("NHWC", "HWIO", "NHWC"))


def basic_block_ref(x_nchw, params, *, is_downsample):
    x = jnp.transpose(x_nchw, (0, 2, 3, 1)).astype(jnp.float32)
    c_in = x.shape[-1]
    c_out = params["w1"].shape[-1]
    stride = 2 if is_downsample else 1

    def bn(y, p):
        s = p["gamma"] / jnp.sqrt(p["var"] + EPS)
        return y * s + (p["beta"] - p["mean"] * s)

    y = jnp.maximum(bn(_conv_ref(x, params["w1"], stride, 1), params["bn1"]), 0.0)
    y = bn(_conv_ref(y, params["w2"], 1, 1), params["bn2"])
    if is_downsample or c_in != c_out:
        r = bn(_conv_ref(x, params["wd"], stride, 0), params["bnd"])
    else:
        r = x
    return jnp.transpose(jnp.maximum(r + y, 0.0), (0, 3, 1, 2))


# ----------------------------- Params ---------------------------------------

def init_params(key, c_in, c_out, *, has_proj):
    ks = iter(jax.random.split(key, 16))

    def nrm(shape, s):
        return s * jax.random.normal(next(ks), shape, dtype=jnp.float32)

    def bn(c):
        return dict(
            gamma=1.0 + 0.1 * jax.random.normal(next(ks), (c,), dtype=jnp.float32),
            beta=0.1 * jax.random.normal(next(ks), (c,), dtype=jnp.float32),
            mean=0.1 * jax.random.normal(next(ks), (c,), dtype=jnp.float32),
            var=1.0 + 0.2 * jax.random.uniform(next(ks), (c,), dtype=jnp.float32))

    p = dict(w1=nrm((3, 3, c_in, c_out), 0.08), bn1=bn(c_out),
             w2=nrm((3, 3, c_out, c_out), 0.06), bn2=bn(c_out))
    if has_proj:
        p["wd"] = nrm((1, 1, c_in, c_out), 0.1)
        p["bnd"] = bn(c_out)
    return p


if __name__ == "__main__":
    key = jax.random.PRNGKey(0)

    def run_case(k, N, c_in, c_out, H, W, is_downsample):
        k_x, k_p = jax.random.split(k)
        x = jax.random.normal(k_x, (N, c_in, H, W), dtype=jnp.float32)
        params = init_params(k_p, c_in, c_out,
                             has_proj=is_downsample or c_in != c_out)
        fwd = jax.jit(basic_block_pallas,
                      static_argnames=("is_downsample", "nchw_f32_out"))
        out = fwd(x, params, is_downsample=is_downsample)
        jax.block_until_ready(out)
        stride = 2 if is_downsample else 1
        assert out.shape == (N, c_out, H // stride, W // stride), out.shape
        assert bool(jnp.all(jnp.isfinite(out)))
        ref = basic_block_ref(x, params, is_downsample=is_downsample)
        err = float(jnp.max(jnp.abs(out - ref)))
        scale = float(jnp.max(jnp.abs(ref)))
        assert err <= 0.03 * scale + 0.03, (err, scale)   # bf16-matmul tolerance

    k1, k2 = jax.random.split(key)
    # Downsample block (DeepSORT layer2 config) at a small spatial size.
    run_case(k1, N=2, c_in=64, c_out=128, H=16, W=16, is_downsample=True)
    # Identity-shortcut block (c_in == c_out, stride 1).
    run_case(k2, N=2, c_in=64, c_out=64, H=16, W=16, is_downsample=False)
    print("KERNEL_OK")
</pallas_src>

<mosaic_0001>
module attributes {stable_mosaic.version = 11 : i64} {
  func.func @kernel(%arg0: i32, %arg1: memref<2x9x9x256xbf16, #tpu.memory_space<vmem>>, %arg2: memref<1024x128xbf16, #tpu.memory_space<vmem>>, %arg3: memref<1152x128xbf16, #tpu.memory_space<vmem>>, %arg4: memref<1x128xf32, #tpu.memory_space<vmem>>, %arg5: memref<1x128xf32, #tpu.memory_space<vmem>>, %arg6: memref<256x128xbf16, #tpu.memory_space<vmem>>, %arg7: memref<1x128xf32, #tpu.memory_space<vmem>>, %arg8: memref<128x128xbf16, #tpu.memory_space<vmem>>, %arg9: memref<2x10x10x128xbf16, #tpu.memory_space<vmem>>) attributes {dimension_semantics = [#tpu.dimension_semantics<parallel>], iteration_bounds = array<i64: 1>, scalar_prefetch = 0 : i64, scratch_operands = 1 : i64, tpu.core_type = #tpu.core_type<tc>, window_params = [{transform_indices = @transform_0, window_bounds = array<i64: 2, 9, 9, 256>}, {pipeline_mode = #tpu.pipeline_mode<synchronous>, transform_indices = @transform_1, window_bounds = array<i64: 1024, 128>}, {pipeline_mode = #tpu.pipeline_mode<synchronous>, transform_indices = @transform_2, window_bounds = array<i64: 1152, 128>}, {pipeline_mode = #tpu.pipeline_mode<synchronous>, transform_indices = @transform_3, window_bounds = array<i64: 1, 128>}, {pipeline_mode = #tpu.pipeline_mode<synchronous>, transform_indices = @transform_4, window_bounds = array<i64: 1, 128>}, {pipeline_mode = #tpu.pipeline_mode<synchronous>, transform_indices = @transform_5, window_bounds = array<i64: 256, 128>}, {pipeline_mode = #tpu.pipeline_mode<synchronous>, transform_indices = @transform_6, window_bounds = array<i64: 1, 128>}, {transform_indices = @transform_7, window_bounds = array<i64: 128, 128>}]} {
    %c0 = arith.constant 0 : index
    %c0_0 = arith.constant 0 : index
    %c0_1 = arith.constant 0 : index
    %c0_2 = arith.constant 0 : index
    %0 = vector.load %arg1[%c0, %c0_0, %c0_1, %c0_2] : memref<2x9x9x256xbf16, #tpu.memory_space<vmem>>, vector<2x8x8x256xbf16>
    %1 = vector.shape_cast %0 : vector<2x8x8x256xbf16> to vector<128x256xbf16>
    %c0_3 = arith.constant 0 : index
    %c0_4 = arith.constant 0 : index
    %c1 = arith.constant 1 : index
    %c0_5 = arith.constant 0 : index
    %2 = vector.load %arg1[%c0_3, %c0_4, %c1, %c0_5] : memref<2x9x9x256xbf16, #tpu.memory_space<vmem>>, vector<2x8x8x256xbf16>
    %3 = vector.shape_cast %2 : vector<2x8x8x256xbf16> to vector<128x256xbf16>
    %c0_6 = arith.constant 0 : index
    %c1_7 = arith.constant 1 : index
    %c0_8 = arith.constant 0 : index
    %c0_9 = arith.constant 0 : index
    %4 = vector.load %arg1[%c0_6, %c1_7, %c0_8, %c0_9] : memref<2x9x9x256xbf16, #tpu.memory_space<vmem>>, vector<2x8x8x256xbf16>
    %5 = vector.shape_cast %4 : vector<2x8x8x256xbf16> to vector<128x256xbf16>
    %c0_10 = arith.constant 0 : index
    %c1_11 = arith.constant 1 : index
    %c1_12 = arith.constant 1 : index
    %c0_13 = arith.constant 0 : index
    %6 = vector.load %arg1[%c0_10, %c1_11, %c1_12, %c0_13] : memref<2x9x9x256xbf16, #tpu.memory_space<vmem>>, vector<2x8x8x256xbf16>
    %7 = vector.shape_cast %6 : vector<2x8x8x256xbf16> to vector<128x256xbf16>
    %8 = tpu.concatenate %1, %3, %5, %7 in 1 : vector<128x256xbf16>, vector<128x256xbf16>, vector<128x256xbf16>, vector<128x256xbf16> -> vector<128x1024xbf16>
    %c0_14 = arith.constant 0 : index
    %c0_15 = arith.constant 0 : index
    %9 = vector.load %arg2[%c0_14, %c0_15] : memref<1024x128xbf16, #tpu.memory_space<vmem>>, vector<1024x128xbf16>
    %cst = arith.constant dense<0.000000e+00> : vector<128x128xf32>
    %10 = tpu.matmul %8, %9, %cst {dimension_numbers = #tpu.dot_dimension_numbers<[1], [0], [0], [1], [0, 0, 1, 1], [], []>} : vector<128x1024xbf16>, vector<1024x128xbf16>, vector<128x128xf32> -> vector<128x128xf32>
    %c0_16 = arith.constant 0 : index
    %c0_17 = arith.constant 0 : index
    %11 = vector.load %arg4[%c0_16, %c0_17] : memref<1x128xf32, #tpu.memory_space<vmem>>, vector<1x128xf32>
    %12 = vector.broadcast %11 : vector<1x128xf32> to vector<128x128xf32>
    %13 = arith.addf %10, %12 : vector<128x128xf32>
    %cst_18 = arith.constant 0.000000e+00 : f32
    %14 = vector.broadcast %cst_18 : f32 to vector<128x128xf32>
    %15 = arith.maximumf %13, %14 : vector<128x128xf32>
    %cst_19 = arith.constant 0.000000e+00 : bf16
    %16 = vector.broadcast %cst_19 : bf16 to vector<2x1x10x128xbf16>
    %cst_20 = arith.constant 0.000000e+00 : bf16
    %17 = vector.broadcast %cst_20 : bf16 to vector<2x10x1x128xbf16>
    %c0_21 = arith.constant 0 : index
    %c0_22 = arith.constant 0 : index
    %c0_23 = arith.constant 0 : index
    %c0_24 = arith.constant 0 : index
    %18 = vector.load %arg9[%c0_21, %c0_22, %c0_23, %c0_24] : memref<2x10x10x128xbf16, #tpu.memory_space<vmem>>, vector<2x1x10x128xbf16>
    tpu.vector_store %arg9[%c0_21, %c0_22, %c0_23, %c0_24], %16 {strides = array<i32>} : memref<2x10x10x128xbf16, #tpu.memory_space<vmem>>, vector<2x1x10x128xbf16>,
    %c0_25 = arith.constant 0 : index
    %c9 = arith.constant 9 : index
    %c0_26 = arith.constant 0 : index
    %c0_27 = arith.constant 0 : index
    %19 = vector.load %arg9[%c0_25, %c9, %c0_26, %c0_27] : memref<2x10x10x128xbf16, #tpu.memory_space<vmem>>, vector<2x1x10x128xbf16>
    tpu.vector_store %arg9[%c0_25, %c9, %c0_26, %c0_27], %16 {strides = array<i32>} : memref<2x10x10x128xbf16, #tpu.memory_space<vmem>>, vector<2x1x10x128xbf16>,
    %c0_28 = arith.constant 0 : index
    %c0_29 = arith.constant 0 : index
    %c0_30 = arith.constant 0 : index
    %c0_31 = arith.constant 0 : index
    %20 = vector.load %arg9[%c0_28, %c0_29, %c0_30, %c0_31] : memref<2x10x10x128xbf16, #tpu.memory_space<vmem>>, vector<2x10x1x128xbf16>
    tpu.vector_store %arg9[%c0_28, %c0_29, %c0_30, %c0_31], %17 {strides = array<i32>} : memref<2x10x10x128xbf16, #tpu.memory_space<vmem>>, vector<2x10x1x128xbf16>,
    %c0_32 = arith.constant 0 : index
    %c0_33 = arith.constant 0 : index
    %c9_34 = arith.constant 9 : index
    %c0_35 = arith.constant 0 : index
    %21 = vector.load %arg9[%c0_32, %c0_33, %c9_34, %c0_35] : memref<2x10x10x128xbf16, #tpu.memory_space<vmem>>, vector<2x10x1x128xbf16>
    tpu.vector_store %arg9[%c0_32, %c0_33, %c9_34, %c0_35], %17 {strides = array<i32>} : memref<2x10x10x128xbf16, #tpu.memory_space<vmem>>, vector<2x10x1x128xbf16>,
    %22 = vector.shape_cast %15 : vector<128x128xf32> to vector<2x8x8x128xf32>
    %23 = arith.truncf %22 : vector<2x8x8x128xf32> to vector<2x8x8x128xbf16>
    %c0_36 = arith.constant 0 : index
    %c1_37 = arith.constant 1 : index
    %c1_38 = arith.constant 1 : index
    %c0_39 = arith.constant 0 : index
    %24 = vector.load %arg9[%c0_36, %c1_37, %c1_38, %c0_39] : memref<2x10x10x128xbf16, #tpu.memory_space<vmem>>, vector<2x8x8x128xbf16>
    tpu.vector_store %arg9[%c0_36, %c1_37, %c1_38, %c0_39], %23 {strides = array<i32>} : memref<2x10x10x128xbf16, #tpu.memory_space<vmem>>, vector<2x8x8x128xbf16>,
    %c0_40 = arith.constant 0 : index
    %c0_41 = arith.constant 0 : index
    %c0_42 = arith.constant 0 : index
    %c0_43 = arith.constant 0 : index
    %25 = vector.load %arg9[%c0_40, %c0_41, %c0_42, %c0_43] : memref<2x10x10x128xbf16, #tpu.memory_space<vmem>>, vector<2x8x8x128xbf16>
    %26 = vector.shape_cast %25 : vector<2x8x8x128xbf16> to vector<128x128xbf16>
    %c0_44 = arith.constant 0 : index
    %c0_45 = arith.constant 0 : index
    %c1_46 = arith.constant 1 : index
    %c0_47 = arith.constant 0 : index
    %27 = vector.load %arg9[%c0_44, %c0_45, %c1_46, %c0_47] : memref<2x10x10x128xbf16, #tpu.memory_space<vmem>>, vector<2x8x8x128xbf16>
    %28 = vector.shape_cast %27 : vector<2x8x8x128xbf16> to vector<128x128xbf16>
    %c0_48 = arith.constant 0 : index
    %c0_49 = arith.constant 0 : index
    %c2 = arith.constant 2 : index
    %c0_50 = arith.constant 0 : index
    %29 = vector.load %arg9[%c0_48, %c0_49, %c2, %c0_50] : memref<2x10x10x128xbf16, #tpu.memory_space<vmem>>, vector<2x8x8x128xbf16>
    %30 = vector.shape_cast %29 : vector<2x8x8x128xbf16> to vector<128x128xbf16>
    %c0_51 = arith.constant 0 : index
    %c1_52 = arith.constant 1 : index
    %c0_53 = arith.constant 0 : index
    %c0_54 = arith.constant 0 : index
    %31 = vector.load %arg9[%c0_51, %c1_52, %c0_53, %c0_54] : memref<2x10x10x128xbf16, #tpu.memory_space<vmem>>, vector<2x8x8x128xbf16>
    %32 = vector.shape_cast %31 : vector<2x8x8x128xbf16> to vector<128x128xbf16>
    %c0_55 = arith.constant 0 : index
    %c1_56 = arith.constant 1 : index
    %c1_57 = arith.constant 1 : index
    %c0_58 = arith.constant 0 : index
    %33 = vector.load %arg9[%c0_55, %c1_56, %c1_57, %c0_58] : memref<2x10x10x128xbf16, #tpu.memory_space<vmem>>, vector<2x8x8x128xbf16>
    %34 = vector.shape_cast %33 : vector<2x8x8x128xbf16> to vector<128x128xbf16>
    %c0_59 = arith.constant 0 : index
    %c1_60 = arith.constant 1 : index
    %c2_61 = arith.constant 2 : index
    %c0_62 = arith.constant 0 : index
    %35 = vector.load %arg9[%c0_59, %c1_60, %c2_61, %c0_62] : memref<2x10x10x128xbf16, #tpu.memory_space<vmem>>, vector<2x8x8x128xbf16>
    %36 = vector.shape_cast %35 : vector<2x8x8x128xbf16> to vector<128x128xbf16>
    %c0_63 = arith.constant 0 : index
    %c2_64 = arith.constant 2 : index
    %c0_65 = arith.constant 0 : index
    %c0_66 = arith.constant 0 : index
    %37 = vector.load %arg9[%c0_63, %c2_64, %c0_65, %c0_66] : memref<2x10x10x128xbf16, #tpu.memory_space<vmem>>, vector<2x8x8x128xbf16>
    %38 = vector.shape_cast %37 : vector<2x8x8x128xbf16> to vector<128x128xbf16>
    %c0_67 = arith.constant 0 : index
    %c2_68 = arith.constant 2 : index
    %c1_69 = arith.constant 1 : index
    %c0_70 = arith.constant 0 : index
    %39 = vector.load %arg9[%c0_67, %c2_68, %c1_69, %c0_70] : memref<2x10x10x128xbf16, #tpu.memory_space<vmem>>, vector<2x8x8x128xbf16>
    %40 = vector.shape_cast %39 : vector<2x8x8x128xbf16> to vector<128x128xbf16>
    %c0_71 = arith.constant 0 : index
    %c2_72 = arith.constant 2 : index
    %c2_73 = arith.constant 2 : index
    %c0_74 = arith.constant 0 : index
    %41 = vector.load %arg9[%c0_71, %c2_72, %c2_73, %c0_74] : memref<2x10x10x128xbf16, #tpu.memory_space<vmem>>, vector<2x8x8x128xbf16>
    %42 = vector.shape_cast %41 : vector<2x8x8x128xbf16> to vector<128x128xbf16>
    %43 = tpu.concatenate %26, %28, %30, %32, %34, %36, %38, %40, %42 in 1 : vector<128x128xbf16>, vector<128x128xbf16>, vector<128x128xbf16>, vector<128x128xbf16>, vector<128x128xbf16>, vector<128x128xbf16>, vector<128x128xbf16>, vector<128x128xbf16>, vector<128x128xbf16> -> vector<128x1152xbf16>
    %c0_75 = arith.constant 0 : index
    %c0_76 = arith.constant 0 : index
    %44 = vector.load %arg3[%c0_75, %c0_76] : memref<1152x128xbf16, #tpu.memory_space<vmem>>, vector<1152x128xbf16>
    %cst_77 = arith.constant dense<0.000000e+00> : vector<128x128xf32>
    %45 = tpu.matmul %43, %44, %cst_77 {dimension_numbers = #tpu.dot_dimension_numbers<[1], [0], [0], [1], [0, 0, 1, 1], [], []>} : vector<128x1152xbf16>, vector<1152x128xbf16>, vector<128x128xf32> -> vector<128x128xf32>
    %c0_78 = arith.constant 0 : index
    %c0_79 = arith.constant 0 : index
    %46 = vector.load %arg5[%c0_78, %c0_79] : memref<1x128xf32, #tpu.memory_space<vmem>>, vector<1x128xf32>
    %47 = vector.broadcast %46 : vector<1x128xf32> to vector<128x128xf32>
    %48 = arith.addf %45, %47 : vector<128x128xf32>
    %c0_80 = arith.constant 0 : index
    %c0_81 = arith.constant 0 : index
    %c0_82 = arith.constant 0 : index
    %c0_83 = arith.constant 0 : index
    %49 = vector.load %arg1[%c0_80, %c0_81, %c0_82, %c0_83] : memref<2x9x9x256xbf16, #tpu.memory_space<vmem>>, vector<2x8x8x256xbf16>
    %50 = vector.shape_cast %49 : vector<2x8x8x256xbf16> to vector<128x256xbf16>
    %c0_84 = arith.constant 0 : index
    %c0_85 = arith.constant 0 : index
    %51 = vector.load %arg6[%c0_84, %c0_85] : memref<256x128xbf16, #tpu.memory_space<vmem>>, vector<256x128xbf16>
    %cst_86 = arith.constant dense<0.000000e+00> : vector<128x128xf32>
    %52 = tpu.matmul %50, %51, %cst_86 {dimension_numbers = #tpu.dot_dimension_numbers<[1], [0], [0], [1], [0, 0, 1, 1], [], []>} : vector<128x256xbf16>, vector<256x128xbf16>, vector<128x128xf32> -> vector<128x128xf32>
    %c0_87 = arith.constant 0 : index
    %c0_88 = arith.constant 0 : index
    %53 = vector.load %arg7[%c0_87, %c0_88] : memref<1x128xf32, #tpu.memory_space<vmem>>, vector<1x128xf32>
    %54 = vector.broadcast %53 : vector<1x128xf32> to vector<128x128xf32>
    %55 = arith.addf %52, %54 : vector<128x128xf32>
    %56 = arith.addf %55, %48 : vector<128x128xf32>
    %cst_89 = arith.constant 0.000000e+00 : f32
    %57 = vector.broadcast %cst_89 : f32 to vector<128x128xf32>
    %58 = arith.maximumf %56, %57 : vector<128x128xf32>
    %59 = arith.truncf %58 : vector<128x128xf32> to vector<128x128xbf16>
    %c0_90 = arith.constant 0 : index
    %c0_91 = arith.constant 0 : index
    %60 = vector.load %arg8[%c0_90, %c0_91] : memref<128x128xbf16, #tpu.memory_space<vmem>>, vector<128x128xbf16>
    tpu.vector_store %arg8[%c0_90, %c0_91], %59 {strides = array<i32>} : memref<128x128xbf16, #tpu.memory_space<vmem>>, vector<128x128xbf16>,
    return
  }
  func.func @transform_0(%arg0: i32) -> (i32, i32, i32, i32) {
    %c0_i32 = arith.constant 0 : i32
    %c0_i32_0 = arith.constant 0 : i32
    %c0_i32_1 = arith.constant 0 : i32
    %c0_i32_2 = arith.constant 0 : i32
    return %arg0, %c0_i32, %c0_i32_0, %c0_i32_1 : i32, i32, i32, i32
  }
  func.func @transform_1(%arg0: i32) -> (i32, i32) {
    %c0_i32 = arith.constant 0 : i32
    %c0_i32_0 = arith.constant 0 : i32
    %c0_i32_1 = arith.constant 0 : i32
    return %c0_i32, %c0_i32_0 : i32, i32
  }
  func.func @transform_2(%arg0: i32) -> (i32, i32) {
    %c0_i32 = arith.constant 0 : i32
    %c0_i32_0 = arith.constant 0 : i32
    %c0_i32_1 = arith.constant 0 : i32
    return %c0_i32, %c0_i32_0 : i32, i32
  }
  func.func @transform_3(%arg0: i32) -> (i32, i32) {
    %c0_i32 = arith.constant 0 : i32
    %c0_i32_0 = arith.constant 0 : i32
    %c0_i32_1 = arith.constant 0 : i32
    return %c0_i32, %c0_i32_0 : i32, i32
  }
  func.func @transform_4(%arg0: i32) -> (i32, i32) {
    %c0_i32 = arith.constant 0 : i32
    %c0_i32_0 = arith.constant 0 : i32
    %c0_i32_1 = arith.constant 0 : i32
    return %c0_i32, %c0_i32_0 : i32, i32
  }
  func.func @transform_5(%arg0: i32) -> (i32, i32) {
    %c0_i32 = arith.constant 0 : i32
    %c0_i32_0 = arith.constant 0 : i32
    %c0_i32_1 = arith.constant 0 : i32
    return %c0_i32, %c0_i32_0 : i32, i32
  }
  func.func @transform_6(%arg0: i32) -> (i32, i32) {
    %c0_i32 = arith.constant 0 : i32
    %c0_i32_0 = arith.constant 0 : i32
    %c0_i32_1 = arith.constant 0 : i32
    return %c0_i32, %c0_i32_0 : i32, i32
  }
  func.func @transform_7(%arg0: i32) -> (i32, i32) {
    %c0_i32 = arith.constant 0 : i32
    %c0_i32_0 = arith.constant 0 : i32
    return %arg0, %c0_i32 : i32, i32
  }
}

</mosaic_0001>

<bundles_post_ra>
// kernel: basic_block_pallas.1
= control target key start
LH: loop header
LB: loop body
LE: loop exit
PB: predicated region body
PF: predicated region fallthrough
CT: control target
= control target key end

     0   :  { %vm59_vm0 = vsmask.f32 3328  ;;  %vm60_vm1 = vsmask.f32 7440  ;;  %vm1763_vm3 = vcmask 1040384   ;;  %vm2113_vm8 = vcmask 1043456   ;;  %s8671_s1 = inlined_call_operand.vmem [shape: bf16[1024,128], index: 1, kind: input, shape index: {}]   ;;  %s8672_s0 = inlined_call_operand.vmem [shape: bf16[2,9,9,256], index: 0, kind: input, shape index: {}]   ;;  %s8673_s2 = inlined_call_operand.vmem [shape: bf16[1152,128], index: 2, kind: input, shape index: {}]   ;;  %s8674_s3 = inlined_call_operand.vmem [shape: f32[1,128], index: 3, kind: input, shape index: {}]   ;;  %s8675_s5 = inlined_call_operand.vmem [shape: bf16[256,128], index: 5, kind: input, shape index: {}]   ;;  %s8676_s4 = inlined_call_operand.vmem [shape: f32[1,128], index: 4, kind: input, shape index: {}]   ;;  %s8677_s6 = inlined_call_operand.vmem [shape: f32[1,128], index: 6, kind: input, shape index: {}]   ;;  %s8678_s7 = inlined_call_operand.vmem [shape: bf16[128,128], index: 7, kind: output, shape index: {}]  }
   0x1   :  { %v6306_v0 = vld [vmem:[%s8671_s1 + $0x40] sm:$0xff]   ;;  %v6310_v4 = vld [vmem:[%s8671_s1 + $0x48] sm:$0xff]   ;;  %v6314_v8 = vld [vmem:[%s8671_s1 + $0x50] sm:$0xff]   ;;  %vm1764_vm4 = vsmask.f32 256  ;;  %vm2515_vm9 = vcmask 1042432  }
   0x2   :  { %v6307_v1 = vld [vmem:[%s8671_s1 + $0xc0] sm:$0xff]   ;;  %5665 = vmatprep.subr.bf16.mxu0 %v6306_v0  ;;  %v6311_v5 = vld [vmem:[%s8671_s1 + $0xc8] sm:$0xff]   ;;  %v6315_v9 = vld [vmem:[%s8671_s1 + $0xd0] sm:$0xff]   ;;  %vm1826_vm6 = vsmask.f32 7938  ;;  %vm2516_vm10 = vcmask 1046532  }
   0x3   :  { %v6308_v2 = vld [vmem:[%s8671_s1] sm:$0xff]   ;;  %5729 = vmatprep.subr.bf16.mxu1 %v6307_v1  ;;  %v6312_v6 = vld [vmem:[%s8671_s1 + $0x8] sm:$0xff]   ;;  %v6316_v10 = vld [vmem:[%s8671_s1 + $0x10] sm:$0xff]  }
   0x4   :  { %v6309_v3 = vld [vmem:[%s8671_s1 + $0x80] sm:$0xff]   ;;  %5666 = vmatpush3.bf16.msra.mxu0 %v6308_v2  ;;  %v6313_v7 = vld [vmem:[%s8671_s1 + $0x88] sm:$0xff]   ;;  %v6317_v11 = vld [vmem:[%s8671_s1 + $0x90] sm:$0xff]  }
   0x5   :  { %5730 = vmatpush3.bf16.msra.mxu1 %v6309_v3  ;;  %5667 = vmatprep.subr.bf16.mxu0 %v6310_v4  ;;  %v6318_v12 = vld [vmem:[%s8671_s1 + $0x58] sm:$0xff]   ;;  %v6322_v16 = vld [vmem:[%s8671_s1 + $0x60] sm:$0xff]   ;;  %v6326_v20 = vld [vmem:[%s8671_s1 + $0x68] sm:$0xff]  }
   0x6   :  { %5731 = vmatprep.subr.bf16.mxu1 %v6311_v5  ;;  %v6319_v13 = vld [vmem:[%s8671_s1 + $0xd8] sm:$0xff]   ;;  %v6323_v17 = vld [vmem:[%s8671_s1 + $0xe0] sm:$0xff]   ;;  %v6327_v21 = vld [vmem:[%s8671_s1 + $0xe8] sm:$0xff]  }
   0x7   :  { %v6320_v14 = vld [vmem:[%s8671_s1 + $0x18] sm:$0xff]   ;;  %v6324_v18 = vld [vmem:[%s8671_s1 + $0x20] sm:$0xff]   ;;  %v6328_v22 = vld [vmem:[%s8671_s1 + $0x28] sm:$0xff]  }
   0x8   :  { %5668 = vmatpush3.bf16.msra.mxu0 %v6312_v6  ;;  %v6321_v15 = vld [vmem:[%s8671_s1 + $0x98] sm:$0xff]   ;;  %v6325_v19 = vld [vmem:[%s8671_s1 + $0xa0] sm:$0xff]   ;;  %v6329_v23 = vld [vmem:[%s8671_s1 + $0xa8] sm:$0xff]  }
   0x9   :  { %5732 = vmatpush3.bf16.msra.mxu1 %v6313_v7  ;;  %5669 = vmatprep.subr.bf16.mxu0 %v6314_v8  ;;  %v6330_v24 = vld [vmem:[%s8671_s1 + $0x70] sm:$0xff]   ;;  %v6334_v28 = vld [vmem:[%s8671_s1 + $0x78] sm:$0xff]   ;;  %v27_v32 = vld [vmem:[%s8672_s0] sm:$0xff] }
   0xa   :  { %5733 = vmatprep.subr.bf16.mxu1 %v6315_v9  ;;  %v6331_v25 = vld [vmem:[%s8671_s1 + $0xf0] sm:$0xff]   ;;  %v6335_v29 = vld [vmem:[%s8671_s1 + $0xf8] sm:$0xff]   ;;  %v43_v34 = vld [vmem:[%s8672_s0 + $0x8] sm:$0x11]  ;;  %v63_v35 = vshrl.u32 %v27_v32, 16  ;;  %v66_v36 = vshll.u32 %v27_v32, 16 }
   0xb   :  { %v6332_v26 = vld [vmem:[%s8671_s1 + $0x30] sm:$0xff]   ;;  %v6336_v30 = vld [vmem:[%s8671_s1 + $0x38] sm:$0xff]   ;;  %v72_v41 = vshll.u32 %v43_v34, 16  ;;  %v6340_v48 = vld [vmem:[%s8671_s1 + $0x140] sm:$0xff]  }
   0xc   :  { %5670 = vmatpush3.bf16.msra.mxu0 %v6316_v10  ;;  %v6333_v27 = vld [vmem:[%s8671_s1 + $0xb0] sm:$0xff]   ;;  %v6337_v31 = vld [vmem:[%s8671_s1 + $0xb8] sm:$0xff]   ;;  %v65_v44 = vrot.slane %v63_v35, 4  ;;  %v68_v45 = vrot.slane %v66_v36, 5  ;;  %v6341_v49 = vld [vmem:[%s8671_s1 + $0x100] sm:$0xff]  }
   0xd   :  { %5734 = vmatpush3.bf16.msra.mxu1 %v6317_v11  ;;  %5671 = vmatprep.subr.bf16.mxu0 %v6318_v12  ;;  %v6684_v33 = vld [vmem:[%s8672_s0 + $0x10] sm:$0xff]  ;;  %v44_v39 = vld [vmem:[%s8672_s0 + $0x18] sm:$0x11]  ;;  %v74_v50 = vrot.slane %v72_v41, 5  ;;  %v6342_v54 = vld [vmem:[%s8671_s1 + $0x1c0] sm:$0xff]  }
   0xe   :  { %5735 = vmatprep.subr.bf16.mxu1 %v6319_v13  ;;  %v77_v37 = vshrl.u32 %v6684_v33, 16  ;;  %v80_v38 = vshll.u32 %v6684_v33, 16  ;;  %v5200_v40 = vcombine.high %v27_v32, %v6684_v33  ;;  %v86_v42 = vshll.u32 %v44_v39, 16  ;;  %vm6707_vm2 = vmor %vm59_vm0, %vm60_vm1  ;;  %v6716_v58 = vld [vmem:[%s8672_s0 + $0x20] sm:$0xff]  ;;  %v6721_v59 = vld [vmem:[%s8672_s0 + $0x30] sm:$0xff] }
   0xf   :  { %v5199_v43 = vcombine.low %v27_v32, %v6684_v33  ;;  %v69_v51 = vor.u32 %v68_v45, %v65_v44  ;;  %v45_v60 = vld [vmem:[%s8672_s0 + $0x28] sm:$0x11]  ;;  %v6343_v61 = vld [vmem:[%s8671_s1 + $0x180] sm:$0xff]   ;;  %v91_v62 = vshrl.u32 %v6716_v58, 16  ;;  %v94_v63 = vshll.u32 %v6716_v58, 16  ;;  %v6352_v35 = vld [vmem:[%s8671_s1 + $0x150] sm:$0xff]  }
  0x10   :  { %5672 = vmatpush3.bf16.msra.mxu0 %v6320_v14  ;;  %v79_v46 = vrot.slane %v77_v37, 4  ;;  %v82_v47 = vrot.slane %v80_v38, 5  ;;  %1382 = vmatprep.mubr.bf16.mxu0 %v5200_v40  ;;  %v88_v53 = vrot.slane %v86_v42, 5  ;;  %v105_v0 = vshrl.u32 %v6721_v59, 16  ;;  %v46_v2 = vld [vmem:[%s8672_s0 + $0x38] sm:$0x11]  ;;  %vm7219_vm5 = vmand %vm1763_vm3, %vm1764_vm4 }
  0x11   :  { %5736 = vmatpush3.bf16.msra.mxu1 %v6321_v15  ;;  %5673 = vmatprep.subr.bf16.mxu0 %v6322_v16  ;;  %v70_v56 = vrot.slane %v69_v51, 4  ;;  %v108_v1 = vshll.u32 %v6721_v59, 16  ;;  %v5202_v5 = vcombine.high %v6716_v58, %v6721_v59  ;;  %v100_v6 = vshll.u32 %v45_v60, 16  ;;  %v6346_v7 = vld [vmem:[%s8671_s1 + $0x148] sm:$0xff]   ;;  %v48_v34 = vld [vmem:[%s8672_s0 + $0x58] sm:$0x11]  ;;  %vm7226_vm7 = vmand %vm1763_vm3, %vm1826_vm6 }
  0x12   :  { %5737 = vmatprep.subr.bf16.mxu1 %v6323_v17  ;;  %v83_v52 = vor.u32 %v82_v47, %v79_v46  ;;  %v93_v10 = vrot.slane %v91_v62, 4  ;;  %v96_v11 = vrot.slane %v94_v63, 5  ;;  %v107_v13 = vrot.slane %v105_v0, 4  ;;  %v6347_v16 = vld [vmem:[%s8671_s1 + $0x108] sm:$0xff]   ;;  %v6353_v40 = vld [vmem:[%s8671_s1 + $0x110] sm:$0xff]   ;;  %vm7430_vm11 = vmand %vm2113_vm8, %vm1826_vm6 }
  0x13   :  { %v75_v3 = vsel %vm6707_vm2, %v70_v56, %v74_v50  ;;  %v102_v12 = vrot.slane %v100_v6, 5  ;;  %v110_v14 = vrot.slane %v108_v1, 5  ;;  %v114_v15 = vshll.u32 %v46_v2, 16  ;;  %v6348_v17 = vld [vmem:[%s8671_s1 + $0x1c8] sm:$0xff]   ;;  %v6354_v45 = vld [vmem:[%s8671_s1 + $0x1d0] sm:$0xff]   ;;  %vm7437_vm12 = vmor %vm2515_vm9, %vm2516_vm10 }
  0x14   :  { %5674 = vmatpush3.bf16.msra.mxu0 %v6324_v18  ;;  %v6711_v57 = vrot.slane %v83_v52, 4  ;;  %v97_v18 = vor.u32 %v96_v11, %v93_v10  ;;  %v142_v44 = vshll.u32 %v48_v34, 16  ;;  %v6355_v50 = vld [vmem:[%s8671_s1 + $0x190] sm:$0xff]   ;;  %v49_v1 = vld [vmem:[%s8672_s0 + $0x68] sm:$0x11]  ;;  %v6358_v11 = vld [vmem:[%s8671_s1 + $0x158] sm:$0xff]  }
  0x15   :  { %5738 = vmatpush3.bf16.msra.mxu1 %v6325_v19  ;;  %5675 = vmatprep.subr.bf16.mxu0 %v6326_v20  ;;  %v5201_v19 = vcombine.low %v6716_v58, %v6721_v59  ;;  %v111_v20 = vor.u32 %v110_v14, %v107_v13  ;;  %v6813_v60 = vld [vmem:[%s8672_s0 + $0x70] sm:$0xff]  ;;  %v156_v6 = vshll.u32 %v49_v1, 16 }
  0x16   :  { %5739 = vmatprep.subr.bf16.mxu1 %v6327_v21  ;;  %v89_v4 = vsel %vm6707_vm2, %v6711_v57, %v88_v53  ;;  %v116_v21 = vrot.slane %v114_v15, 5  ;;  %v144_v52 = vrot.slane %v142_v44, 5  ;;  %v161_v0 = vshrl.u32 %v6813_v60, 16 }
  0x17   :  { %v5215_v8 = vcombine.low %v75_v3, %v89_v4  ;;  %v5216_v9 = vcombine.high %v75_v3, %v89_v4  ;;  %v164_v3 = vshll.u32 %v6813_v60, 16  ;;  %v158_v13 = vrot.slane %v156_v6, 5 }
  0x18   :  { %5676 = vmatpush3.bf16.msra.mxu0 %v6328_v22  ;;  %v6349_v22 = vld [vmem:[%s8671_s1 + $0x188] sm:$0xff]   ;;  %v163_v10 = vrot.slane %v161_v0, 4 }
  0x19   :  { %5740 = vmatpush3.bf16.msra.mxu1 %v6329_v23  ;;  %5677 = vmatprep.subr.bf16.mxu0 %v6330_v24  ;;  %v6760_v23 = vld [vmem:[%s8672_s0 + $0x40] sm:$0xff]  ;;  %v6762_v24 = vrot.slane %v97_v18, 4  ;;  %v166_v14 = vrot.slane %v164_v3, 5  ;;  %v6359_v18 = vld [vmem:[%s8671_s1 + $0x118] sm:$0xff]  }
  0x1a   :  { %5741 = vmatprep.subr.bf16.mxu1 %v6331_v25  ;;  %1479 = vmatprep.mubr.bf16.mxu1 %v5216_v9  ;;  %v6767_v25 = vld [vmem:[%s8672_s0 + $0x50] sm:$0xff]  ;;  %v6367_v3 = vld [vmem:[%s8671_s1 + $0x1a0] sm:$0xff]  }
  0x1b   :  { %v5204_v32 = vcombine.high %v6760_v23, %v6767_v25  ;;  %v103_v36 = vsel %vm6707_vm2, %v6762_v24, %v102_v12  ;;  %v5203_v53 = vcombine.low %v6760_v23, %v6767_v25 }
  0x1c   :  { %5678 = vmatpush3.bf16.msra.mxu0 %v6332_v26  ;;  %v119_v26 = vshrl.u32 %v6760_v23, 16 }
  0x1d   :  { %5742 = vmatpush3.bf16.msra.mxu1 %v6333_v27  ;;  %5679 = vmatprep.subr.bf16.mxu0 %v6334_v28  ;;  %v122_v27 = vshll.u32 %v6760_v23, 16  ;;  %v47_v28 = vld [vmem:[%s8672_s0 + $0x48] sm:$0x11] }
  0x1e   :  { %5743 = vmatprep.subr.bf16.mxu1 %v6335_v29  ;;  %v6774_v29 = vrot.slane %v111_v20, 4  ;;  %v121_v37 = vrot.slane %v119_v26, 4  ;;  %v128_v39 = vshll.u32 %v47_v28, 16  ;;  %v35_v28 = vld [vmem:[%s8672_s0 + $0x90] sm:$0xff] }
  0x1f   :  { %v124_v38 = vrot.slane %v122_v27, 5  ;;  %v6361_v27 = vld [vmem:[%s8671_s1 + $0x198] sm:$0xff]   ;;  %v178_v34 = vshll.u32 %v35_v28, 16 }
  0x20   :  { %5680 = vmatpush3.bf16.msra.mxu0 %v6336_v30  ;;  %v133_v30 = vshrl.u32 %v6767_v25, 16  ;;  %v117_v41 = vsel %vm6707_vm2, %v6774_v29, %v116_v21  ;;  %v6360_v21 = vld [vmem:[%s8671_s1 + $0x1d8] sm:$0xff]  }
  0x21   :  { %5744 = vmatpush3.bf16.msra.mxu1 %v6337_v31  ;;  %5793 = vmatprep.subr.bf16.mxu0 %v6340_v48  ;;  %v136_v31 = vshll.u32 %v6767_v25, 16  ;;  %v5218_v46 = vcombine.high %v103_v36, %v117_v41  ;;  %v5217_v47 = vcombine.low %v103_v36, %v117_v41  ;;  %v125_v48 = vor.u32 %v124_v38, %v121_v37  ;;  %v51_v36 = vld [vmem:[%s8672_s0 + $0x98] sm:$0x11] }
  0x22   :  { %5857 = vmatprep.subr.bf16.mxu1 %v6342_v54  ;;  %v135_v42 = vrot.slane %v133_v30, 4  ;;  %v6806_v54 = vld [vmem:[%s8672_s0 + $0x60] sm:$0xff]  ;;  %v184_v41 = vshll.u32 %v51_v36, 16  ;;  %v180_v44 = vrot.slane %v178_v34, 5  ;;  %v6371_v34 = vld [vmem:[%s8671_s1 + $0x128] sm:$0xff]  }
  0x23   :  { %1383 = vmatmul.mubr.bf16.vlgmr.msra.gmra.mrb[0].mxu0 %v5199_v43  ;;  %v138_v43 = vrot.slane %v136_v31, 5  ;;  %v6808_v56 = vrot.slane %v125_v48, 4  ;;  %v147_v62 = vshrl.u32 %v6806_v54, 16  ;;  %v150_v63 = vshll.u32 %v6806_v54, 16  ;;  %v6857_v30 = vld [vmem:[%s8672_s0 + $0xa0] sm:$0xff]  ;;  %v6372_v36 = vld [vmem:[%s8671_s1 + $0x1e8] sm:$0xff]  }
  0x24   :  { %5794 = vmatpush3.bf16.msra.mxu0 %v6341_v49  ;;  %1390 = vmatprep.mubr.bf16.mxu0 %v5202_v5  ;;  %v130_v49 = vrot.slane %v128_v39, 5  ;;  %v5206_v4 = vcombine.high %v6806_v54, %v6813_v60  ;;  %v50_v5 = vld [vmem:[%s8672_s0 + $0x78] sm:$0x11]  ;;  %v5205_v20 = vcombine.low %v6806_v54, %v6813_v60  ;;  %v192_v38 = vshll.u32 %v6857_v30, 16 }
  0x25   :  { %5795 = vmatprep.subr.bf16.mxu0 %v6346_v7  ;;  %1480 = vmatmul.mubr.bf16.vlgmr.msra.gmra.mrb[0].mxu1 %v5215_v8  ;;  %v139_v51 = vor.u32 %v138_v43, %v135_v42  ;;  %v149_v8 = vrot.slane %v147_v62, 4  ;;  %v152_v9 = vrot.slane %v150_v63, 5  ;;  %v5208_v39 = vcombine.high %v35_v28, %v6857_v30  ;;  %v6366_v63 = vld [vmem:[%s8671_s1 + $0x1e0] sm:$0xff]  }
  0x26   :  { %5858 = vmatpush3.bf16.msra.mxu1 %v6343_v61  ;;  %1487 = vmatprep.mubr.bf16.mxu1 %v5218_v46  ;;  %v131_v2 = vsel %vm6707_vm2, %v6808_v56, %v130_v49  ;;  %v6364_v46 = vld [vmem:[%s8671_s1 + $0x160] sm:$0xff]   ;;  %v186_v48 = vrot.slane %v184_v41, 5  ;;  %v194_v49 = vrot.slane %v192_v38, 5 }
  0x27   :  { %5859 = vmatprep.subr.bf16.mxu1 %v6348_v17  ;;  %v6815_v61 = vrot.slane %v139_v51, 4  ;;  %v170_v17 = vshll.u32 %v50_v5, 16  ;;  %v6897_v5 = vld [vmem:[%s8672_s0 + $0xc0] sm:$0xff] }
  0x28   :  { %5796 = vmatpush3.bf16.msra.mxu0 %v6347_v16  ;;  %v153_v16 = vor.u32 %v152_v9, %v149_v8  ;;  %v217_v9 = vshrl.u32 %v6897_v5, 16 }
  0x29   :  { %5797 = vmatprep.subr.bf16.mxu0 %v6352_v35  ;;  %v145_v7 = vsel %vm6707_vm2, %v6815_v61, %v144_v52  ;;  %v172_v26 = vrot.slane %v170_v17, 5  ;;  %v189_v35 = vshrl.u32 %v6857_v30, 16  ;;  %v6365_v52 = vld [vmem:[%s8671_s1 + $0x120] sm:$0xff]  }
  0x2a   :  { %5860 = vmatpush3.bf16.msra.mxu1 %v6349_v22  ;;  %v5220_v12 = vcombine.high %v131_v2, %v145_v7  ;;  %v5219_v15 = vcombine.low %v131_v2, %v145_v7  ;;  %v6846_v22 = vrot.slane %v153_v16, 4  ;;  %v5207_v2 = vcombine.low %v35_v28, %v6857_v30 }
  0x2b   :  { %1391 = vmatmul.mubr.bf16.gmra.mrb[4].mxu0 %v5201_v19  ;;  %5861 = vmatprep.subr.bf16.mxu1 %v6354_v45  ;;  %v167_v19 = vor.u32 %v166_v14, %v163_v10  ;;  %v191_v45 = vrot.slane %v189_v35, 4  ;;  %v53_v10 = vld [vmem:[%s8672_s0 + $0xb8] sm:$0x11]  ;;  %v54_v14 = vld [vmem:[%s8672_s0 + $0xc8] sm:$0x11] }
  0x2c   :  { %1398 = vmatprep.mubr.bf16.mxu0 %v5204_v32  ;;  %5798 = vmatpush3.bf16.msra.mxu0 %v6353_v40  ;;  %v175_v32 = vshrl.u32 %v35_v28, 16  ;;  %v159_v37 = vsel %vm6707_vm2, %v6846_v22, %v158_v13  ;;  %v52_v40 = vld [vmem:[%s8672_s0 + $0xa8] sm:$0x11] }
  0x2d   :  { %1488 = vmatmul.mubr.bf16.gmra.mrb[4].mxu1 %v5217_v47  ;;  %5799 = vmatprep.subr.bf16.mxu0 %v6358_v11  ;;  %v6859_v31 = vrot.slane %v167_v19, 4  ;;  %v198_v51 = vshll.u32 %v52_v40, 16  ;;  %v195_v62 = vor.u32 %v194_v49, %v191_v45  ;;  %v219_v19 = vrot.slane %v217_v9, 4  ;;  %v55_v49 = vld [vmem:[%s8672_s0 + $0xd8] sm:$0x11] }
  0x2e   :  { %5862 = vmatpush3.bf16.msra.mxu1 %v6355_v50  ;;  %1495 = vmatprep.mubr.bf16.mxu1 %v5220_v12  ;;  %v177_v43 = vrot.slane %v175_v32, 4  ;;  %v220_v12 = vshll.u32 %v6897_v5, 16  ;;  %v226_v32 = vshll.u32 %v54_v14, 16  ;;  %v6378_v14 = vld [vmem:[%s8671_s1 + $0x1f0] sm:$0xff]  }
  0x2f   :  { %5863 = vmatprep.subr.bf16.mxu1 %v6360_v21  ;;  %v173_v42 = vsel %vm6707_vm2, %v6859_v31, %v172_v26  ;;  %v200_v1 = vrot.slane %v198_v51, 5  ;;  %v6899_v6 = vrot.slane %v195_v62, 4  ;;  %v240_v62 = vshll.u32 %v55_v49, 16 }
  0x30   :  { %5800 = vmatpush3.bf16.msra.mxu0 %v6359_v18  ;;  %v5222_v47 = vcombine.high %v159_v37, %v173_v42  ;;  %v181_v50 = vor.u32 %v180_v44, %v177_v43  ;;  %v228_v40 = vrot.slane %v226_v32, 5  ;;  %v6939_v43 = vld [vmem:[%s8672_s0 + $0xd0] sm:$0xff]  ;;  %v6944_v44 = vld [vmem:[%s8672_s0 + $0xe0] sm:$0xff] }
  0x31   :  { %5801 = vmatprep.subr.bf16.mxu0 %v6364_v46  ;;  %v201_v16 = vsel %vm6707_vm2, %v6899_v6, %v200_v1  ;;  %v231_v46 = vshrl.u32 %v6939_v43, 16  ;;  %v248_v51 = vshll.u32 %v6944_v44, 16 }
  0x32   :  { %5864 = vmatpush3.bf16.msra.mxu1 %v6361_v27  ;;  %v182_v0 = vrot.slane %v181_v50, 4  ;;  %v222_v27 = vrot.slane %v220_v12, 5  ;;  %v6377_v12 = vld [vmem:[%s8671_s1 + $0x130] sm:$0xff]  }
  0x33   :  { %1399 = vmatmul.mubr.bf16.gmra.mrb[8].mxu0 %v5203_v53  ;;  %v5221_v53 = vcombine.low %v159_v37, %v173_v42  ;;  %5865 = vmatprep.subr.bf16.mxu1 %v6366_v63  ;;  %v6373_v42 = vld [vmem:[%s8671_s1 + $0x1a8] sm:$0xff]   ;;  %v250_v9 = vrot.slane %v248_v51, 5 }
  0x34   :  { %1406 = vmatprep.mubr.bf16.mxu0 %v5206_v4  ;;  %5802 = vmatpush3.bf16.msra.mxu0 %v6365_v52  ;;  %v6892_v4 = vld [vmem:[%s8672_s0 + $0xb0] sm:$0xff]  ;;  %v187_v11 = vsel %vm6707_vm2, %v182_v0, %v186_v48  ;;  %v223_v35 = vor.u32 %v222_v27, %v219_v19  ;;  %v245_v48 = vshrl.u32 %v6944_v44, 16  ;;  %v5212_v52 = vcombine.high %v6939_v43, %v6944_v44 }
  0x35   :  { %1496 = vmatmul.mubr.bf16.gmra.mrb[8].mxu1 %v5219_v15  ;;  %v203_v7 = vshrl.u32 %v6892_v4, 16  ;;  %v206_v8 = vshll.u32 %v6892_v4, 16  ;;  %v5210_v13 = vcombine.high %v6892_v4, %v6897_v5  ;;  %v212_v15 = vshll.u32 %v53_v10, 16 }
  0x36   :  { %1503 = vmatprep.mubr.bf16.mxu1 %v5222_v47  ;;  %5866 = vmatpush3.bf16.msra.mxu1 %v6367_v3  ;;  %v5224_v21 = vcombine.high %v187_v11, %v201_v16  ;;  %v5239_v37 = vcombine.low %v6857_v30, %v6892_v4  ;;  %v5223_v38 = vcombine.low %v187_v11, %v201_v16  ;;  %v6946_v45 = vrot.slane %v223_v35, 4  ;;  %v6376_v3 = vld [vmem:[%s8671_s1 + $0x170] sm:$0xff]   ;;  %v57_v35 = vld [vmem:[%s8672_s0 + $0xf8] sm:$0x11] }
  0x37   :  { %v205_v17 = vrot.slane %v203_v7, 4  ;;  %v208_v18 = vrot.slane %v206_v8, 5  ;;  %v214_v26 = vrot.slane %v212_v15, 5  ;;  %v5209_v41 = vcombine.low %v6892_v4, %v6897_v5  ;;  %5867 = vmatprep.subr.bf16.mxu1 %v6372_v36 }
  0x38   :  { %v234_v47 = vshll.u32 %v6939_v43, 16  ;;  %v229_v63 = vsel %vm6707_vm2, %v6946_v45, %v228_v40  ;;  %v233_v0 = vrot.slane %v231_v46, 4  ;;  %v242_v8 = vrot.slane %v240_v62, 5 }
  0x39   :  { %v209_v28 = vor.u32 %v208_v18, %v205_v17  ;;  %v5241_v15 = vcombine.low %v6897_v5, %v6939_v43  ;;  %v5211_v19 = vcombine.low %v6939_v43, %v6944_v44 }
  0x3a   :  { %5868 = vmatpush3.bf16.msra.mxu1 %v6373_v42  ;;  %v236_v1 = vrot.slane %v234_v47, 5  ;;  %v268_v42 = vshll.u32 %v57_v35, 16 }
  0x3b   :  { %1407 = vmatmul.mubr.bf16.gmra.mrb[12].mxu0 %v5205_v20  ;;  %v6370_v20 = vld [vmem:[%s8671_s1 + $0x168] sm:$0xff]   ;;  %5869 = vmatprep.subr.bf16.mxu1 %v6378_v14 }
  0x3c   :  { %1414 = vmatprep.mubr.bf16.mxu0 %v5208_v39  ;;  %5803 = vmatprep.subr.bf16.mxu0 %v6370_v20  ;;  %v6929_v39 = vrot.slane %v209_v28, 4  ;;  %v237_v10 = vor.u32 %v236_v1, %v233_v0  ;;  %v6379_v20 = vld [vmem:[%s8671_s1 + $0x1b0] sm:$0xff]   ;;  %v6383_v0 = vld [vmem:[%s8671_s1 + $0x138] sm:$0xff]  }
  0x3d   :  { %1504 = vmatmul.mubr.bf16.gmra.mrb[12].mxu1 %v5221_v53  ;;  %5804 = vmatpush3.bf16.msra.mxu0 %v6371_v34  ;;  %v56_v53 = vld [vmem:[%s8672_s0 + $0xe8] sm:$0x11] }
  0x3e   :  { %1511 = vmatprep.mubr.bf16.mxu1 %v5224_v21  ;;  %v215_v50 = vsel %vm6707_vm2, %v6929_v39, %v214_v26  ;;  %v254_v11 = vshll.u32 %v56_v53, 16  ;;  %5805 = vmatprep.subr.bf16.mxu0 %v6376_v3  ;;  %v6977_v17 = vrot.slane %v237_v10, 4  ;;  %v6987_v21 = vld [vmem:[%s8672_s0 + $0xf0] sm:$0xff]  ;;  %v6992_v26 = vld [vmem:[%s8672_s0 + $0x100] sm:$0xff]  ;;  %v5183_v10 = vld [vmem:[%s8672_s0 + $0x18] sm:$0x11] }
  0x3f   :  { %v5226_v7 = vcombine.high %v215_v50, %v229_v63  ;;  %v5225_v16 = vcombine.low %v215_v50, %v229_v63  ;;  %v259_v28 = vshrl.u32 %v6987_v21, 16  ;;  %v262_v32 = vshll.u32 %v6987_v21, 16  ;;  %5870 = vmatpush3.bf16.msra.mxu1 %v6379_v20  ;;  %v6382_v50 = vld [vmem:[%s8671_s1 + $0x178] sm:$0xff]  }
  0x40   :  { %v256_v18 = vrot.slane %v254_v11, 5  ;;  %v273_v34 = vshrl.u32 %v6992_v26, 16  ;;  %v243_v36 = vsel %vm6707_vm2, %v6977_v17, %v242_v8  ;;  %v5214_v40 = vcombine.high %v6987_v21, %v6992_v26 }
  0x41   :  { %5806 = vmatpush3.bf16.msra.mxu0 %v6377_v12  ;;  %v261_v47 = vrot.slane %v259_v28, 4  ;;  %v5243_v3 = vcombine.low %v6944_v44, %v6987_v21  ;;  %v5184_v12 = vld [vmem:[%s8672_s0 + $0x28] sm:$0x11]  ;;  %v5213_v20 = vcombine.low %v6987_v21, %v6992_v26 }
  0x42   :  { %v275_v49 = vrot.slane %v273_v34, 4  ;;  %5807 = vmatprep.subr.bf16.mxu0 %v6382_v50 }
  0x43   :  { %1415 = vmatmul.mubr.bf16.gmra.mrb[16].mxu0 %v5207_v2  ;;  %v247_v2 = vrot.slane %v245_v48, 4  ;;  %v264_v48 = vrot.slane %v262_v32, 5  ;;  %v5232_v32 = vcombine.high %v6684_v33, %v6716_v58 }
  0x44   :  { %1422 = vmatprep.mubr.bf16.mxu0 %v5210_v13 }
  0x45   :  { %1512 = vmatmul.mubr.bf16.gmra.mrb[16].mxu1 %v5223_v38  ;;  %v251_v13 = vor.u32 %v250_v9, %v247_v2  ;;  %v276_v38 = vshll.u32 %v6992_v26, 16  ;;  %v265_v62 = vor.u32 %v264_v48, %v261_v47  ;;  %v6384_v2 = vld [vmem:[%s8671_s1 + $0x1f8] sm:$0xff]   ;;  %5808 = vmatpush3.bf16.msra.mxu0 %v6383_v0 }
  0x46   :  { %1519 = vmatprep.mubr.bf16.mxu1 %v5226_v7  ;;  %v6385_v9 = vld [vmem:[%s8671_s1 + $0x1b8] sm:$0xff]   ;;  %5871 = vmatprep.subr.bf16.mxu1 %v6384_v2 }
  0x47   :  { %v6994_v27 = vrot.slane %v251_v13, 4  ;;  %v278_v53 = vrot.slane %v276_v38, 5  ;;  %v7025_v7 = vrot.slane %v265_v62, 4  ;;  %v329_v13 = vshll.u32 %v5183_v10, 16  ;;  %5872 = vmatpush3.bf16.msra.mxu1 %v6385_v9  ;;  %v5186_v38 = vld [vmem:[%s8672_s0 + $0x48] sm:$0x11] }
  0x48   :  { %v5187_v48 = vld [vmem:[%s8672_s0 + $0x58] sm:$0x11]  ;;  %v5233_v9 = vcombine.low %v6721_v59, %v6760_v23 }
  0x49   :  { %v257_v46 = vsel %vm6707_vm2, %v6994_v27, %v256_v18  ;;  %v279_v1 = vor.u32 %v278_v53, %v275_v49  ;;  %v343_v18 = vshll.u32 %v5184_v12, 16  ;;  %v331_v34 = vrot.slane %v329_v13, 5  ;;  %v5188_v49 = vld [vmem:[%s8672_s0 + $0x68] sm:$0x11]  ;;  %v5174_v53 = vld [vmem:[%s8672_s0 + $0x80] sm:$0xff] }
  0x4a   :  { %v5228_v51 = vcombine.high %v243_v36, %v257_v46  ;;  %v5227_v14 = vcombine.low %v243_v36, %v257_v46  ;;  %v5185_v36 = vld [vmem:[%s8672_s0 + $0x38] sm:$0x11]  ;;  %v371_v46 = vshll.u32 %v5186_v38, 16  ;;  %v385_v62 = vshll.u32 %v5187_v48, 16 }
  0x4b   :  { %1423 = vmatmul.mubr.bf16.gmra.mrb[20].mxu0 %v5209_v41  ;;  %v58_v41 = vld [vmem:[%s8672_s0 + $0x108] sm:$0x11]  ;;  %v7033_v11 = vrot.slane %v279_v1, 4  ;;  %v345_v35 = vrot.slane %v343_v18, 5  ;;  %v421_v1 = vshll.u32 %v5174_v53, 16  ;;  %v5236_v12 = vcombine.high %v6767_v25, %v6806_v54 }
  0x4c   :  { %1430 = vmatprep.mubr.bf16.mxu0 %v5212_v52  ;;  %v270_v52 = vrot.slane %v268_v42, 5  ;;  %v282_v63 = vshll.u32 %v58_v41, 16  ;;  %v357_v42 = vshll.u32 %v5185_v36, 16  ;;  %v387_v10 = vrot.slane %v385_v62, 5 }
  0x4d   :  { %1520 = vmatmul.mubr.bf16.gmra.mrb[20].mxu1 %v5225_v16  ;;  %v346_v41 = vsel %vm6707_vm2, %v6762_v24, %v345_v35  ;;  %v373_v24 = vrot.slane %v371_v46, 5  ;;  %v5238_v35 = vcombine.high %v6813_v60, %v5174_v53  ;;  %v5237_v48 = vcombine.low %v6813_v60, %v5174_v53 }
  0x4e   :  { %1527 = vmatprep.mubr.bf16.mxu1 %v5228_v51  ;;  %v284_v8 = vrot.slane %v282_v63, 5  ;;  %v271_v16 = vsel %vm6707_vm2, %v7025_v7, %v270_v52  ;;  %v5231_v51 = vcombine.low %v6684_v33, %v6716_v58  ;;  %v359_v52 = vrot.slane %v357_v42, 5 }
  0x4f   :  { %v399_v63 = vshll.u32 %v5188_v49, 16  ;;  %v374_v33 = vsel %vm6707_vm2, %v6808_v56, %v373_v24  ;;  %v418_v58 = vshrl.u32 %v5174_v53, 16  ;;  %v5190_v56 = vld [vmem:[%s8672_s0 + $0x88] sm:$0x11]  ;;  %v5240_v49 = vcombine.high %v6857_v30, %v6892_v4 }
  0x50   :  { %v360_v0 = vsel %vm6707_vm2, %v6774_v29, %v359_v52  ;;  %v5189_v29 = vld [vmem:[%s8672_s0 + $0x78] sm:$0x11]  ;;  %v5244_v30 = vcombine.high %v6944_v44, %v6987_v21  ;;  %v6402_v44 = vld [vmem:[%s8673_s2 + $0x40] sm:$0xff]  }
  0x51   :  { %v401_v13 = vrot.slane %v399_v63, 5  ;;  %v413_v18 = vshll.u32 %v5189_v29, 16  ;;  %v6403_v21 = vld [vmem:[%s8673_s2 + $0xc0] sm:$0xff]   ;;  %5921 = vmatprep.subr.bf16.mxu0 %v6402_v44 }
  0x52   :  { %5985 = vmatprep.subr.bf16.mxu1 %v6403_v21 }
  0x53   :  { %1431 = vmatmul.mubr.bf16.gmra.mrb[24].mxu0 %v5211_v19  ;;  %v285_v19 = vsel %vm6707_vm2, %v7033_v11, %v284_v8  ;;  %v5250_v8 = vcombine.high %v360_v0, %v374_v33  ;;  %v415_v36 = vrot.slane %v413_v18, 5 }
  0x54   :  { %1438 = vmatprep.mubr.bf16.mxu0 %v5214_v40  ;;  %v5230_v28 = vcombine.high %v271_v16, %v285_v19  ;;  %v332_v40 = vsel %vm6707_vm2, %v6711_v57, %v331_v34  ;;  %v5229_v47 = vcombine.low %v271_v16, %v285_v19  ;;  %v5234_v57 = vcombine.high %v6721_v59, %v6760_v23 }
  0x55   :  { %1528 = vmatmul.mubr.bf16.gmra.mrb[24].mxu1 %v5227_v14  ;;  %v5248_v50 = vcombine.high %v332_v40, %v346_v41  ;;  %v5247_v2 = vcombine.low %v332_v40, %v346_v41  ;;  %v420_v14 = vrot.slane %v418_v58, 4  ;;  %v423_v16 = vrot.slane %v421_v1, 5  ;;  %v5195_v1 = vld [vmem:[%s8672_s0 + $0xe8] sm:$0x11] }
  0x56   :  { %1535 = vmatprep.mubr.bf16.mxu1 %v5230_v28  ;;  %v388_v59 = vsel %vm6707_vm2, %v6815_v61, %v387_v10  ;;  %v402_v23 = vsel %vm6707_vm2, %v6846_v22, %v401_v13  ;;  %v5249_v28 = vcombine.low %v360_v0, %v374_v33  ;;  %v5235_v34 = vcombine.low %v6767_v25, %v6806_v54  ;;  %v5191_v61 = vld [vmem:[%s8672_s0 + $0xa8] sm:$0x11]  ;;  %v5192_v22 = vld [vmem:[%s8672_s0 + $0xb8] sm:$0x11] }
  0x57   :  { %v424_v19 = vor.u32 %v423_v16, %v420_v14  ;;  %v416_v25 = vsel %vm6707_vm2, %v6859_v31, %v415_v36  ;;  %v441_v41 = vshll.u32 %v5191_v61, 16  ;;  %v455_v42 = vshll.u32 %v5192_v22, 16  ;;  %v5194_v31 = vld [vmem:[%s8672_s0 + $0xd8] sm:$0x11]  ;;  %v6407_v61 = vld [vmem:[%s8673_s2 + $0xc8] sm:$0xff]  }
  0x58   :  { %v5251_v46 = vcombine.low %v388_v59, %v402_v23  ;;  %v483_v53 = vshll.u32 %v5194_v31, 16  ;;  %v5242_v0 = vcombine.high %v6897_v5, %v6939_v43  ;;  %v6408_v22 = vld [vmem:[%s8673_s2 + $0x8] sm:$0xff]  }
  0x59   :  { %v425_v38 = vrot.slane %v424_v19, 4  ;;  %v1831_v31 = vld [vmem:[#allocation2 + $0xc] sm:$0x1] }
  0x5a   :  { %v485_v58 = vrot.slane %v483_v53, 5  ;;  %v1772_v53 = vld [vmem:[#allocation2 + $0x10] sm:$0x1] }
  0x5b   :  { %1439 = vmatmul.mubr.bf16.gmra.mrb[28].mxu0 %v5213_v20  ;;  %v427_v20 = vshll.u32 %v5190_v56, 16 }
  0x5c   :  { %1576 = vmatprep.mubr.bf16.mxu0 %v5232_v32  ;;  %v5252_v32 = vcombine.high %v388_v59, %v402_v23  ;;  %v486_v10 = vsel %vm6707_vm2, %v6977_v17, %v485_v58  ;;  %v5197_v59 = vld [vmem:[%s8672_s0 + $0x108] sm:$0x11]  ;;  %v6421_v58 = vld [vmem:[%s8673_s2 + $0xa0] sm:$0xff]  }
  0x5d   :  { %1536 = vmatmul.mubr.bf16.gmra.mrb[28].mxu1 %v5229_v47  ;;  %v429_v40 = vrot.slane %v427_v20, 5  ;;  %v525_v18 = vshll.u32 %v5197_v59, 16  ;;  %v6429_v59 = vld [vmem:[%s8673_s2 + $0xb0] sm:$0xff]  }
  0x5e   :  { %1673 = vmatprep.mubr.bf16.mxu1 %v5248_v50  ;;  %v443_v50 = vrot.slane %v441_v41, 5  ;;  %v6411_v41 = vld [vmem:[%s8673_s2 + $0xd0] sm:$0xff]  }
  0x5f   :  { %v430_v54 = vsel %vm6707_vm2, %v425_v38, %v429_v40 }
  0x60   :  { %v5254_v47 = vcombine.high %v416_v25, %v430_v54  ;;  %v444_v60 = vsel %vm6707_vm2, %v6899_v6, %v443_v50  ;;  %v5253_v62 = vcombine.low %v416_v25, %v430_v54  ;;  %v5196_v6 = vld [vmem:[%s8672_s0 + $0xf8] sm:$0x11]  ;;  %v6409_v25 = vld [vmem:[%s8673_s2 + $0x88] sm:$0xff]   ;;  %v6410_v54 = vld [vmem:[%s8673_s2 + $0x50] sm:$0xff]  }
  0x61   :  { %v6417_v50 = vld [vmem:[%s8673_s2 + $0x98] sm:$0xff]  }
  0x63   :  { %1577 = vmatmul.mubr.bf16.vlgmr.msra.gmra.mrb[32].mxu0 %v5231_v51  ;;  %v457_v51 = vrot.slane %v455_v42, 5  ;;  %v6412_v42 = vld [vmem:[%s8673_s2 + $0x10] sm:$0xff]  }
  0x64   :  { %1584 = vmatprep.mubr.bf16.mxu0 %v5234_v57  ;;  %v5193_v57 = vld [vmem:[%s8672_s0 + $0xc8] sm:$0x11] }
  0x65   :  { %1674 = vmatmul.mubr.bf16.vlgmr.msra.gmra.mrb[32].mxu1 %v5247_v2  ;;  %v458_v52 = vsel %vm6707_vm2, %v6929_v39, %v457_v51  ;;  %v469_v24 = vshll.u32 %v5193_v57, 16  ;;  %v5182_v39 = vld [vmem:[%s8672_s0 + $0x110] sm:$0xff]  ;;  %v497_v2 = vshll.u32 %v5195_v1, 16  ;;  %v1769_v51 = vld [vmem:[#allocation2 + $0x8] sm:$0x1]  ;;  %v6541_v1 = vmov 0  }
  0x66   :  { %1681 = vmatprep.mubr.bf16.mxu1 %v5250_v8  ;;  %v5256_v63 = vcombine.high %v444_v60, %v458_v52  ;;  %v511_v8 = vshll.u32 %v5196_v6, 16  ;;  %v533_v13 = vshll.u32 %v5182_v39, 16  ;;  %v5255_v14 = vcombine.low %v444_v60, %v458_v52  ;;  %1754 = vst [vmem:[#allocation2] sm:$0xf] %v6541_v1  ;;  %1755 = vst [vmem:[#allocation2 + $0x4] sm:$0x1] %v6541_v1 }
  0x67   :  { %v471_v33 = vrot.slane %v469_v24, 5  ;;  %v499_v29 = vrot.slane %v497_v2, 5  ;;  %v5245_v38 = vcombine.low %v6992_v26, %v5182_v39  ;;  %v1770_v60 = vsel %vm7219_vm5, 0, %v1769_v51  ;;  %1756 = vst [vmem:[#allocation2 + $0x50] sm:$0xf] %v6541_v1  ;;  %v6437_v51 = vld [vmem:[%s8673_s2 + $0x140] sm:$0xff]  }
  0x68   :  { %v513_v4 = vrot.slane %v511_v8, 5  ;;  %v535_v56 = vrot.slane %v533_v13, 5  ;;  %v8697_v52 = vmov 0  ;;  %1771 = vst [vmem:[#allocation2 + $0x8] sm:$0x1] %v1770_v60  ;;  %v1832_v24 = vsel %vm7226_vm7, 0, %v1831_v31 }
  0x69   :  { %v500_v17 = vsel %vm6707_vm2, %v6994_v27, %v499_v29  ;;  %v8698_v52 = vsel %vm7226_vm7, 4294967295, %v8697_v52  ;;  %1833 = vst [vmem:[#allocation2 + $0xc] sm:$0x1] %v1832_v24  ;;  %1757 = vst [vmem:[#allocation2 + $0x54] sm:$0x1] %v6541_v1  ;;  %v6423_v29 = vld [vmem:[%s8673_s2 + $0xe8] sm:$0xff]  }
  0x6a   :  { %v514_v23 = vsel %vm6707_vm2, %v7025_v7, %v513_v4  ;;  %8699 = vst [vmem:[#allocation3_spill] sm:$0xff] %v8698_v52  ;;  %1759 = vst [vmem:[#allocation2 + $0x48] sm:$0xf] %v6541_v1  ;;  %v1775_v6 = vld [vmem:[#allocation2 + $0x18] sm:$0x1]  ;;  %v6438_v31 = vld [vmem:[%s8673_s2 + $0x1c0] sm:$0xff]  }
  0x6b   :  { %1585 = vmatmul.mubr.bf16.gmra.mrb[36].mxu0 %v5233_v9  ;;  %v472_v9 = vsel %vm6707_vm2, %v6946_v45, %v471_v33  ;;  %v5198_v45 = vld [vmem:[%s8672_s0 + $0x118] sm:$0x11]  ;;  %v5259_v27 = vcombine.low %v500_v17, %v514_v23  ;;  %v6419_v33 = vld [vmem:[%s8673_s2 + $0xe0] sm:$0xff]   ;;  %1760 = vst [vmem:[#allocation2 + $0x4c] sm:$0x1] %v6541_v1  ;;  %v1776_v2 = vsel %vm7219_vm5, 0, %v1775_v6 }
  0x6c   :  { %1592 = vmatprep.mubr.bf16.mxu0 %v5236_v12  ;;  %v530_v12 = vshrl.u32 %v5182_v39, 16  ;;  %v5258_v16 = vcombine.high %v472_v9, %v486_v10  ;;  %v539_v20 = vshll.u32 %v5198_v45, 16  ;;  %1761 = vst [vmem:[#allocation2 + $0x98] sm:$0xf] %v6541_v1  ;;  %1762 = vst [vmem:[#allocation2 + $0x9c] sm:$0x1] %v6541_v1 }
  0x6d   :  { %1682 = vmatmul.mubr.bf16.gmra.mrb[36].mxu1 %v5249_v28  ;;  %v5257_v28 = vcombine.low %v472_v9, %v486_v10  ;;  %1777 = vst [vmem:[#allocation2 + $0x18] sm:$0x1] %v1776_v2  ;;  %v6418_v9 = vld [vmem:[%s8673_s2 + $0x60] sm:$0xff]   ;;  %v1781_v45 = vld [vmem:[#allocation2 + $0x28] sm:$0x1] }
  0x6e   :  { %1689 = vmatprep.mubr.bf16.mxu1 %v5252_v32  ;;  %v5260_v32 = vcombine.high %v500_v17, %v514_v23  ;;  %v541_v5 = vrot.slane %v539_v20, 5  ;;  %v6420_v10 = vld [vmem:[%s8673_s2 + $0x20] sm:$0xff]   ;;  %v6422_v17 = vld [vmem:[%s8673_s2 + $0x68] sm:$0xff]   ;;  %v1782_v23 = vsel %vm7219_vm5, 0, %v1781_v45  ;;  %v1808_v45 = vld [vmem:[#allocation2 + $0x70] sm:$0x1] }
  0x6f   :  { %v1840_v13 = vld [vmem:[#allocation2 + $0x24] sm:$0x1]  ;;  %v6424_v20 = vld [vmem:[%s8673_s2 + $0x28] sm:$0xff]   ;;  %1783 = vst [vmem:[#allocation2 + $0x28] sm:$0x1] %v1782_v23  ;;  %v1809_v23 = vsel %vm7219_vm5, 0, %v1808_v45 }
  0x70   :  { %v1828_v4 = vld [vmem:[#allocation2 + $0x4] sm:$0x1]  ;;  %1810 = vst [vmem:[#allocation2 + $0x70] sm:$0x1] %v1809_v23 }
  0x73   :  { %1593 = vmatmul.mubr.bf16.gmra.mrb[40].mxu0 %v5235_v34  ;;  %v5246_v34 = vcombine.high %v6992_v26, %v5182_v39  ;;  %v6405_v26 = vld [vmem:[%s8673_s2 + $0x80] sm:$0xff]   ;;  %v1837_v39 = vld [vmem:[#allocation2 + $0x1c] sm:$0x1] }
  0x74   :  { %1600 = vmatprep.mubr.bf16.mxu0 %v5238_v35  ;;  %v527_v35 = vrot.slane %v525_v18, 5  ;;  %5986 = vmatpush3.bf16.msra.mxu1 %v6405_v26  ;;  %v1838_v8 = vsel %vm7226_vm7, 0, %v1837_v39  ;;  %v1843_v18 = vld [vmem:[#allocation2 + $0x2c] sm:$0x1]  ;;  %v1790_v26 = vld [vmem:[#allocation2 + $0x40] sm:$0x1] }
  0x75   :  { %1690 = vmatmul.mubr.bf16.gmra.mrb[40].mxu1 %v5251_v46  ;;  %5987 = vmatprep.subr.bf16.mxu1 %v6407_v61  ;;  %v6413_v46 = vld [vmem:[%s8673_s2 + $0x90] sm:$0xff]   ;;  %1839 = vst [vmem:[#allocation2 + $0x1c] sm:$0x1] %v1838_v8  ;;  %v1791_v61 = vsel %vm7219_vm5, 0, %v1790_v26  ;;  %v7333_v39 = vld [vmem:[%s8674_s3] ss:$0 sm:$0xff] }
  0x76   :  { %1697 = vmatprep.mubr.bf16.mxu1 %v5254_v47  ;;  %v528_v43 = vsel %vm6707_vm2, %v7033_v11, %v527_v35  ;;  %v6406_v11 = vld [vmem:[%s8673_s2 + $0x48] sm:$0xff]   ;;  %v6414_v47 = vld [vmem:[%s8673_s2 + $0x58] sm:$0xff]   ;;  %1792 = vst [vmem:[#allocation2 + $0x40] sm:$0x1] %v1791_v61 }
  0x78   :  { %5988 = vmatpush3.bf16.msra.mxu1 %v6409_v25  ;;  %v6434_v25 = vld [vmem:[%s8673_s2 + $0x38] sm:$0xff]  }
  0x79   :  { %5989 = vmatprep.subr.bf16.mxu1 %v6411_v41 }
  0x7b   :  { %1601 = vmatmul.mubr.bf16.gmra.mrb[44].mxu0 %v5237_v48  ;;  %v6415_v48 = vld [vmem:[%s8673_s2 + $0xd8] sm:$0xff]  }
  0x7c   :  { %1608 = vmatprep.mubr.bf16.mxu0 %v5240_v49  ;;  %5990 = vmatpush3.bf16.msra.mxu1 %v6413_v46  ;;  %v6416_v49 = vld [vmem:[%s8673_s2 + $0x18] sm:$0xff]  }
  0x7d   :  { %1698 = vmatmul.mubr.bf16.gmra.mrb[44].mxu1 %v5253_v62  ;;  %5991 = vmatprep.subr.bf16.mxu1 %v6415_v48  ;;  %v1834_v62 = vld [vmem:[#allocation2 + $0x14] sm:$0x1]  ;;  %v1864_v48 = vld [vmem:[#allocation2 + $0x64] sm:$0x1] }
  0x7e   :  { %1705 = vmatprep.mubr.bf16.mxu1 %v5256_v63  ;;  %v1773_v63 = vsel %vm7219_vm5, 0, %v1772_v53  ;;  %v1805_v53 = vld [vmem:[#allocation2 + $0x68] sm:$0x1] }
  0x7f   :  { %1774 = vst [vmem:[#allocation2 + $0x10] sm:$0x1] %v1773_v63 }
  0x80   :  { %5992 = vmatpush3.bf16.msra.mxu1 %v6417_v50  ;;  %v1865_v50 = vsel %vm7226_vm7, 0, %v1864_v48 }
  0x81   :  { %5993 = vmatprep.subr.bf16.mxu1 %v6419_v33  ;;  %1866 = vst [vmem:[#allocation2 + $0x64] sm:$0x1] %v1865_v50  ;;  %v1806_v33 = vsel %vm7219_vm5, 0, %v1805_v53 }
  0x82   :  { %1807 = vst [vmem:[#allocation2 + $0x68] sm:$0x1] %v1806_v33  ;;  %v1876_v33 = vld [vmem:[#allocation2 + $0x84] sm:$0x1] }
  0x83   :  { %1609 = vmatmul.mubr.bf16.gmra.mrb[48].mxu0 %v5239_v37  ;;  %v532_v37 = vrot.slane %v530_v12, 4  ;;  %v1778_v12 = vld [vmem:[#allocation2 + $0x20] sm:$0x1] }
  0x84   :  { %1616 = vmatprep.mubr.bf16.mxu0 %v5242_v0  ;;  %v1835_v0 = vsel %vm7226_vm7, 0, %v1834_v62  ;;  %5994 = vmatpush3.bf16.msra.mxu1 %v6421_v58  ;;  %v1867_v62 = vld [vmem:[#allocation2 + $0x6c] sm:$0x1] }
  0x85   :  { %1706 = vmatmul.mubr.bf16.gmra.mrb[48].mxu1 %v5255_v14  ;;  %v536_v19 = vor.u32 %v535_v56, %v532_v37  ;;  %1836 = vst [vmem:[#allocation2 + $0x14] sm:$0x1] %v1835_v0  ;;  %v1779_v14 = vsel %vm7219_vm5, 0, %v1778_v12  ;;  %5995 = vmatprep.subr.bf16.mxu1 %v6423_v29  ;;  %v6427_v37 = vld [vmem:[%s8673_s2 + $0xf0] sm:$0xff]   ;;  %v1829_v56 = vsel %vm7226_vm7, 0, %v1828_v4  ;;  %v1868_v58 = vsel %vm7226_vm7, 0, %v1867_v62 }
  0x86   :  { %1713 = vmatprep.mubr.bf16.mxu1 %v5258_v16  ;;  %v1841_v16 = vsel %vm7226_vm7, 0, %v1840_v13  ;;  %1780 = vst [vmem:[#allocation2 + $0x20] sm:$0x1] %v1779_v14  ;;  %1830 = vst [vmem:[#allocation2 + $0x4] sm:$0x1] %v1829_v56 }
  0x87   :  { %v537_v36 = vrot.slane %v536_v19, 4  ;;  %1842 = vst [vmem:[#allocation2 + $0x24] sm:$0x1] %v1841_v16  ;;  %v1766_v19 = vld [vmem:[#allocation2] sm:$0x1] }
  0x88   :  { %1869 = vst [vmem:[#allocation2 + $0x6c] sm:$0x1] %v1868_v58 }
  0x8b   :  { %1617 = vmatmul.mubr.bf16.gmra.mrb[52].mxu0 %v5241_v15  ;;  %v542_v15 = vsel %vm6707_vm2, %v537_v36, %v541_v5  ;;  %v6430_v5 = vld [vmem:[%s8673_s2 + $0xf8] sm:$0xff]  }
  0x8c   :  { %1624 = vmatprep.mubr.bf16.mxu0 %v5244_v30  ;;  %v5262_v7 = vcombine.high %v528_v43, %v542_v15  ;;  %v5261_v40 = vcombine.low %v528_v43, %v542_v15  ;;  %v6425_v30 = vld [vmem:[%s8673_s2 + $0xa8] sm:$0xff]   ;;  %v6431_v43 = vld [vmem:[%s8673_s2 + $0xb8] sm:$0xff]   ;;  %v1767_v15 = vsel %vm7219_vm5, 0, %v1766_v19 }
  0x8d   :  { %1714 = vmatmul.mubr.bf16.gmra.mrb[52].mxu1 %v5257_v28  ;;  %v1844_v28 = vsel %vm7226_vm7, 0, %v1843_v18  ;;  %1768 = vst [vmem:[#allocation2] sm:$0x1] %v1767_v15  ;;  %v1870_v18 = vld [vmem:[#allocation2 + $0x74] sm:$0x1] }
  0x8e   :  { %1721 = vmatprep.mubr.bf16.mxu1 %v5260_v32  ;;  %5996 = vmatpush3.bf16.msra.mxu1 %v6425_v30  ;;  %v1784_v32 = vld [vmem:[#allocation2 + $0x30] sm:$0x1]  ;;  %1845 = vst [vmem:[#allocation2 + $0x2c] sm:$0x1] %v1844_v28 }
  0x8f   :  { %5997 = vmatprep.subr.bf16.mxu1 %v6427_v37  ;;  %v1785_v35 = vsel %vm7219_vm5, 0, %v1784_v32 }
  0x90   :  { %1786 = vst [vmem:[#allocation2 + $0x30] sm:$0x1] %v1785_v35  ;;  %v1873_v35 = vld [vmem:[#allocation2 + $0x7c] sm:$0x1] }
  0x91   :  { %v1874_v15 = vsel %vm7226_vm7, 0, %v1873_v35 }
  0x92   :  { %5998 = vmatpush3.bf16.msra.mxu1 %v6429_v59  ;;  %1875 = vst [vmem:[#allocation2 + $0x7c] sm:$0x1] %v1874_v15 }
  0x93   :  { %1625 = vmatmul.mubr.bf16.gmra.mrb[56].mxu0 %v5243_v3  ;;  %v6404_v3 = vld [vmem:[%s8673_s2] sm:$0xff]   ;;  %5999 = vmatprep.subr.bf16.mxu1 %v6430_v5 }
  0x94   :  { %1632 = vmatprep.mubr.bf16.mxu0 %v5246_v34  ;;  %5922 = vmatpush3.bf16.msra.mxu0 %v6404_v3  ;;  %v1846_v34 = vld [vmem:[#allocation2 + $0x34] sm:$0x1]  ;;  %v6432_v3 = vld [vmem:[%s8673_s2 + $0x78] sm:$0xff]  }
  0x95   :  { %1722 = vmatmul.mubr.bf16.gmra.mrb[56].mxu1 %v5259_v27  ;;  %5923 = vmatprep.subr.bf16.mxu0 %v6406_v11  ;;  %v1847_v36 = vsel %vm7226_vm7, 0, %v1846_v34  ;;  %v6426_v27 = vld [vmem:[%s8673_s2 + $0x70] sm:$0xff]   ;;  %v1852_v11 = vld [vmem:[#allocation2 + $0x44] sm:$0x1]  ;;  %v1811_v34 = vld [vmem:[#allocation2 + $0x78] sm:$0x1] }
  0x96   :  { %1729 = vmatprep.mubr.bf16.mxu1 %v5262_v7  ;;  %1848 = vst [vmem:[#allocation2 + $0x34] sm:$0x1] %v1847_v36  ;;  %v6428_v7 = vld [vmem:[%s8673_s2 + $0x30] sm:$0xff]   ;;  %6000 = vmatpush3.bf16.msra.mxu1 %v6431_v43  ;;  %v1812_v43 = vsel %vm7219_vm5, 0, %v1811_v34 }
  0x97   :  { %6113 = vmatprep.subr.bf16.mxu1 %v6438_v31  ;;  %1813 = vst [vmem:[#allocation2 + $0x78] sm:$0x1] %v1812_v43 }
  0x98   :  { %5924 = vmatpush3.bf16.msra.mxu0 %v6408_v22  ;;  %v1853_v22 = vsel %vm7226_vm7, 0, %v1852_v11 }
  0x99   :  { %5925 = vmatprep.subr.bf16.mxu0 %v6410_v54  ;;  %1854 = vst [vmem:[#allocation2 + $0x44] sm:$0x1] %v1853_v22  ;;  %v1799_v54 = vld [vmem:[#allocation2 + $0x58] sm:$0x1] }
  0x9a   :  { %v1800_v41 = vsel %vm7219_vm5, 0, %v1799_v54 }
  0x9b   :  { %1633 = vmatmul.mubr.bf16.gmra.mrb[60].mxu0 %v5245_v38  ;;  %v1787_v38 = vld [vmem:[#allocation2 + $0x38] sm:$0x1]  ;;  %1801 = vst [vmem:[#allocation2 + $0x58] sm:$0x1] %v1800_v41 }
  0x9c   :  { %5926 = vmatpush3.bf16.msra.mxu0 %v6412_v42  ;;  %v1788_v44 = vsel %vm7219_vm5, 0, %v1787_v38  ;;  %v1861_v42 = vld [vmem:[#allocation2 + $0x5c] sm:$0x1] }
  0x9d   :  { %1730 = vmatmul.mubr.bf16.gmra.mrb[60].mxu1 %v5261_v40  ;;  %5927 = vmatprep.subr.bf16.mxu0 %v6414_v47  ;;  %v1849_v40 = vld [vmem:[#allocation2 + $0x3c] sm:$0x1]  ;;  %1789 = vst [vmem:[#allocation2 + $0x38] sm:$0x1] %v1788_v44  ;;  %v1862_v46 = vsel %vm7226_vm7, 0, %v1861_v42 }
  0x9e   :  { %v1850_v21 = vsel %vm7226_vm7, 0, %v1849_v40  ;;  %1863 = vst [vmem:[#allocation2 + $0x5c] sm:$0x1] %v1862_v46  ;;  %v1802_v47 = vld [vmem:[#allocation2 + $0x60] sm:$0x1] }
  0x9f   :  { %1851 = vst [vmem:[#allocation2 + $0x3c] sm:$0x1] %v1850_v21 }
  0xa0   :  { %5928 = vmatpush3.bf16.msra.mxu0 %v6416_v49  ;;  %v1803_v49 = vsel %vm7219_vm5, 0, %v1802_v47 }
  0xa1   :  { %5929 = vmatprep.subr.bf16.mxu0 %v6418_v9  ;;  %1804 = vst [vmem:[#allocation2 + $0x60] sm:$0x1] %v1803_v49 }
  0xa4   :  { %5930 = vmatpush3.bf16.msra.mxu0 %v6420_v10 }
  0xa5   :  { %5931 = vmatprep.subr.bf16.mxu0 %v6422_v17 }
  0xa8   :  { %5932 = vmatpush3.bf16.msra.mxu0 %v6424_v20  ;;  %v1871_v20 = vsel %vm7226_vm7, 0, %v1870_v18 }
  0xa9   :  { %5933 = vmatprep.subr.bf16.mxu0 %v6426_v27  ;;  %1872 = vst [vmem:[#allocation2 + $0x74] sm:$0x1] %v1871_v20  ;;  %v1858_v20 = vld [vmem:[#allocation2 + $0x54] sm:$0x1] }
  0xaa   :  { %v1859_v35 = vsel %vm7226_vm7, 0, %v1858_v20 }
  0xab   :  { %1860 = vst [vmem:[#allocation2 + $0x54] sm:$0x1] %v1859_v35 }
  0xac   :  { %5934 = vmatpush3.bf16.msra.mxu0 %v6428_v7 }
  0xad   :  { %5935 = vmatprep.subr.bf16.mxu0 %v6432_v3 }
  0xb0   :  { %5936 = vmatpush3.bf16.msra.mxu0 %v6434_v25 }
  0xb1   :  { %6049 = vmatprep.subr.bf16.mxu0 %v6437_v51 }
  0xf6   :  { %v5681_v60 = vpop.f32.mrb[0].mxu0 }
  0xf7   :  { %v5682_v24 = vpop.f32.mrb[1].mxu0 }
  0xf8   :  { %v5683_v63 = vadd.f32 %v5682_v24, %v5681_v60  ;;  %v5684_v0 = vpop.f32.mrb[2].mxu0  ;;  %v5745_v2 = vpop.f32.mrb[0].mxu1  ;;  %v1814_v24 = vld [vmem:[#allocation2 + $0x80] sm:$0x1] }
  0xf9   :  { %v5685_v1 = vpop.f32.mrb[3].mxu0  ;;  %v5746_v9 = vpop.f32.mrb[1].mxu1 }
  0xfa   :  { %v5686_v6 = vadd.f32 %v5685_v1, %v5684_v0  ;;  %v1385_v8 = vadd.f32 %v5683_v63, %v7333_v39  ;;  %v5747_v12 = vadd.f32 %v5746_v9, %v5745_v2  ;;  %v5748_v13 = vpop.f32.mrb[2].mxu1  ;;  %v1815_v0 = vsel %vm7219_vm5, 0, %v1814_v24 }
  0xfb   :  { %v5749_v29 = vpop.f32.mrb[3].mxu1  ;;  %1816 = vst [vmem:[#allocation2 + $0x80] sm:$0x1] %v1815_v0  ;;  %v1877_v1 = vsel %vm7226_vm7, 0, %v1876_v33 }
  0xfc   :  { %v1388_v14 = vadd.f32 %v5686_v6, %v7333_v39  ;;  %v7337_v37 = vadd.f32 %v5747_v12, %v1385_v8  ;;  %v5750_v56 = vadd.f32 %v5749_v29, %v5748_v13  ;;  %1878 = vst [vmem:[#allocation2 + $0x84] sm:$0x1] %v1877_v1  ;;  %v1817_v12 = vld [vmem:[#allocation2 + $0x88] sm:$0x1]  ;;  %v1879_v13 = vld [vmem:[#allocation2 + $0x8c] sm:$0x1] }
  0xfe   :  { %v5687_v10 = vpop.f32.mrb[4].mxu0  ;;  %v7341_v19 = vadd.f32 %v5750_v56, %v1388_v14  ;;  %v1880_v56 = vsel %vm7226_vm7, 0, %v1879_v13 }
  0xff   :  { %v5688_v16 = vpop.f32.mrb[5].mxu0  ;;  %1881 = vst [vmem:[#allocation2 + $0x8c] sm:$0x1] %v1880_v56 }
 0x100   :  { %v5689_v30 = vadd.f32 %v5688_v16, %v5687_v10  ;;  %v5690_v4 = vpop.f32.mrb[6].mxu0  ;;  %v5751_v28 = vpop.f32.mrb[4].mxu1 }
 0x101   :  { %v5691_v59 = vpop.f32.mrb[7].mxu0  ;;  %v5752_v36 = vpop.f32.mrb[5].mxu1 }
 0x102   :  { %v5692_v17 = vadd.f32 %v5691_v59, %v5690_v4  ;;  %v1393_v32 = vadd.f32 %v5689_v30, %v7333_v39  ;;  %v5753_v27 = vadd.f32 %v5752_v36, %v5751_v28  ;;  %v5754_v7 = vpop.f32.mrb[6].mxu1  ;;  %v1818_v4 = vsel %vm7219_vm5, 0, %v1817_v12  ;;  %v1796_v59 = vld [vmem:[#allocation2 + $0x50] sm:$0x1] }
 0x103   :  { %v5755_v44 = vpop.f32.mrb[7].mxu1  ;;  %1819 = vst [vmem:[#allocation2 + $0x88] sm:$0x1] %v1818_v4  ;;  %v1797_v18 = vsel %vm7219_vm5, 0, %v1796_v59 }
 0x104   :  { %v1396_v38 = vadd.f32 %v5692_v17, %v7333_v39  ;;  %v7351_v26 = vadd.f32 %v5753_v27, %v1393_v32  ;;  %v5756_v11 = vadd.f32 %v5755_v44, %v5754_v7  ;;  %1798 = vst [vmem:[#allocation2 + $0x50] sm:$0x1] %v1797_v18 }
 0x106   :  { %v5693_v5 = vpop.f32.mrb[8].mxu0  ;;  %v7353_v25 = vadd.f32 %v5756_v11, %v1396_v38 }
 0x107   :  { %v5694_v40 = vpop.f32.mrb[9].mxu0 }
 0x108   :  { %v5695_v21 = vadd.f32 %v5694_v40, %v5693_v5  ;;  %v5696_v3 = vpop.f32.mrb[10].mxu0  ;;  %v5757_v54 = vpop.f32.mrb[8].mxu1 }
 0x109   :  { %v5697_v61 = vpop.f32.mrb[11].mxu0  ;;  %v5758_v42 = vpop.f32.mrb[9].mxu1 }
 0x10a   :  { %v5698_v22 = vadd.f32 %v5697_v61, %v5696_v3  ;;  %v1401_v41 = vadd.f32 %v5695_v21, %v7333_v39  ;;  %v5759_v47 = vadd.f32 %v5758_v42, %v5757_v54  ;;  %v5760_v48 = vpop.f32.mrb[10].mxu1  ;;  %v1820_v42 = vld [vmem:[#allocation2 + $0x90] sm:$0x1] }
 0x10b   :  { %v5761_v51 = vpop.f32.mrb[11].mxu1 }
 0x10c   :  { %v1404_v49 = vadd.f32 %v5698_v22, %v7333_v39  ;;  %v7357_v53 = vadd.f32 %v5759_v47, %v1401_v41  ;;  %v5762_v62 = vadd.f32 %v5761_v51, %v5760_v48  ;;  %v1821_v47 = vsel %vm7219_vm5, 0, %v1820_v42  ;;  %v1882_v48 = vld [vmem:[#allocation2 + $0x94] sm:$0x1] }
 0x10d   :  { %1822 = vst [vmem:[#allocation2 + $0x90] sm:$0x1] %v1821_v47 }
 0x10e   :  { %v5699_v46 = vpop.f32.mrb[12].mxu0  ;;  %v7363_v6 = vadd.f32 %v5762_v62, %v1404_v49 }
 0x10f   :  { %v5700_v50 = vpop.f32.mrb[13].mxu0 }
 0x110   :  { %v5701_v31 = vadd.f32 %v5700_v50, %v5699_v46  ;;  %v5702_v60 = vpop.f32.mrb[14].mxu0  ;;  %v5763_v2 = vpop.f32.mrb[12].mxu1  ;;  %v1883_v50 = vsel %vm7226_vm7, 0, %v1882_v48 }
 0x111   :  { %v5703_v63 = vpop.f32.mrb[15].mxu0  ;;  %v5764_v9 = vpop.f32.mrb[13].mxu1  ;;  %1884 = vst [vmem:[#allocation2 + $0x94] sm:$0x1] %v1883_v50 }
 0x112   :  { %v5704_v58 = vadd.f32 %v5703_v63, %v5702_v60  ;;  %v1409_v8 = vadd.f32 %v5701_v31, %v7333_v39  ;;  %v5765_v14 = vadd.f32 %v5764_v9, %v5763_v2  ;;  %v5766_v16 = vpop.f32.mrb[14].mxu1 }
 0x113   :  { %v5767_v45 = vpop.f32.mrb[15].mxu1 }
 0x114   :  { %v1412_v29 = vadd.f32 %v5704_v58, %v7333_v39  ;;  %v7373_v28 = vadd.f32 %v5765_v14, %v1409_v8  ;;  %v5768_v32 = vadd.f32 %v5767_v45, %v5766_v16 }
 0x116   :  { %v5705_v10 = vpop.f32.mrb[16].mxu0  ;;  %v7377_v5 = vadd.f32 %v5768_v32, %v1412_v29 }
 0x117   :  { %v5706_v30 = vpop.f32.mrb[17].mxu0 }
 0x118   :  { %v5707_v17 = vadd.f32 %v5706_v30, %v5705_v10  ;;  %v5708_v23 = vpop.f32.mrb[18].mxu0  ;;  %v5769_v43 = vpop.f32.mrb[16].mxu1 }
 0x119   :  { %v5709_v34 = vpop.f32.mrb[19].mxu0  ;;  %v5770_v27 = vpop.f32.mrb[17].mxu1 }
 0x11a   :  { %v5710_v36 = vadd.f32 %v5709_v34, %v5708_v23  ;;  %v1417_v15 = vadd.f32 %v5707_v17, %v7333_v39  ;;  %v5771_v38 = vadd.f32 %v5770_v27, %v5769_v43  ;;  %v5772_v40 = vpop.f32.mrb[18].mxu1 }
 0x11b   :  { %v5773_v3 = vpop.f32.mrb[19].mxu1 }
 0x11c   :  { %v1420_v44 = vadd.f32 %v5710_v36, %v7333_v39  ;;  %v7381_v22 = vadd.f32 %v5771_v38, %v1417_v15  ;;  %v5774_v54 = vadd.f32 %v5773_v3, %v5772_v40 }
 0x11e   :  { %v5711_v7 = vpop.f32.mrb[20].mxu0  ;;  %v7385_v49 = vadd.f32 %v5774_v54, %v1420_v44 }
 0x11f   :  { %v5712_v21 = vpop.f32.mrb[21].mxu0 }
 0x120   :  { %v5713_v11 = vadd.f32 %v5712_v21, %v5711_v7  ;;  %v5714_v61 = vpop.f32.mrb[22].mxu0  ;;  %v5775_v51 = vpop.f32.mrb[20].mxu1 }
 0x121   :  { %v5715_v41 = vpop.f32.mrb[23].mxu0  ;;  %v5776_v60 = vpop.f32.mrb[21].mxu1 }
 0x122   :  { %v5716_v46 = vadd.f32 %v5715_v41, %v5714_v61  ;;  %v1425_v31 = vadd.f32 %v5713_v11, %v7333_v39  ;;  %v5777_v62 = vadd.f32 %v5776_v60, %v5775_v51  ;;  %v5778_v63 = vpop.f32.mrb[22].mxu1 }
 0x123   :  { %v5779_v58 = vpop.f32.mrb[23].mxu1 }
 0x124   :  { %v1428_v0 = vadd.f32 %v5716_v46, %v7333_v39  ;;  %v7391_v8 = vadd.f32 %v5777_v62, %v1425_v31  ;;  %v5780_v9 = vadd.f32 %v5779_v58, %v5778_v63  ;;  %v7405_v46 = vld [vmem:[#allocation2] sm:$0xf] }
 0x125   :  { %v2244_v51 = vshrl.u32 %v7405_v46, 16  ;;  %v2247_v31 = vshll.u32 %v7405_v46, 16 }
 0x126   :  { %v5717_v24 = vpop.f32.mrb[24].mxu0  ;;  %v7394_v14 = vadd.f32 %v5780_v9, %v1428_v0 }
 0x127   :  { %v5718_v33 = vpop.f32.mrb[25].mxu0  ;;  %v2246_v9 = vrot.slane %v2244_v51, 4  ;;  %v2115_v51 = vld [vmem:[#allocation2 + $0x8] sm:$0xf] }
 0x128   :  { %v5719_v1 = vadd.f32 %v5718_v33, %v5717_v24  ;;  %v5720_v2 = vpop.f32.mrb[26].mxu0  ;;  %v5781_v29 = vpop.f32.mrb[24].mxu1 }
 0x129   :  { %v5721_v10 = vpop.f32.mrb[27].mxu0  ;;  %v5782_v30 = vpop.f32.mrb[25].mxu1 }
 0x12a   :  { %v1433_v12 = vadd.f32 %v5719_v1, %v7333_v39  ;;  %v5722_v13 = vadd.f32 %v5721_v10, %v5720_v2  ;;  %v5783_v56 = vadd.f32 %v5782_v30, %v5781_v29  ;;  %v5784_v59 = vpop.f32.mrb[26].mxu1  ;;  %v7414_v30 = vld [vmem:[#allocation2 + $0x4] sm:$0x1] }
 0x12b   :  { %v5785_v17 = vpop.f32.mrb[27].mxu1 }
 0x12c   :  { %v1436_v16 = vadd.f32 %v5722_v13, %v7333_v39  ;;  %v7397_v20 = vadd.f32 %v5783_v56, %v1433_v12  ;;  %v5786_v32 = vadd.f32 %v5785_v17, %v5784_v59  ;;  %v7416_v59 = vld [vmem:[#allocation2] sm:$0xe] }
 0x12e   :  { %v5723_v4 = vpop.f32.mrb[28].mxu0  ;;  %v7400_v43 = vadd.f32 %v5786_v32, %v1436_v16  ;;  %v2219_v16 = vld [vmem:[#allocation2 + $0x50] sm:$0xf] }
 0x12f   :  { %v5724_v45 = vpop.f32.mrb[29].mxu0 }
 0x130   :  { %v5725_v23 = vadd.f32 %v5724_v45, %v5723_v4  ;;  %v5726_v18 = vpop.f32.mrb[30].mxu0  ;;  %v5787_v27 = vpop.f32.mrb[28].mxu1  ;;  %v2253_v45 = vshll.u32 %v7414_v30, 16 }
 0x131   :  { %v5727_v34 = vpop.f32.mrb[31].mxu0  ;;  %v5788_v7 = vpop.f32.mrb[29].mxu1 }
 0x132   :  { %v1441_v35 = vadd.f32 %v5725_v23, %v7333_v39  ;;  %v5728_v36 = vadd.f32 %v5727_v34, %v5726_v18  ;;  %v5789_v40 = vadd.f32 %v5788_v7, %v5787_v27  ;;  %v5790_v44 = vpop.f32.mrb[30].mxu1  ;;  %v2356_v18 = vshrl.u32 %v2219_v16, 16 }
 0x133   :  { %v5791_v3 = vpop.f32.mrb[31].mxu1  ;;  %v2520_v27 = vrot.slane %v7414_v30, 5 }
 0x134   :  { %v1444_v15 = vadd.f32 %v5728_v36, %v7333_v39  ;;  %v7403_v54 = vadd.f32 %v5789_v40, %v1441_v35  ;;  %v5792_v41 = vadd.f32 %v5791_v3, %v5790_v44 }
 0x136   :  { %v5809_v38 = vpop.f32.mrb[32].mxu0  ;;  %v7408_v50 = vadd.f32 %v5792_v41, %v1444_v15 }
 0x137   :  { %v5810_v21 = vpop.f32.mrb[33].mxu0 }
 0x138   :  { %v5811_v11 = vadd.f32 %v5810_v21, %v5809_v38  ;;  %v5812_v61 = vpop.f32.mrb[34].mxu0  ;;  %v5873_v60 = vpop.f32.mrb[32].mxu1 }
 0x139   :  { %v5813_v42 = vpop.f32.mrb[35].mxu0  ;;  %v5874_v24 = vpop.f32.mrb[33].mxu1 }
 0x13a   :  { %v1579_v47 = vadd.f32 %v5811_v11, %v7337_v37  ;;  %v5814_v48 = vadd.f32 %v5813_v42, %v5812_v61  ;;  %v5875_v63 = vadd.f32 %v5874_v24, %v5873_v60  ;;  %v5876_v0 = vpop.f32.mrb[34].mxu1  ;;  %v2249_v37 = vrot.slane %v2247_v31, 5 }
 0x13b   :  { %v5877_v58 = vpop.f32.mrb[35].mxu1  ;;  %v7426_v42 = vrot.slane %v2356_v18, 4 }
 0x13c   :  { %v1582_v39 = vadd.f32 %v5814_v48, %v7341_v19  ;;  %v1676_v10 = vadd.f32 %v5875_v63, %v1579_v47  ;;  %v5878_v12 = vadd.f32 %v5877_v58, %v5876_v0  ;;  %v2250_v23 = vor.u32 %v2249_v37, %v2246_v9  ;;  %v2118_v63 = vld [vmem:[#allocation2 + $0xc] sm:$0x1] }
 0x13d   :  { %v2359_v47 = vshll.u32 %v2219_v16, 16  ;;  %v2235_v16 = vld [vmem:[#allocation2 + $0x54] sm:$0x1] }
 0x13e   :  { %v5815_v62 = vpop.f32.mrb[36].mxu0  ;;  %v1738_v4 = vmax.f32 %v1676_v10, 0.0  ;;  %v1679_v56 = vadd.f32 %v5878_v12, %v1582_v39  ;;  %v7424_v41 = vrot.slane %v2250_v23, 4 }
 0x13f   :  { %v5816_v33 = vpop.f32.mrb[37].mxu0 }
 0x140   :  { %v5817_v1 = vadd.f32 %v5816_v33, %v5815_v62  ;;  %v5818_v2 = vpop.f32.mrb[38].mxu0  ;;  %v5586_v32 = vpack.c.bf16 %v1738_v4, %v1738_v4  ;;  %v1739_v34 = vmax.f32 %v1679_v56, 0.0  ;;  %v5879_v35 = vpop.f32.mrb[36].mxu1  ;;  %v2121_v33 = vld [vmem:[#allocation2 + $0x10] sm:$0xf]  ;;  %v2361_v56 = vrot.slane %v2359_v47, 5 }
 0x141   :  { %v5819_v13 = vpop.f32.mrb[39].mxu0  ;;  %v5880_v36 = vpop.f32.mrb[37].mxu1  ;;  %v2475_v4 = vld [vmem:[#allocation2 + $0x50] sm:$0xe] }
 0x142   :  { %v1587_v19 = vadd.f32 %v5817_v1, %v7351_v26  ;;  %v5820_v29 = vadd.f32 %v5819_v13, %v5818_v2  ;;  %v5344_v26 = vrot.slane %v7416_v59, 9  ;;  %v1953_v7 = vshrl.u32 %v5586_v32, 16  ;;  %v5882_v44 = vpop.f32.mrb[38].mxu1  ;;  %v6526_v13 = vld [vmem:[%s8672_s0 + $0xd4] ss:$16 sps:$4 sm:$0xff]  }
 0x143   :  { %v5587_v38 = vpack.c.bf16 %v1739_v34, %v1739_v34  ;;  %v5881_v40 = vadd.f32 %v5880_v36, %v5879_v35  ;;  %v5883_v3 = vpop.f32.mrb[39].mxu1  ;;  %v1956_v39 = vshll.u32 %v5586_v32, 16  ;;  %v2365_v59 = vshll.u32 %v2235_v16, 16 }
 0x144   :  { %v1590_v17 = vadd.f32 %v5820_v29, %v7353_v25  ;;  %v7422_v25 = vrot.slane %v2253_v45, 5  ;;  %v1955_v48 = vrot.slane %v1953_v7, 7  ;;  %v5884_v58 = vadd.f32 %v5883_v3, %v5882_v44 }
 0x145   :  { %v1961_v31 = vshrl.u32 %v5587_v38, 16  ;;  %v1684_v60 = vadd.f32 %v5881_v40, %v1587_v19  ;;  %v1964_v0 = vshll.u32 %v5587_v38, 16  ;;  %v2124_v19 = vld [vmem:[#allocation2 + $0x14] sm:$0x1]  ;;  %v5352_v3 = vrot.slane %v2475_v4, 9 }
 0x146   :  { %v5821_v15 = vpop.f32.mrb[40].mxu0  ;;  %v1958_v9 = vor.u32 %v1956_v39, %v1955_v48  ;;  %v1959_v37 = vrot.slane %v1955_v48, 4  ;;  %v1687_v29 = vadd.f32 %v5884_v58, %v1590_v17  ;;  %v2552_v48 = vrot.slane %v2235_v16, 5  ;;  %v2127_v39 = vld [vmem:[#allocation2 + $0x18] sm:$0xf] }
 0x147   :  { %v5822_v21 = vpop.f32.mrb[41].mxu0  ;;  %v1963_v10 = vrot.slane %v1961_v31, 7  ;;  %v1740_v12 = vmax.f32 %v1684_v60, 0.0 }
 0x148   :  { %v5823_v11 = vadd.f32 %v5822_v21, %v5821_v15  ;;  %v5824_v61 = vpop.f32.mrb[42].mxu0  ;;  %v2119_v45 = vsel %vm7219_vm5, %v1959_v37, %v2118_v63  ;;  %v5885_v32 = vpop.f32.mrb[40].mxu1  ;;  %v1741_v35 = vmax.f32 %v1687_v29, 0.0  ;;  %v2362_v63 = vor.u32 %v2361_v56, %v7426_v42 }
 0x149   :  { %v5825_v24 = vpop.f32.mrb[43].mxu0  ;;  %v1966_v23 = vor.u32 %v1964_v0, %v1963_v10  ;;  %v1967_v18 = vrot.slane %v1963_v10, 4  ;;  %2120 = vst [vmem:[#allocation2 + $0xc] sm:$0x1] %v2119_v45  ;;  %v5588_v34 = vpack.c.bf16 %v1740_v12, %v1740_v12  ;;  %v5886_v36 = vpop.f32.mrb[41].mxu1  ;;  %v7459_v0 = vrot.slane %v2365_v59, 5 }
 0x14a   :  { %v1595_v1 = vadd.f32 %v5823_v11, %v7357_v53  ;;  %v5826_v2 = vadd.f32 %v5825_v24, %v5824_v61  ;;  %v2116_v53 = vsel %vm7430_vm11, %v1958_v9, %v2115_v51  ;;  %v5887_v40 = vadd.f32 %v5886_v36, %v5885_v32  ;;  %v5888_v44 = vpop.f32.mrb[42].mxu1  ;;  %v2130_v51 = vld [vmem:[#allocation2 + $0x1c] sm:$0x1]  ;;  %v2133_v10 = vld [vmem:[#allocation2 + $0x20] sm:$0xf] }
 0x14b   :  { %2117 = vst [vmem:[#allocation2 + $0x8] sm:$0xf] %v2116_v53  ;;  %v2122_v7 = vsel %vm7430_vm11, %v1966_v23, %v2121_v33  ;;  %v2125_v38 = vsel %vm7219_vm5, %v1967_v18, %v2124_v19  ;;  %v1969_v11 = vshrl.u32 %v5588_v34, 16  ;;  %v1972_v58 = vshll.u32 %v5588_v34, 16  ;;  %v2136_v12 = vld [vmem:[#allocation2 + $0x24] sm:$0x1] }
 0x14c   :  { %v1598_v30 = vadd.f32 %v5826_v2, %v7363_v6  ;;  %v7448_v6 = vsel %vm7437_vm12, %v5344_v26, %v2520_v27  ;;  %2123 = vst [vmem:[#allocation2 + $0x10] sm:$0xf] %v2122_v7  ;;  %2126 = vst [vmem:[#allocation2 + $0x14] sm:$0x1] %v2125_v38  ;;  %v5589_v26 = vpack.c.bf16 %v1741_v35, %v1741_v35  ;;  %v5889_v27 = vpop.f32.mrb[43].mxu1 }
 0x14d   :  { %v1692_v31 = vadd.f32 %v5887_v40, %v1595_v1  ;;  %v5890_v60 = vadd.f32 %v5889_v27, %v5888_v44  ;;  %v1971_v33 = vrot.slane %v1969_v11, 7  ;;  %v7464_v45 = vsel %vm7437_vm12, %v5352_v3, %v2552_v48 }
 0x14e   :  { %v5827_v17 = vpop.f32.mrb[44].mxu0  ;;  %v1977_v2 = vshrl.u32 %v5589_v26, 16  ;;  %v1980_v37 = vshll.u32 %v5589_v26, 16 }
 0x14f   :  { %v5828_v21 = vpop.f32.mrb[45].mxu0  ;;  %v1742_v19 = vmax.f32 %v1692_v31, 0.0  ;;  %v1695_v29 = vadd.f32 %v5890_v60, %v1598_v30  ;;  %v1974_v4 = vor.u32 %v1972_v58, %v1971_v33  ;;  %v1975_v53 = vrot.slane %v1971_v33, 4  ;;  %v2142_v33 = vld [vmem:[#allocation2 + $0x2c] sm:$0x1] }
 0x150   :  { %v5829_v61 = vadd.f32 %v5828_v21, %v5827_v17  ;;  %v5830_v47 = vpop.f32.mrb[46].mxu0  ;;  %v1979_v1 = vrot.slane %v1977_v2, 7  ;;  %v5891_v59 = vpop.f32.mrb[44].mxu1 }
 0x151   :  { %v5831_v24 = vpop.f32.mrb[47].mxu0  ;;  %v5590_v42 = vpack.c.bf16 %v1742_v19, %v1742_v19  ;;  %v1743_v56 = vmax.f32 %v1695_v29, 0.0  ;;  %v2128_v30 = vsel %vm7430_vm11, %v1974_v4, %v2127_v39  ;;  %v2131_v32 = vsel %vm7219_vm5, %v1975_v53, %v2130_v51  ;;  %v5892_v36 = vpop.f32.mrb[45].mxu1  ;;  %v2139_v51 = vld [vmem:[#allocation2 + $0x28] sm:$0xf] }
 0x152   :  { %v1603_v9 = vadd.f32 %v5829_v61, %v7373_v28  ;;  %v5832_v16 = vadd.f32 %v5831_v24, %v5830_v47  ;;  %v7467_v18 = vld [vmem:[#allocation2 + $0x8] sm:$0xf]  ;;  %v7469_v28 = vrot.slane %v2362_v63, 4  ;;  %v1982_v34 = vor.u32 %v1980_v37, %v1979_v1  ;;  %2129 = vst [vmem:[#allocation2 + $0x18] sm:$0xf] %v2128_v30  ;;  %v5894_v44 = vpop.f32.mrb[46].mxu1 }
 0x153   :  { %v1983_v35 = vrot.slane %v1979_v1, 4  ;;  %2132 = vst [vmem:[#allocation2 + $0x1c] sm:$0x1] %v2131_v32  ;;  %v1985_v7 = vshrl.u32 %v5590_v42, 16  ;;  %v1988_v38 = vshll.u32 %v5590_v42, 16  ;;  %v5893_v40 = vadd.f32 %v5892_v36, %v5891_v59  ;;  %v5895_v27 = vpop.f32.mrb[47].mxu1 }
 0x154   :  { %v1606_v23 = vadd.f32 %v5832_v16, %v7377_v5  ;;  %v5591_v5 = vpack.c.bf16 %v1743_v56, %v1743_v56  ;;  %v2583_v21 = vld [vmem:[#allocation2 + $0x10] sm:$0xf]  ;;  %v2134_v11 = vsel %vm7430_vm11, %v1982_v34, %v2133_v10  ;;  %v2615_v61 = vshrl.u32 %v7467_v18, 16  ;;  %v2148_v53 = vld [vmem:[#allocation2 + $0x34] sm:$0x1] }
 0x155   :  { %v2137_v26 = vsel %vm7219_vm5, %v1983_v35, %v2136_v12  ;;  %v2618_v47 = vshll.u32 %v7467_v18, 16  ;;  %2135 = vst [vmem:[#allocation2 + $0x20] sm:$0xf] %v2134_v11  ;;  %v1987_v39 = vrot.slane %v1985_v7, 7  ;;  %v1700_v24 = vadd.f32 %v5893_v40, %v1603_v9  ;;  %v2145_v16 = vld [vmem:[#allocation2 + $0x30] sm:$0xf] }
 0x156   :  { %v7475_v17 = vpop.f32.mrb[48].mxu0  ;;  %2138 = vst [vmem:[#allocation2 + $0x24] sm:$0x1] %v2137_v26  ;;  %v1993_v31 = vshrl.u32 %v5591_v5, 16  ;;  %v1996_v60 = vshll.u32 %v5591_v5, 16  ;;  %v5896_v58 = vadd.f32 %v5895_v27, %v5894_v44  ;;  %v2617_v2 = vrot.slane %v2615_v61, 4 }
 0x157   :  { %v5834_v3 = vpop.f32.mrb[49].mxu0  ;;  %v2620_v37 = vrot.slane %v2618_v47, 5  ;;  %v2629_v10 = vshrl.u32 %v2583_v21, 16  ;;  %v1990_v12 = vor.u32 %v1988_v38, %v1987_v39  ;;  %v1991_v19 = vrot.slane %v1987_v39, 4  ;;  %v2468_v30 = vld [vmem:[#allocation2 + $0x8] sm:$0xe] }
 0x158   :  { %v5836_v48 = vpop.f32.mrb[50].mxu0  ;;  %v1995_v29 = vrot.slane %v1993_v31, 7  ;;  %v1744_v4 = vmax.f32 %v1700_v24, 0.0  ;;  %v1703_v1 = vadd.f32 %v5896_v58, %v1606_v23  ;;  %v2632_v59 = vshll.u32 %v2583_v21, 16  ;;  %v5897_v36 = vpop.f32.mrb[48].mxu1 }
 0x159   :  { %v5837_v63 = vpop.f32.mrb[51].mxu0  ;;  %v2621_v42 = vor.u32 %v2620_v37, %v2617_v2  ;;  %v2631_v56 = vrot.slane %v2629_v10, 4  ;;  %v2140_v9 = vsel %vm7430_vm11, %v1990_v12, %v2139_v51  ;;  %v2143_v32 = vsel %vm7219_vm5, %v1991_v19, %v2142_v33  ;;  %v7489_v40 = vld [vmem:[#allocation2 + $0xc] sm:$0x1]  ;;  %v5898_v44 = vpop.f32.mrb[49].mxu1 }
 0x15a   :  { %v1998_v34 = vor.u32 %v1996_v60, %v1995_v29  ;;  %v1999_v35 = vrot.slane %v1995_v29, 4  ;;  %2141 = vst [vmem:[#allocation2 + $0x28] sm:$0xf] %v2140_v9  ;;  %2144 = vst [vmem:[#allocation2 + $0x2c] sm:$0x1] %v2143_v32  ;;  %v5592_v7 = vpack.c.bf16 %v1744_v4, %v1744_v4  ;;  %v1745_v38 = vmax.f32 %v1703_v1, 0.0 }
 0x15b   :  { %v7487_v5 = vrot.slane %v2621_v42, 4  ;;  %v2634_v23 = vrot.slane %v2632_v59, 5  ;;  %v5416_v27 = vcombine.low %v7467_v18, %v2583_v21  ;;  %v5345_v61 = vrot.slane %v2468_v30, 9  ;;  %v5900_v47 = vpop.f32.mrb[50].mxu1  ;;  %v2151_v2 = vld [vmem:[#allocation2 + $0x38] sm:$0xf] }
 0x15c   :  { %v2146_v11 = vsel %vm7430_vm11, %v1998_v34, %v2145_v16  ;;  %v2149_v26 = vsel %vm7219_vm5, %v1999_v35, %v2148_v53  ;;  %v2001_v51 = vshrl.u32 %v5592_v7, 16  ;;  %v2004_v31 = vshll.u32 %v5592_v7, 16  ;;  %v5901_v33 = vpop.f32.mrb[51].mxu1  ;;  %v7502_v12 = vld [vmem:[#allocation2 + $0x8] sm:$0xf] }
 0x15d   :  { %2147 = vst [vmem:[#allocation2 + $0x30] sm:$0xf] %v2146_v11  ;;  %2150 = vst [vmem:[#allocation2 + $0x34] sm:$0x1] %v2149_v26  ;;  %v5593_v60 = vpack.c.bf16 %v1745_v38, %v1745_v38  ;;  %v2635_v24 = vor.u32 %v2634_v23, %v2631_v56  ;;  %4367 = vmatprep.mubr.bf16.mxu1 %v5416_v27  ;;  %v2524_v37 = vrot.slane %v7489_v40, 5 }
 0x15e   :  { %v7496_v39 = vpop.f32.mrb[52].mxu0  ;;  %v5835_v10 = vadd.f32 %v5834_v3, %v7475_v17  ;;  %v5899_v18 = vadd.f32 %v5898_v44, %v5897_v36  ;;  %v5838_v21 = vadd.f32 %v5837_v63, %v5836_v48  ;;  %v2003_v29 = vrot.slane %v2001_v51, 7  ;;  %v2154_v42 = vld [vmem:[#allocation2 + $0x3c] sm:$0x1]  ;;  %v2157_v56 = vld [vmem:[#allocation2 + $0x40] sm:$0xf] }
 0x15f   :  { %v7498_v58 = vpop.f32.mrb[53].mxu0  ;;  %v2009_v16 = vshrl.u32 %v5593_v60, 16  ;;  %v2012_v4 = vshll.u32 %v5593_v60, 16  ;;  %v7506_v53 = vrot.slane %v2635_v24, 4  ;;  %v2525_v59 = vsel %vm7437_vm12, %v5345_v61, %v2524_v37  ;;  %v6440_v63 = vld [vmem:[%s8673_s2 + $0x180] sm:$0xff]   ;;  %v6444_v36 = vld [vmem:[%s8673_s2 + $0x1c8] sm:$0xff]  }
 0x160   :  { %v7504_v19 = vpop.f32.mrb[54].mxu0  ;;  %v1611_v17 = vadd.f32 %v5835_v10, %v7381_v22  ;;  %v1614_v3 = vadd.f32 %v5838_v21, %v7385_v49  ;;  %v5902_v48 = vadd.f32 %v5901_v33, %v5900_v47  ;;  %v2006_v30 = vor.u32 %v2004_v31, %v2003_v29  ;;  %v2160_v34 = vld [vmem:[#allocation2 + $0x44] sm:$0x1]  ;;  %v7523_v23 = vld [vmem:[#allocation2 + $0x18] sm:$0xf]  ;;  %v7525_v44 = vpop.f32.mrb[52].mxu1 }
 0x161   :  { %v7508_v1 = vpop.f32.mrb[55].mxu0  ;;  %v2007_v9 = vrot.slane %v2003_v29, 4  ;;  %v2011_v32 = vrot.slane %v2009_v16, 7  ;;  %v5408_v35 = vcombine.low %v7448_v6, %v2525_v59  ;;  %v2258_v22 = vshrl.u32 %v7502_v12, 16  ;;  %v7531_v61 = vld [vmem:[#allocation2 + $0x20] sm:$0xf] }
 0x162   :  { %v1708_v7 = vadd.f32 %v5899_v18, %v1611_v17  ;;  %v1711_v38 = vadd.f32 %v5902_v48, %v1614_v3  ;;  %v2261_v49 = vshll.u32 %v7502_v12, 16  ;;  %v2152_v11 = vsel %vm7430_vm11, %v2006_v30, %v2151_v2  ;;  %v7533_v47 = vpop.f32.mrb[53].mxu1  ;;  %v6446_v31 = vld [vmem:[%s8673_s2 + $0x188] sm:$0xff]   ;;  %v7557_v48 = vld [vmem:[#allocation2 + $0x14] sm:$0x1] }
 0x163   :  { %v2155_v6 = vsel %vm7219_vm5, %v2007_v9, %v2154_v42  ;;  %v2014_v26 = vor.u32 %v2012_v4, %v2011_v32  ;;  %v2015_v27 = vrot.slane %v2011_v32, 4  ;;  %4368 = vmatmul.mubr.bf16.vlgmr.msra.gmra.mrb[64].mxu1 %v5408_v35  ;;  %2153 = vst [vmem:[#allocation2 + $0x38] sm:$0xf] %v2152_v11  ;;  %v2260_v33 = vrot.slane %v2258_v22, 4  ;;  %v7540_v37 = vpop.f32.mrb[54].mxu1  ;;  %v6450_v42 = vld [vmem:[%s8673_s2 + $0x1d0] sm:$0xff]  }
 0x164   :  { %2156 = vst [vmem:[#allocation2 + $0x3c] sm:$0x1] %v2155_v6  ;;  %v1746_v60 = vmax.f32 %v1708_v7, 0.0  ;;  %v1747_v24 = vmax.f32 %v1711_v38, 0.0  ;;  %v2263_v2 = vrot.slane %v2261_v49, 5  ;;  %6114 = vmatpush3.bf16.msra.mxu1 %v6440_v63  ;;  %v2267_v29 = vshll.u32 %v7489_v40, 16 }
 0x165   :  { %v2158_v18 = vsel %vm7430_vm11, %v2014_v26, %v2157_v56  ;;  %v2161_v21 = vsel %vm7219_vm5, %v2015_v27, %v2160_v34  ;;  %v7551_v4 = vpop.f32.mrb[55].mxu1  ;;  %6115 = vmatprep.subr.bf16.mxu1 %v6444_v36  ;;  %v2643_v3 = vshrl.u32 %v7523_v23, 16  ;;  %v2469_v40 = vld [vmem:[#allocation2 + $0x10] sm:$0xe]  ;;  %v2646_v9 = vshll.u32 %v7523_v23, 16 }
 0x166   :  { %v7535_v51 = vpop.f32.mrb[56].mxu0  ;;  %2159 = vst [vmem:[#allocation2 + $0x40] sm:$0xf] %v2158_v18  ;;  %2162 = vst [vmem:[#allocation2 + $0x44] sm:$0x1] %v2161_v21  ;;  %v5594_v59 = vpack.c.bf16 %v1746_v60, %v1746_v60  ;;  %v5595_v17 = vpack.c.bf16 %v1747_v24, %v1747_v24  ;;  %v2264_v56 = vor.u32 %v2263_v2, %v2260_v33  ;;  %v2269_v30 = vrot.slane %v2267_v29, 5 }
 0x167   :  { %v7542_v10 = vpop.f32.mrb[57].mxu0  ;;  %v2657_v32 = vshrl.u32 %v7531_v61, 16  ;;  %v2660_v34 = vshll.u32 %v7531_v61, 16  ;;  %v6452_v36 = vld [vmem:[%s8673_s2 + $0x190] sm:$0xff]   ;;  %v2470_v11 = vld [vmem:[#allocation2 + $0x18] sm:$0xe] }
 0x168   :  { %v7559_v63 = vpop.f32.mrb[58].mxu0  ;;  %v2017_v7 = vshrl.u32 %v5594_v59, 16  ;;  %v2020_v38 = vshll.u32 %v5594_v59, 16  ;;  %v2025_v22 = vshrl.u32 %v5595_v17, 16  ;;  %v2028_v49 = vshll.u32 %v5595_v17, 16  ;;  %6116 = vmatpush3.bf16.msra.mxu1 %v6446_v31  ;;  %v6456_v18 = vld [vmem:[%s8673_s2 + $0x1d8] sm:$0xff]  }
 0x169   :  { %v7564_v35 = vpop.f32.mrb[59].mxu0  ;;  %v2163_v6 = vld [vmem:[#allocation2 + $0x58] sm:$0xf]  ;;  %v2166_v26 = vld [vmem:[#allocation2 + $0x5c] sm:$0x1]  ;;  %v2265_v60 = vrot.slane %v2264_v56, 4  ;;  %6117 = vmatprep.subr.bf16.mxu1 %v6450_v42  ;;  %v5417_v31 = vcombine.low %v7523_v23, %v7531_v61 }
 0x16a   :  { %v2169_v27 = vld [vmem:[#allocation2 + $0x60] sm:$0xf]  ;;  %v7569_v24 = vrot.slane %v2643_v3, 4  ;;  %v7571_v33 = vrot.slane %v2646_v9, 5  ;;  %v7573_v2 = vrot.slane %v2657_v32, 4  ;;  %v2019_v21 = vrot.slane %v2017_v7, 7 }
 0x16b   :  { %v2027_v29 = vrot.slane %v2025_v22, 7  ;;  %v7578_v59 = vrot.slane %v2660_v34, 5  ;;  %v7582_v17 = vld [vmem:[#allocation2 + $0x1c] sm:$0x1]  ;;  %v7584_v56 = vpop.f32.mrb[56].mxu1  ;;  %v2270_v9 = vsel %vm6707_vm2, %v2265_v60, %v2269_v30  ;;  %v5346_v42 = vrot.slane %v2469_v40, 9  ;;  %4375 = vmatprep.mubr.bf16.mxu1 %v5417_v31 }
 0x16c   :  { %v2172_v3 = vld [vmem:[#allocation2 + $0x64] sm:$0x1]  ;;  %v2528_v32 = vrot.slane %v7557_v48, 5  ;;  %v5347_v16 = vrot.slane %v2470_v11, 9  ;;  %v7589_v15 = vpop.f32.mrb[57].mxu1  ;;  %v2022_v7 = vor.u32 %v2020_v38, %v2019_v21  ;;  %v2023_v34 = vrot.slane %v2019_v21, 4  ;;  %6118 = vmatpush3.bf16.msra.mxu1 %v6452_v36 }
 0x16d   :  { %8704 = vst [vmem:[#allocation4_spill] sm:$0xff] %v7578_v59  ;;  %v2030_v22 = vor.u32 %v2028_v49, %v2027_v29  ;;  %v2031_v52 = vrot.slane %v2027_v29, 4  ;;  %v7591_v23 = vpop.f32.mrb[58].mxu1  ;;  %v6458_v30 = vld [vmem:[%s8673_s2 + $0x198] sm:$0xff]   ;;  %v8705_v40 = vsel %vm6707_vm2, %v7424_v41, %v7422_v25  ;;  %v2532_v49 = vrot.slane %v7582_v17, 5  ;;  %v6439_v60 = vld [vmem:[%s8673_s2 + $0x100] sm:$0xff]   ;;  %6119 = vmatprep.subr.bf16.mxu1 %v6456_v18 }
 0x16e   :  { %v7593_v61 = vpop.f32.mrb[60].mxu0  ;;  %v5400_v11 = vcombine.low %v8705_v40, %v2270_v9  ;;  %v2529_v38 = vsel %vm7437_vm12, %v5346_v42, %v2528_v32  ;;  %v5841_v36 = vadd.f32 %v7498_v58, %v7496_v39  ;;  %v7611_v21 = vld [vmem:[#allocation2 + $0x10] sm:$0xf]  ;;  %v7613_v29 = vpop.f32.mrb[59].mxu1  ;;  %v6462_v25 = vld [vmem:[%s8673_s2 + $0x1e0] sm:$0xff]   ;;  %v2164_v41 = vsel %vm7430_vm11, %v2022_v7, %v2163_v6  ;;  %v6443_v18 = vld [vmem:[%s8673_s2 + $0x148] sm:$0xff]  }
 0x16f   :  { %v2167_v31 = vsel %vm7219_vm5, %v2023_v34, %v2166_v26  ;;  %v2170_v9 = vsel %vm7430_vm11, %v2030_v22, %v2169_v27  ;;  %v2173_v39 = vsel %vm7219_vm5, %v2031_v52, %v2172_v3  ;;  %v7626_v58 = vld [vmem:[#allocation2 + $0x18] sm:$0xf]  ;;  %v7631_v42 = vpop.f32.mrb[61].mxu0  ;;  %2165 = vst [vmem:[#allocation2 + $0x58] sm:$0xf] %v2164_v41  ;;  %v2533_v6 = vsel %vm7437_vm12, %v5347_v16, %v2532_v49 }
 0x170   :  { %2168 = vst [vmem:[#allocation2 + $0x5c] sm:$0x1] %v2167_v31  ;;  %2171 = vst [vmem:[#allocation2 + $0x60] sm:$0xf] %v2170_v9  ;;  %4270 = vmatprep.mubr.bf16.mxu0 %v5400_v11  ;;  %v1619_v26 = vadd.f32 %v5841_v36, %v7391_v8  ;;  %v5905_v52 = vadd.f32 %v7533_v47, %v7525_v44  ;;  %v5844_v27 = vadd.f32 %v7508_v1, %v7504_v19  ;;  %v7640_v3 = vpop.f32.mrb[62].mxu0  ;;  %v6464_v19 = vld [vmem:[%s8673_s2 + $0x1a0] sm:$0xff]  }
 0x171   :  { %2174 = vst [vmem:[#allocation2 + $0x64] sm:$0x1] %v2173_v39  ;;  %v8706_v32 = vcombine.low %v7405_v46, %v7502_v12  ;;  %v5409_v7 = vcombine.low %v2529_v38, %v2533_v6  ;;  %v5908_v34 = vadd.f32 %v7551_v4, %v7540_v37  ;;  %v2272_v16 = vshrl.u32 %v7611_v21, 16  ;;  %v7649_v22 = vpop.f32.mrb[63].mxu0  ;;  %6120 = vmatpush3.bf16.msra.mxu1 %v6458_v30  ;;  %v7657_v47 = vld [vmem:[#allocation2 + $0x28] sm:$0xf] }
 0x172   :  { %v2275_v8 = vshll.u32 %v7611_v21, 16  ;;  %v1716_v1 = vadd.f32 %v5905_v52, %v1619_v26  ;;  %v1622_v46 = vadd.f32 %v5844_v27, %v7394_v14  ;;  %v2281_v12 = vshll.u32 %v7557_v48, 16  ;;  %v6445_v37 = vld [vmem:[%s8673_s2 + $0x108] sm:$0xff]   ;;  %6121 = vmatprep.subr.bf16.mxu1 %v6462_v25  ;;  %v6449_v11 = vld [vmem:[%s8673_s2 + $0x150] sm:$0xff]   ;;  %v7670_v38 = vpop.f32.mrb[60].mxu1 }
 0x173   :  { %4271 = vmatmul.mubr.bf16.vlgmr.msra.gmra.mrb[64].mxu0 %v8706_v32  ;;  %v2286_v44 = vshrl.u32 %v7626_v58, 16  ;;  %v6468_v4 = vld [vmem:[%s8673_s2 + $0x1e8] sm:$0xff]   ;;  %4376 = vmatmul.mubr.bf16.gmra.mrb[68].mxu1 %v5409_v7  ;;  %v2274_v30 = vrot.slane %v2272_v16, 4  ;;  %v2289_v14 = vshll.u32 %v7626_v58, 16  ;;  %v2295_v48 = vshll.u32 %v7582_v17, 16  ;;  %v7672_v31 = vpop.f32.mrb[61].mxu1 }
 0x174   :  { %6050 = vmatpush3.bf16.msra.mxu0 %v6439_v60  ;;  %v2277_v40 = vrot.slane %v2275_v8, 5  ;;  %v1748_v49 = vmax.f32 %v1716_v1, 0.0  ;;  %v1719_v60 = vadd.f32 %v5908_v34, %v1622_v46  ;;  %v2283_v36 = vrot.slane %v2281_v12, 5  ;;  %v2587_v41 = vld [vmem:[#allocation2 + $0x30] sm:$0xf]  ;;  %v6470_v26 = vld [vmem:[%s8673_s2 + $0x1a8] sm:$0xff]  }
 0x175   :  { %6051 = vmatprep.subr.bf16.mxu0 %v6443_v18  ;;  %v2288_v25 = vrot.slane %v2286_v44, 4  ;;  %v2291_v39 = vrot.slane %v2289_v14, 5  ;;  %v2297_v6 = vrot.slane %v2295_v48, 5  ;;  %v7676_v18 = vpop.f32.mrb[62].mxu1  ;;  %6122 = vmatpush3.bf16.msra.mxu1 %v6464_v19  ;;  %v2671_v32 = vshrl.u32 %v7657_v47, 16  ;;  %v6451_v34 = vld [vmem:[%s8673_s2 + $0x110] sm:$0xff]  }
 0x176   :  { %v2278_v9 = vor.u32 %v2277_v40, %v2274_v30  ;;  %v5596_v52 = vpack.c.bf16 %v1748_v49, %v1748_v49  ;;  %v1749_v27 = vmax.f32 %v1719_v60, 0.0  ;;  %v2674_v7 = vshll.u32 %v7657_v47, 16  ;;  %v7686_v16 = vpop.f32.mrb[63].mxu1  ;;  %6123 = vmatprep.subr.bf16.mxu1 %v6468_v4  ;;  %v6474_v8 = vld [vmem:[%s8673_s2 + $0x1f0] sm:$0xff]   ;;  %v7691_v44 = vld [vmem:[#allocation2 + $0x24] sm:$0x1] }
 0x177   :  { %v2292_v1 = vor.u32 %v2291_v39, %v2288_v25  ;;  %v2685_v46 = vshrl.u32 %v2587_v41, 16  ;;  %v2688_v12 = vshll.u32 %v2587_v41, 16  ;;  %v7696_v48 = vrot.slane %v2671_v32, 4  ;;  %v2471_v4 = vld [vmem:[#allocation2 + $0x20] sm:$0xe]  ;;  %v6457_v49 = vld [vmem:[%s8673_s2 + $0x118] sm:$0xff]  }
 0x178   :  { %6052 = vmatpush3.bf16.msra.mxu0 %v6445_v37  ;;  %v2279_v19 = vrot.slane %v2278_v9, 4  ;;  %v6455_v37 = vld [vmem:[%s8673_s2 + $0x158] sm:$0xff]   ;;  %v2033_v30 = vshrl.u32 %v5596_v52, 16  ;;  %v2036_v40 = vshll.u32 %v5596_v52, 16  ;;  %v5597_v14 = vpack.c.bf16 %v1749_v27, %v1749_v27  ;;  %v7707_v39 = vld [vmem:[#allocation2 + $0x2c] sm:$0x1] }
 0x179   :  { %6053 = vmatprep.subr.bf16.mxu0 %v6449_v11  ;;  %8707 = vst [vmem:[#allocation5_spill] sm:$0xff] %v7696_v48  ;;  %v2293_v25 = vrot.slane %v2292_v1, 4  ;;  %v7703_v9 = vrot.slane %v2674_v7, 5  ;;  %v7705_v11 = vrot.slane %v2685_v46, 4  ;;  %6124 = vmatpush3.bf16.msra.mxu1 %v6470_v26  ;;  %v6476_v52 = vld [vmem:[%s8673_s2 + $0x1b0] sm:$0xff]   ;;  %v7712_v48 = vrot.slane %v2688_v12, 5 }
 0x17a   :  { %v2284_v60 = vsel %vm6707_vm2, %v2279_v19, %v2283_v36  ;;  %v2035_v27 = vrot.slane %v2033_v30, 7  ;;  %v2041_v32 = vshrl.u32 %v5597_v14, 16  ;;  %v2044_v17 = vshll.u32 %v5597_v14, 16  ;;  %v2472_v59 = vld [vmem:[#allocation2 + $0x28] sm:$0xe]  ;;  %6125 = vmatprep.subr.bf16.mxu1 %v6474_v8 }
 0x17b   :  { %8708 = vst [vmem:[#allocation6_spill] sm:$0xff] %v7703_v9  ;;  %8709 = vst [vmem:[#allocation7_spill] sm:$0xff] %v7705_v11  ;;  %v2175_v36 = vld [vmem:[#allocation2 + $0x68] sm:$0xf]  ;;  %v2178_v7 = vld [vmem:[#allocation2 + $0x6c] sm:$0x1]  ;;  %v2298_v19 = vsel %vm6707_vm2, %v2293_v25, %v2297_v6  ;;  %v5418_v1 = vcombine.low %v7657_v47, %v2587_v41  ;;  %v5847_v41 = vadd.f32 %v7542_v10, %v7535_v51 }
 0x17c   :  { %6054 = vmatpush3.bf16.msra.mxu0 %v6451_v34  ;;  %v5348_v26 = vrot.slane %v2471_v4, 9  ;;  %v2536_v46 = vrot.slane %v7691_v44, 5  ;;  %v2038_v11 = vor.u32 %v2036_v40, %v2035_v27  ;;  %v2039_v30 = vrot.slane %v2035_v27, 4  ;;  %v2181_v14 = vld [vmem:[#allocation2 + $0x70] sm:$0xf]  ;;  %v6461_v34 = vld [vmem:[%s8673_s2 + $0x160] sm:$0xff]  }
 0x17d   :  { %6055 = vmatprep.subr.bf16.mxu0 %v6455_v37  ;;  %v2043_v9 = vrot.slane %v2041_v32, 7  ;;  %v5401_v12 = vcombine.low %v2284_v60, %v2298_v19  ;;  %v2184_v8 = vld [vmem:[#allocation2 + $0x74] sm:$0x1]  ;;  %4383 = vmatprep.mubr.bf16.mxu1 %v5418_v1  ;;  %v5349_v25 = vrot.slane %v2472_v59, 9  ;;  %v2540_v47 = vrot.slane %v7707_v39, 5  ;;  %v6477_v37 = vld [vmem:[%s8673_s2 + $0x1f8] sm:$0xff]  }
 0x17e   :  { %v2537_v6 = vsel %vm7437_vm12, %v5348_v26, %v2536_v46  ;;  %6126 = vmatpush3.bf16.msra.mxu1 %v6476_v52  ;;  %v2176_v40 = vsel %vm7430_vm11, %v2038_v11, %v2175_v36  ;;  %v2179_v4 = vsel %vm7219_vm5, %v2039_v30, %v2178_v7  ;;  %v7733_v59 = vld [vmem:[#allocation2 + $0x20] sm:$0xf]  ;;  %v6467_v10 = vld [vmem:[%s8673_s2 + $0x168] sm:$0xff]   ;;  %v8710_v11 = vcombine.low %v7611_v21, %v7626_v58  ;;  %v6478_v36 = vld [vmem:[%s8673_s2 + $0x1b8] sm:$0xff]  }
 0x17f   :  { %v2046_v60 = vor.u32 %v2044_v17, %v2043_v9  ;;  %v2047_v27 = vrot.slane %v2043_v9, 4  ;;  %4278 = vmatprep.mubr.bf16.mxu0 %v5401_v12  ;;  %v6463_v51 = vld [vmem:[%s8673_s2 + $0x120] sm:$0xff]   ;;  %2177 = vst [vmem:[#allocation2 + $0x68] sm:$0xf] %v2176_v40  ;;  %2180 = vst [vmem:[#allocation2 + $0x6c] sm:$0x1] %v2179_v4  ;;  %v2541_v17 = vsel %vm7437_vm12, %v5349_v25, %v2540_v47  ;;  %6127 = vmatprep.subr.bf16.mxu1 %v6477_v37 }
 0x180   :  { %6056 = vmatpush3.bf16.msra.mxu0 %v6457_v49  ;;  %v1627_v9 = vadd.f32 %v5847_v41, %v7397_v20  ;;  %v5911_v49 = vadd.f32 %v7589_v15, %v7584_v56  ;;  %v5850_v52 = vadd.f32 %v7564_v35, %v7559_v63  ;;  %v7751_v32 = vld [vmem:[#allocation2 + $0x28] sm:$0xf]  ;;  %v5410_v7 = vcombine.low %v2537_v6, %v2541_v17  ;;  %v6484_v15 = vld [vmem:[%s8675_s5 + $0x40] sm:$0xff]   ;;  %v2588_v30 = vld [vmem:[#allocation2 + $0x38] sm:$0xf] }
 0x181   :  { %4279 = vmatmul.mubr.bf16.gmra.mrb[68].mxu0 %v8710_v11  ;;  %v2182_v21 = vsel %vm7430_vm11, %v2046_v60, %v2181_v14  ;;  %v2185_v58 = vsel %vm7219_vm5, %v2047_v27, %v2184_v8  ;;  %v5914_v20 = vadd.f32 %v7613_v29, %v7591_v23  ;;  %6057 = vmatprep.subr.bf16.mxu0 %v6461_v34  ;;  %v2300_v56 = vshrl.u32 %v7733_v59, 16  ;;  %v6469_v1 = vld [vmem:[%s8673_s2 + $0x128] sm:$0xff]   ;;  %v2589_v8 = vld [vmem:[#allocation2 + $0x40] sm:$0xf]  ;;  %v6473_v6 = vld [vmem:[%s8673_s2 + $0x170] sm:$0xff]  }
 0x182   :  { %2183 = vst [vmem:[#allocation2 + $0x70] sm:$0xf] %v2182_v21  ;;  %2186 = vst [vmem:[#allocation2 + $0x74] sm:$0x1] %v2185_v58  ;;  %v1724_v63 = vadd.f32 %v5911_v49, %v1627_v9  ;;  %v1630_v35 = vadd.f32 %v5850_v52, %v7400_v43  ;;  %v2303_v19 = vshll.u32 %v7733_v59, 16  ;;  %4384 = vmatmul.mubr.bf16.gmra.mrb[72].mxu1 %v5410_v7  ;;  %v2309_v23 = vshll.u32 %v7691_v44, 16 }
 0x183   :  { %v2314_v29 = vshrl.u32 %v7751_v32, 16  ;;  %v2317_v26 = vshll.u32 %v7751_v32, 16  ;;  %v2323_v46 = vshll.u32 %v7707_v39, 16  ;;  %v2302_v12 = vrot.slane %v2300_v56, 4  ;;  %6128 = vmatpush3.bf16.msra.mxu1 %v6478_v36  ;;  %v6475_v11 = vld [vmem:[%s8673_s2 + $0x130] sm:$0xff]  }
 0x184   :  { %6058 = vmatpush3.bf16.msra.mxu0 %v6463_v51  ;;  %v1750_v43 = vmax.f32 %v1724_v63, 0.0  ;;  %v1727_v14 = vadd.f32 %v5914_v20, %v1630_v35  ;;  %v2305_v34 = vrot.slane %v2303_v19, 5  ;;  %v2311_v44 = vrot.slane %v2309_v23, 5  ;;  %6289 = vmatprep.subr.bf16.mxu1 %v6484_v15  ;;  %v7783_v36 = vld [vmem:[#allocation2 + $0x34] sm:$0x1] }
 0x185   :  { %6059 = vmatprep.subr.bf16.mxu0 %v6467_v10  ;;  %v2316_v25 = vrot.slane %v2314_v29, 4  ;;  %v2319_v47 = vrot.slane %v2317_v26, 5  ;;  %v2325_v41 = vrot.slane %v2323_v46, 5  ;;  %v5394_v4 = vcombine.low %v7733_v59, %v7751_v32  ;;  %v2473_v21 = vld [vmem:[#allocation2 + $0x30] sm:$0xe]  ;;  %v6480_v59 = vld [vmem:[%s8673_s2 + $0x178] sm:$0xff]  }
 0x186   :  { %v5598_v37 = vpack.c.bf16 %v1750_v43, %v1750_v43  ;;  %v1751_v39 = vmax.f32 %v1727_v14, 0.0  ;;  %v2306_v40 = vor.u32 %v2305_v34, %v2302_v12  ;;  %v2699_v27 = vshrl.u32 %v2588_v30, 16  ;;  %v2187_v32 = vld [vmem:[#allocation2 + $0x78] sm:$0xf]  ;;  %v7794_v63 = vld [vmem:[#allocation2 + $0x3c] sm:$0x1] }
 0x187   :  { %v2320_v60 = vor.u32 %v2319_v47, %v2316_v25  ;;  %v2702_v51 = vshll.u32 %v2588_v30, 16  ;;  %v2713_v10 = vshrl.u32 %v2589_v8, 16  ;;  %v2474_v23 = vld [vmem:[#allocation2 + $0x38] sm:$0xe]  ;;  %v2190_v29 = vld [vmem:[#allocation2 + $0x7c] sm:$0x1]  ;;  %v5419_v14 = vcombine.low %v2588_v30, %v2589_v8 }
 0x188   :  { %6060 = vmatpush3.bf16.msra.mxu0 %v6469_v1  ;;  %v2049_v17 = vshrl.u32 %v5598_v37, 16  ;;  %v2052_v9 = vshll.u32 %v5598_v37, 16  ;;  %v5599_v49 = vpack.c.bf16 %v1751_v39, %v1751_v39  ;;  %v2307_v52 = vrot.slane %v2306_v40, 4  ;;  %v2193_v26 = vld [vmem:[#allocation2 + $0x80] sm:$0xf] }
 0x189   :  { %6061 = vmatprep.subr.bf16.mxu0 %v6473_v6  ;;  %v2321_v58 = vrot.slane %v2320_v60, 4  ;;  %v7788_v7 = vrot.slane %v2699_v27, 4  ;;  %v7790_v20 = vrot.slane %v2702_v51, 5  ;;  %v7792_v15 = vrot.slane %v2713_v10, 4  ;;  %v2196_v47 = vld [vmem:[#allocation2 + $0x84] sm:$0x1]  ;;  %4391 = vmatprep.mubr.bf16.mxu1 %v5419_v14 }
 0x18a   :  { %v2051_v35 = vrot.slane %v2049_v17, 7  ;;  %v2057_v56 = vshrl.u32 %v5599_v49, 16  ;;  %v2060_v19 = vshll.u32 %v5599_v49, 16  ;;  %v2312_v1 = vsel %vm6707_vm2, %v2307_v52, %v2311_v44  ;;  %v6481_v44 = vld [vmem:[%s8673_s2 + $0x138] sm:$0xff]  }
 0x18b   :  { %v2326_v46 = vsel %vm6707_vm2, %v2321_v58, %v2325_v41  ;;  %v2716_v43 = vshll.u32 %v2589_v8, 16  ;;  %v5350_v12 = vrot.slane %v2473_v21, 9  ;;  %v2544_v40 = vrot.slane %v7783_v36, 5  ;;  %v7810_v8 = vld [vmem:[%s8673_s2 + $0x200] sm:$0xff]   ;;  %v7826_v21 = vld [vmem:[#allocation2 + $0x38] sm:$0xf] }
 0x18c   :  { %6062 = vmatpush3.bf16.msra.mxu0 %v6475_v11  ;;  %v2054_v34 = vor.u32 %v2052_v9, %v2051_v35  ;;  %v2055_v6 = vrot.slane %v2051_v35, 4  ;;  %v2059_v25 = vrot.slane %v2057_v56, 7  ;;  %v5402_v37 = vcombine.low %v2312_v1, %v2326_v46  ;;  %v7816_v11 = vld [vmem:[#allocation2 + $0x30] sm:$0xf] }
 0x18d   :  { %6063 = vmatprep.subr.bf16.mxu0 %v6480_v59  ;;  %v7803_v39 = vrot.slane %v2716_v43, 5  ;;  %v5351_v41 = vrot.slane %v2474_v23, 9  ;;  %v2548_v30 = vrot.slane %v7794_v63, 5  ;;  %v2545_v17 = vsel %vm7437_vm12, %v5350_v12, %v2544_v40  ;;  %v2591_v43 = vld [vmem:[#allocation2 + $0x60] sm:$0xf] }
 0x18e   :  { %v2188_v60 = vsel %vm7430_vm11, %v2054_v34, %v2187_v32  ;;  %v2191_v27 = vsel %vm7219_vm5, %v2055_v6, %v2190_v29  ;;  %v2062_v51 = vor.u32 %v2060_v19, %v2059_v25  ;;  %v2063_v10 = vrot.slane %v2059_v25, 4  ;;  %4286 = vmatprep.mubr.bf16.mxu0 %v5402_v37 }
 0x18f   :  { %2189 = vst [vmem:[#allocation2 + $0x78] sm:$0xf] %v2188_v60  ;;  %2192 = vst [vmem:[#allocation2 + $0x7c] sm:$0x1] %v2191_v27  ;;  %4287 = vmatmul.mubr.bf16.gmra.mrb[72].mxu0 %v5394_v4  ;;  %v2549_v9 = vsel %vm7437_vm12, %v5351_v41, %v2548_v30  ;;  %v5853_v49 = vadd.f32 %v7631_v42, %v7593_v61  ;;  %v5917_v52 = vadd.f32 %v7672_v31, %v7670_v38  ;;  %v2236_v41 = vld [vmem:[#allocation2 + $0x5c] sm:$0x1] }
 0x190   :  { %v2194_v59 = vsel %vm7430_vm11, %v2062_v51, %v2193_v26  ;;  %v2197_v4 = vsel %vm7219_vm5, %v2063_v10, %v2196_v47  ;;  %v5411_v32 = vcombine.low %v2545_v17, %v2549_v9  ;;  %v5856_v58 = vadd.f32 %v7649_v22, %v7640_v3  ;;  %6064 = vmatpush3.bf16.msra.mxu0 %v6481_v44  ;;  %v2476_v10 = vld [vmem:[#allocation2 + $0x58] sm:$0xe] }
 0x191   :  { %2195 = vst [vmem:[#allocation2 + $0x80] sm:$0xf] %v2194_v59  ;;  %2198 = vst [vmem:[#allocation2 + $0x84] sm:$0x1] %v2197_v4  ;;  %v1635_v61 = vadd.f32 %v5853_v49, %v7403_v54  ;;  %v5920_v42 = vadd.f32 %v7686_v16, %v7676_v18  ;;  %v2328_v38 = vshrl.u32 %v7816_v11, 16  ;;  %v2331_v31 = vshll.u32 %v7816_v11, 16  ;;  %6257 = vmatprep.subr.bf16.mxu0 %v7810_v8 }
 0x192   :  { %4392 = vmatmul.mubr.bf16.gmra.mrb[76].mxu1 %v5411_v32  ;;  %v1638_v35 = vadd.f32 %v5856_v58, %v7408_v50  ;;  %v2337_v56 = vshll.u32 %v7783_v36, 16  ;;  %v2342_v3 = vshrl.u32 %v7826_v21, 16  ;;  %v2345_v22 = vshll.u32 %v7826_v21, 16  ;;  %v2590_v16 = vld [vmem:[#allocation2 + $0x58] sm:$0xf] }
 0x193   :  { %v1732_v19 = vadd.f32 %v5917_v52, %v1635_v61  ;;  %v2330_v54 = vrot.slane %v2328_v38, 4  ;;  %v2333_v1 = vrot.slane %v2331_v31, 5  ;;  %v2351_v18 = vshll.u32 %v7794_v63, 16  ;;  %v7855_v52 = vld [vmem:[#allocation2 + $0x58] sm:$0xf] }
 0x194   :  { %v1735_v23 = vadd.f32 %v5920_v42, %v1638_v35  ;;  %v2339_v29 = vrot.slane %v2337_v56, 5  ;;  %v2344_v26 = vrot.slane %v2342_v3, 4  ;;  %v2347_v46 = vrot.slane %v2345_v22, 5  ;;  %v2202_v59 = vld [vmem:[#allocation2 + $0x8c] sm:$0x1] }
 0x195   :  { %v1752_v14 = vmax.f32 %v1732_v19, 0.0  ;;  %v2334_v12 = vor.u32 %v2333_v1, %v2330_v54  ;;  %v2353_v50 = vrot.slane %v2351_v18, 5  ;;  %v5395_v36 = vcombine.low %v7816_v11, %v7826_v21  ;;  %v2199_v21 = vld [vmem:[#allocation2 + $0x88] sm:$0xf]  ;;  %v2205_v38 = vld [vmem:[#allocation2 + $0x90] sm:$0xf] }
 0x196   :  { %v1753_v34 = vmax.f32 %v1735_v23, 0.0  ;;  %v2348_v6 = vor.u32 %v2347_v46, %v2344_v26  ;;  %v2727_v25 = vshrl.u32 %v2590_v16, 16  ;;  %v2730_v47 = vshll.u32 %v2590_v16, 16  ;;  %v2208_v31 = vld [vmem:[#allocation2 + $0x94] sm:$0x1] }
 0x197   :  { %v5600_v37 = vpack.c.bf16 %v1752_v14, %v1752_v14  ;;  %v2335_v44 = vrot.slane %v2334_v12, 4  ;;  %v2741_v40 = vshrl.u32 %v2591_v43, 16  ;;  %v2744_v63 = vshll.u32 %v2591_v43, 16  ;;  %v2592_v18 = vld [vmem:[#allocation2 + $0x68] sm:$0xf] }
 0x198   :  { %v5601_v30 = vpack.c.bf16 %v1753_v34, %v1753_v34  ;;  %v2349_v60 = vrot.slane %v2348_v6, 4  ;;  %v7847_v27 = vrot.slane %v2727_v25, 4  ;;  %v7849_v51 = vrot.slane %v2730_v47, 5  ;;  %v2237_v14 = vld [vmem:[#allocation2 + $0x64] sm:$0x1] }
 0x199   :  { %v2065_v17 = vshrl.u32 %v5600_v37, 16  ;;  %v2068_v9 = vshll.u32 %v5600_v37, 16  ;;  %v2340_v11 = vsel %vm6707_vm2, %v2335_v44, %v2339_v29  ;;  %v7853_v49 = vrot.slane %v2741_v40, 4  ;;  %v2593_v34 = vld [vmem:[#allocation2 + $0x70] sm:$0xf] }
 0x19a   :  { %v2073_v4 = vshrl.u32 %v5601_v30, 16  ;;  %v2076_v32 = vshll.u32 %v5601_v30, 16  ;;  %v2354_v58 = vsel %vm6707_vm2, %v2349_v60, %v2353_v50  ;;  %v7859_v61 = vrot.slane %v2744_v63, 5  ;;  %v2477_v6 = vld [vmem:[#allocation2 + $0x60] sm:$0xe] }
 0x19b   :  { %v2067_v42 = vrot.slane %v2065_v17, 7  ;;  %v5403_v35 = vcombine.low %v2340_v11, %v2354_v58  ;;  %v5420_v56 = vcombine.low %v2590_v16, %v2591_v43  ;;  %v5353_v3 = vrot.slane %v2476_v10, 9  ;;  %v7874_v44 = vld [vmem:[#allocation2 + $0x60] sm:$0xf]  ;;  %v6538_v63 = vld [vmem:[#allocation2 + $0x50] sm:$0xf] }
 0x19c   :  { %v2075_v22 = vrot.slane %v2073_v4, 7  ;;  %v2556_v19 = vrot.slane %v2236_v41, 5  ;;  %v2370_v54 = vshrl.u32 %v7855_v52, 16  ;;  %v2373_v1 = vshll.u32 %v7855_v52, 16  ;;  %v7881_v4 = vld [vmem:[#allocation2 + $0x68] sm:$0xf] }
 0x19d   :  { %v2070_v23 = vor.u32 %v2068_v9, %v2067_v42  ;;  %v2071_v29 = vrot.slane %v2067_v42, 4  ;;  %4294 = vmatprep.mubr.bf16.mxu0 %v5403_v35  ;;  %4399 = vmatprep.mubr.bf16.mxu1 %v5420_v56  ;;  %v2368_v26 = vsel %vm6707_vm2, %v7469_v28, %v7459_v0  ;;  %v2379_v46 = vshll.u32 %v2236_v41, 16  ;;  %v2238_v28 = vld [vmem:[#allocation2 + $0x6c] sm:$0x1]  ;;  %v2478_v9 = vld [vmem:[#allocation2 + $0x68] sm:$0xe] }
 0x19e   :  { %v2078_v16 = vor.u32 %v2076_v32, %v2075_v22  ;;  %v2079_v43 = vrot.slane %v2075_v22, 4  ;;  %4295 = vmatmul.mubr.bf16.gmra.mrb[76].mxu0 %v5395_v36  ;;  %v2557_v12 = vsel %vm7437_vm12, %v5353_v3, %v2556_v19  ;;  %v2372_v50 = vrot.slane %v2370_v54, 4  ;;  %v2594_v3 = vld [vmem:[#allocation2 + $0x78] sm:$0xf] }
 0x19f   :  { %v2200_v25 = vsel %vm7430_vm11, %v2070_v23, %v2199_v21  ;;  %v2203_v47 = vsel %vm7219_vm5, %v2071_v29, %v2202_v59  ;;  %v5412_v37 = vcombine.low %v7464_v45, %v2557_v12  ;;  %v2375_v0 = vrot.slane %v2373_v1, 5 }
 0x1a0   :  { %2201 = vst [vmem:[#allocation2 + $0x88] sm:$0xf] %v2200_v25  ;;  %2204 = vst [vmem:[#allocation2 + $0x8c] sm:$0x1] %v2203_v47  ;;  %v2206_v36 = vsel %vm7430_vm11, %v2078_v16, %v2205_v38  ;;  %v2209_v40 = vsel %vm7219_vm5, %v2079_v43, %v2208_v31  ;;  %v5396_v41 = vcombine.low %v6538_v63, %v7855_v52  ;;  %v2755_v30 = vshrl.u32 %v2592_v18, 16 }
 0x1a1   :  { %2207 = vst [vmem:[#allocation2 + $0x90] sm:$0xf] %v2206_v36  ;;  %2210 = vst [vmem:[#allocation2 + $0x94] sm:$0x1] %v2209_v40  ;;  %4400 = vmatmul.mubr.bf16.gmra.mrb[80].mxu1 %v5412_v37  ;;  %v2376_v45 = vor.u32 %v2375_v0, %v2372_v50  ;;  %v2381_v60 = vrot.slane %v2379_v46, 5  ;;  %v2758_v10 = vshll.u32 %v2592_v18, 16  ;;  %v5421_v21 = vcombine.low %v2592_v18, %v2593_v34 }
 0x1a2   :  { %v2769_v17 = vshrl.u32 %v2593_v34, 16  ;;  %v2772_v11 = vshll.u32 %v2593_v34, 16  ;;  %v5354_v59 = vrot.slane %v2477_v6, 9  ;;  %v2560_v62 = vrot.slane %v2237_v14, 5  ;;  %v2595_v16 = vld [vmem:[#allocation2 + $0x80] sm:$0xf] }
 0x1a3   :  { %v2377_v32 = vrot.slane %v2376_v45, 4  ;;  %v7883_v58 = vrot.slane %v2755_v30, 4  ;;  %v7885_v42 = vrot.slane %v2758_v10, 5  ;;  %4407 = vmatprep.mubr.bf16.mxu1 %v5421_v21  ;;  %v5355_v31 = vrot.slane %v2478_v9, 9  ;;  %v2239_v37 = vld [vmem:[#allocation2 + $0x74] sm:$0x1] }
 0x1a4   :  { %v7887_v52 = vrot.slane %v2769_v17, 4  ;;  %v2561_v38 = vsel %vm7437_vm12, %v5354_v59, %v2560_v62  ;;  %v2564_v35 = vrot.slane %v2238_v28, 5  ;;  %v2384_v56 = vshrl.u32 %v7874_v44, 16  ;;  %v2479_v63 = vld [vmem:[#allocation2 + $0x70] sm:$0xe] }
 0x1a5   :  { %v2382_v22 = vsel %vm6707_vm2, %v2377_v32, %v2381_v60  ;;  %v2387_v19 = vshll.u32 %v7874_v44, 16  ;;  %v2393_v54 = vshll.u32 %v2237_v14, 16  ;;  %v2398_v1 = vshrl.u32 %v7881_v4, 16  ;;  %v2480_v30 = vld [vmem:[#allocation2 + $0x78] sm:$0xe] }
 0x1a6   :  { %v5404_v18 = vcombine.low %v2368_v26, %v2382_v22  ;;  %v2565_v23 = vsel %vm7437_vm12, %v5355_v31, %v2564_v35  ;;  %v2386_v29 = vrot.slane %v2384_v56, 4  ;;  %v2401_v46 = vshll.u32 %v7881_v4, 16  ;;  %v2240_v9 = vld [vmem:[#allocation2 + $0x7c] sm:$0x1]  ;;  %v7911_v62 = vld [vmem:[#allocation2 + $0x78] sm:$0xf] }
 0x1a7   :  { %v7899_v43 = vrot.slane %v2772_v11, 5  ;;  %v5413_v12 = vcombine.low %v2561_v38, %v2565_v23  ;;  %v2389_v50 = vrot.slane %v2387_v19, 5  ;;  %v2400_v34 = vrot.slane %v2398_v1, 4  ;;  %v7903_v11 = vld [vmem:[#allocation2 + $0x70] sm:$0xf] }
 0x1a8   :  { %4302 = vmatprep.mubr.bf16.mxu0 %v5404_v18  ;;  %v2395_v6 = vrot.slane %v2393_v54, 5  ;;  %v2403_v25 = vrot.slane %v2401_v46, 5  ;;  %v2407_v47 = vshll.u32 %v2238_v28, 16  ;;  %v2783_v14 = vshrl.u32 %v2594_v3, 16  ;;  %v2596_v22 = vld [vmem:[#allocation2 + $0x88] sm:$0xf] }
 0x1a9   :  { %4303 = vmatmul.mubr.bf16.gmra.mrb[80].mxu0 %v5396_v41  ;;  %4408 = vmatmul.mubr.bf16.gmra.mrb[84].mxu1 %v5413_v12  ;;  %v2390_v26 = vor.u32 %v2389_v50, %v2386_v29  ;;  %v5397_v0 = vcombine.low %v7874_v44, %v7881_v4  ;;  %v2786_v36 = vshll.u32 %v2594_v3, 16  ;;  %v2797_v40 = vshrl.u32 %v2595_v16, 16  ;;  %v7924_v12 = vld [vmem:[#allocation2 + $0x90] sm:$0xf] }
 0x1aa   :  { %v2404_v45 = vor.u32 %v2403_v25, %v2400_v34  ;;  %v2409_v60 = vrot.slane %v2407_v47, 5  ;;  %v2800_v10 = vshll.u32 %v2595_v16, 16  ;;  %v5422_v17 = vcombine.low %v2594_v3, %v2595_v16  ;;  %v7929_v47 = vld [vmem:[#allocation2 + $0x84] sm:$0x1] }
 0x1ab   :  { %v2391_v28 = vrot.slane %v2390_v26, 4  ;;  %v7905_v21 = vrot.slane %v2783_v14, 4  ;;  %v7907_v41 = vrot.slane %v2786_v36, 5  ;;  %v7909_v59 = vrot.slane %v2797_v40, 4  ;;  %v2481_v14 = vld [vmem:[#allocation2 + $0x80] sm:$0xe] }
 0x1ac   :  { %v2405_v44 = vrot.slane %v2404_v45, 4  ;;  %4415 = vmatprep.mubr.bf16.mxu1 %v5422_v17  ;;  %v5356_v4 = vrot.slane %v2479_v63, 9  ;;  %v2568_v32 = vrot.slane %v2239_v37, 5  ;;  %v5357_v38 = vrot.slane %v2480_v30, 9  ;;  %v7931_v30 = vld [vmem:[#allocation2 + $0x10] sm:$0xf] }
 0x1ad   :  { %v2396_v31 = vsel %vm6707_vm2, %v2391_v28, %v2395_v6  ;;  %v2572_v35 = vrot.slane %v2240_v9, 5  ;;  %v2412_v56 = vshrl.u32 %v7903_v11, 16  ;;  %v2415_v3 = vshll.u32 %v7903_v11, 16  ;;  %v2967_v28 = vld [vmem:[#allocation2 + $0x14] sm:$0x1] }
 0x1ae   :  { %v2410_v19 = vsel %vm6707_vm2, %v2405_v44, %v2409_v60  ;;  %v2569_v54 = vsel %vm7437_vm12, %v5356_v4, %v2568_v32  ;;  %v2421_v1 = vshll.u32 %v2239_v37, 16  ;;  %v2426_v18 = vshrl.u32 %v7911_v62, 16  ;;  %v2482_v37 = vld [vmem:[#allocation2 + $0x88] sm:$0xe] }
 0x1af   :  { %v5405_v23 = vcombine.low %v2396_v31, %v2410_v19  ;;  %v2573_v29 = vsel %vm7437_vm12, %v5357_v38, %v2572_v35  ;;  %v2414_v46 = vrot.slane %v2412_v56, 4  ;;  %v2417_v16 = vrot.slane %v2415_v3, 5  ;;  %v7944_v3 = vld [vmem:[#allocation2 + $0x18] sm:$0xf] }
 0x1b0   :  { %v7926_v50 = vrot.slane %v2800_v10, 5  ;;  %v5414_v34 = vcombine.low %v2569_v54, %v2573_v29  ;;  %v2428_v6 = vrot.slane %v2426_v18, 4  ;;  %v2429_v25 = vshll.u32 %v7911_v62, 16 }
 0x1b1   :  { %4310 = vmatprep.mubr.bf16.mxu0 %v5405_v23  ;;  %v2418_v26 = vor.u32 %v2417_v16, %v2414_v46  ;;  %v2423_v36 = vrot.slane %v2421_v1, 5  ;;  %v2435_v40 = vshll.u32 %v2240_v9, 16  ;;  %v2811_v63 = vshrl.u32 %v2596_v22, 16  ;;  %v2242_v9 = vld [vmem:[#allocation2 + $0x8c] sm:$0x1] }
 0x1b2   :  { %4311 = vmatmul.mubr.bf16.gmra.mrb[84].mxu0 %v5397_v0  ;;  %4416 = vmatmul.mubr.bf16.gmra.mrb[88].mxu1 %v5414_v34  ;;  %v2431_v45 = vrot.slane %v2429_v25, 5  ;;  %v5398_v60 = vcombine.low %v7903_v11, %v7911_v62  ;;  %v2814_v10 = vshll.u32 %v2596_v22, 16  ;;  %v2825_v17 = vshrl.u32 %v7924_v12, 16  ;;  %v7949_v1 = vld [vmem:[#allocation2 + $0x1c] sm:$0x1] }
 0x1b3   :  { %v2419_v44 = vrot.slane %v2418_v26, 4  ;;  %v2437_v4 = vrot.slane %v2435_v40, 5  ;;  %v5423_v38 = vcombine.low %v2596_v22, %v7924_v12  ;;  %v7938_v35 = vrot.slane %v2811_v63, 4  ;;  %8711 = vst [vmem:[#allocation8_spill] sm:$0xff] %v7949_v1  ;;  %v7953_v46 = vld [vmem:[#allocation2 + $0x80] sm:$0xf] }
 0x1b4   :  { %v2432_v31 = vor.u32 %v2431_v45, %v2428_v6  ;;  %v7940_v0 = vrot.slane %v2814_v10, 5  ;;  %v7942_v56 = vrot.slane %v2825_v17, 4  ;;  %v5358_v62 = vrot.slane %v2481_v14, 9  ;;  %v7963_v40 = vld [vmem:[#allocation2 + $0x88] sm:$0xf] }
 0x1b5   :  { %v2424_v11 = vsel %vm6707_vm2, %v2419_v44, %v2423_v36  ;;  %4423 = vmatprep.mubr.bf16.mxu1 %v5423_v38  ;;  %v2576_v19 = vrot.slane %v7929_v47, 5  ;;  %v5359_v54 = vrot.slane %v2482_v37, 9  ;;  %v2580_v18 = vrot.slane %v2242_v9, 5 }
 0x1b6   :  { %v2433_v22 = vrot.slane %v2432_v31, 4  ;;  %v2984_v23 = vshrl.u32 %v7931_v30, 16  ;;  %v2987_v29 = vshll.u32 %v7931_v30, 16  ;;  %v2993_v34 = vshll.u32 %v2967_v28, 16 }
 0x1b7   :  { %v2577_v16 = vsel %vm7437_vm12, %v5358_v62, %v2576_v19  ;;  %v2998_v6 = vshrl.u32 %v7944_v3, 16  ;;  %v3001_v25 = vshll.u32 %v7944_v3, 16  ;;  %v2581_v37 = vsel %vm7437_vm12, %v5359_v54, %v2580_v18  ;;  %v2598_v62 = vld [vmem:[#allocation2 + $0xc] sm:$0x1] }
 0x1b8   :  { %v2438_v14 = vsel %vm6707_vm2, %v2433_v22, %v2437_v4  ;;  %v2986_v26 = vrot.slane %v2984_v23, 4  ;;  %v2989_v36 = vrot.slane %v2987_v29, 5  ;;  %v5415_v45 = vcombine.low %v2577_v16, %v2581_v37  ;;  %v2838_v22 = vld [vmem:[#allocation2 + $0x8] sm:$0xe]  ;;  %v2599_v37 = vld [vmem:[#allocation2 + $0x14] sm:$0x1] }
 0x1b9   :  { %v5406_v63 = vcombine.low %v2424_v11, %v2438_v14  ;;  %v2995_v10 = vrot.slane %v2993_v34, 5  ;;  %v3000_v17 = vrot.slane %v2998_v6, 4  ;;  %v3003_v28 = vrot.slane %v3001_v25, 5 }
 0x1ba   :  { %v2990_v44 = vor.u32 %v2989_v36, %v2986_v26  ;;  %v3007_v38 = vshll.u32 %v7949_v1, 16  ;;  %v2440_v31 = vshrl.u32 %v7953_v46, 16  ;;  %4424 = vmatmul.mubr.bf16.gmra.mrb[92].mxu1 %v5415_v45  ;;  %v2443_v4 = vshll.u32 %v7953_v46, 16  ;;  %v2839_v1 = vld [vmem:[#allocation2 + $0x10] sm:$0xe] }
 0x1bb   :  { %4318 = vmatprep.mubr.bf16.mxu0 %v5406_v63  ;;  %v2449_v19 = vshll.u32 %v7929_v47, 16  ;;  %v2454_v54 = vshrl.u32 %v7963_v40, 16  ;;  %v2457_v11 = vshll.u32 %v7963_v40, 16  ;;  %v3004_v23 = vor.u32 %v3003_v28, %v3000_v17 }
 0x1bc   :  { %4319 = vmatmul.mubr.bf16.gmra.mrb[88].mxu0 %v5398_v60  ;;  %v2991_v18 = vrot.slane %v2990_v44, 4  ;;  %v3009_v29 = vrot.slane %v3007_v38, 5  ;;  %v2442_v16 = vrot.slane %v2440_v31, 4  ;;  %v2445_v34 = vrot.slane %v2443_v4, 5  ;;  %v7977_v38 = vld [vmem:[#allocation2 + $0x20] sm:$0xf] }
 0x1bd   :  { %v2451_v6 = vrot.slane %v2449_v19, 5  ;;  %v2456_v25 = vrot.slane %v2454_v54, 4  ;;  %v2459_v14 = vrot.slane %v2457_v11, 5  ;;  %v3005_v26 = vrot.slane %v3004_v23, 4  ;;  %v7979_v54 = vld [vmem:[#allocation2 + $0x24] sm:$0x1] }
 0x1be   :  { %v2463_v36 = vshll.u32 %v2242_v9, 16  ;;  %v2996_v47 = vsel %vm6707_vm2, %v2991_v18, %v2995_v10  ;;  %v2446_v63 = vor.u32 %v2445_v34, %v2442_v16  ;;  %v2624_v32 = vshll.u32 %v2598_v62, 16  ;;  %v7984_v10 = vld [vmem:[%s8675_s5] sm:$0xff]   ;;  %v7986_v16 = vld [vmem:[#allocation2 + $0x28] sm:$0xf] }
 0x1bf   :  { %v2460_v45 = vor.u32 %v2459_v14, %v2456_v25  ;;  %v3010_v60 = vsel %vm6707_vm2, %v3005_v26, %v3009_v29  ;;  %v5399_v44 = vcombine.low %v7953_v46, %v7963_v40  ;;  %v5360_v28 = vrot.slane %v2838_v22, 9  ;;  %v7994_v22 = vld [vmem:[#allocation2 + $0x2c] sm:$0x1] }
 0x1c0   :  { %v2465_v17 = vrot.slane %v2463_v36, 5  ;;  %v5448_v31 = vcombine.low %v2996_v47, %v3010_v60  ;;  %v2447_v4 = vrot.slane %v2446_v63, 4  ;;  %v2888_v19 = vrot.slane %v2598_v62, 5  ;;  %v8012_v47 = vld [vmem:[#allocation2 + $0x24] sm:$0x1] }
 0x1c1   :  { %v2461_v9 = vrot.slane %v2460_v45, 4  ;;  %v2626_v11 = vrot.slane %v2624_v32, 5  ;;  %v2638_v18 = vshll.u32 %v2599_v37, 16  ;;  %v5361_v23 = vrot.slane %v2839_v1, 9  ;;  %v8000_v32 = vld [vmem:[%s8675_s5 + $0x48] sm:$0xff]  }
 0x1c2   :  { %v2892_v29 = vrot.slane %v2599_v37, 5  ;;  %4561 = vmatprep.mubr.bf16.mxu1 %v5448_v31  ;;  %v2452_v46 = vsel %vm6707_vm2, %v2447_v4, %v2451_v6  ;;  %v5440_v62 = vcombine.low %v7931_v30, %v7944_v3  ;;  %v3012_v34 = vshrl.u32 %v7977_v38, 16  ;;  %v8006_v37 = vld [vmem:[#allocation2 + $0x1c] sm:$0x1]  ;;  %v2840_v63 = vld [vmem:[#allocation2 + $0x18] sm:$0xe] }
 0x1c3   :  { %v2466_v40 = vsel %vm6707_vm2, %v2461_v9, %v2465_v17  ;;  %v3015_v6 = vshll.u32 %v7977_v38, 16  ;;  %v3021_v14 = vshll.u32 %v7979_v54, 16  ;;  %v2889_v30 = vsel %vm7437_vm12, %v5360_v28, %v2888_v19  ;;  %v8017_v45 = vld [vmem:[%s8675_s5 + $0x8] sm:$0xff]   ;;  %v2841_v4 = vld [vmem:[#allocation2 + $0x20] sm:$0xe]  ;;  %v8024_v9 = vld [vmem:[%s8675_s5 + $0x50] sm:$0xff]  }
 0x1c4   :  { %v5407_v1 = vcombine.low %v2452_v46, %v2466_v40  ;;  %v2893_v25 = vsel %vm7437_vm12, %v5361_v23, %v2892_v29  ;;  %4562 = vmatmul.mubr.bf16.vlgmr.msra.gmra.mrb[96].mxu1 %v5440_v62  ;;  %v3014_v3 = vrot.slane %v3012_v34, 4  ;;  %v3026_v26 = vshrl.u32 %v7986_v16, 16  ;;  %8712 = vst [vmem:[#allocation9_spill] sm:$0xff] %v8024_v9  ;;  %v8030_v40 = vld [vmem:[#allocation2 + $0x30] sm:$0xf] }
 0x1c5   :  { %v3029_v36 = vshll.u32 %v7986_v16, 16  ;;  %v2640_v60 = vrot.slane %v2638_v18, 5  ;;  %v5432_v17 = vcombine.low %v2889_v30, %v2893_v25  ;;  %v3017_v31 = vrot.slane %v3015_v6, 5  ;;  %6297 = vmatpush3.bf16.msra.mxu1 %v7984_v10  ;;  %v8040_v30 = vld [vmem:[#allocation2 + $0x38] sm:$0xf] }
 0x1c6   :  { %4326 = vmatprep.mubr.bf16.mxu0 %v5407_v1  ;;  %v3035_v28 = vshll.u32 %v7994_v22, 16  ;;  %v8713_v19 = vshll.u32 %v7924_v12, 16  ;;  %v3023_v29 = vrot.slane %v3021_v14, 5  ;;  %v3028_v46 = vrot.slane %v3026_v26, 4  ;;  %6290 = vmatprep.subr.bf16.mxu1 %v8000_v32  ;;  %v8042_v26 = vld [vmem:[#allocation2 + $0x34] sm:$0x1] }
 0x1c7   :  { %4327 = vmatmul.mubr.bf16.gmra.mrb[92].mxu0 %v5399_v44  ;;  %v3031_v18 = vrot.slane %v3029_v36, 5  ;;  %v3018_v62 = vor.u32 %v3017_v31, %v3014_v3  ;;  %v2627_v34 = vsel %vm6707_vm2, %v7487_v5, %v2626_v11  ;;  %v2641_v12 = vsel %vm6707_vm2, %v7506_v53, %v2640_v60  ;;  %v8050_v53 = vld [vmem:[%s8675_s5 + $0x10] sm:$0xff]   ;;  %v8056_v31 = vld [vmem:[#allocation2 + $0x3c] sm:$0x1] }
 0x1c8   :  { %v8028_v23 = vrot.slane %v8713_v19, 5  ;;  %4464 = vmatprep.mubr.bf16.mxu0 %v5432_v17  ;;  %v5362_v1 = vrot.slane %v2840_v63, 9  ;;  %v5424_v44 = vcombine.low %v2627_v34, %v2641_v12  ;;  %v2896_v6 = vrot.slane %v8006_v37, 5  ;;  %8714 = vst [vmem:[#allocation10_spill] sm:$0xff] %v8050_v53 }
 0x1c9   :  { %v3032_v25 = vor.u32 %v3031_v18, %v3028_v46  ;;  %v5363_v14 = vrot.slane %v2841_v4, 9  ;;  %v3019_v36 = vrot.slane %v3018_v62, 4  ;;  %v3037_v3 = vrot.slane %v3035_v28, 5  ;;  %6298 = vmatpush3.bf16.msra.mxu1 %v8017_v45  ;;  %v8063_v4 = vld [vmem:[%s8675_s5 + $0x58] sm:$0xff]  }
 0x1ca   :  { %v2900_v17 = vrot.slane %v8012_v47, 5  ;;  %v3040_v5 = vshrl.u32 %v8030_v40, 16  ;;  %v2897_v63 = vsel %vm7437_vm12, %v5362_v1, %v2896_v6  ;;  %v5441_v60 = vcombine.low %v7977_v38, %v7986_v16  ;;  %6291 = vmatprep.subr.bf16.mxu1 %v8024_v9  ;;  %8715 = vst [vmem:[#allocation11_spill] sm:$0xff] %v8063_v4  ;;  %v6487_v1 = vld [vmem:[%s8673_s2 + $0x208] sm:$0xff]  }
 0x1cb   :  { %v3033_v11 = vrot.slane %v3032_v25, 4  ;;  %v3043_v28 = vshll.u32 %v8030_v40, 16  ;;  %v3049_v18 = vshll.u32 %v8042_v26, 16  ;;  %v3054_v62 = vshrl.u32 %v8040_v30, 16  ;;  %v2842_v25 = vld [vmem:[#allocation2 + $0x28] sm:$0xe] }
 0x1cc   :  { %v2901_v19 = vsel %vm7437_vm12, %v5363_v14, %v2900_v17  ;;  %v3042_v46 = vrot.slane %v3040_v5, 4  ;;  %v3024_v38 = vsel %vm6707_vm2, %v3019_v36, %v3023_v29  ;;  %v3057_v17 = vshll.u32 %v8040_v30, 16  ;;  %v8078_v9 = vld [vmem:[#allocation2 + $0x2c] sm:$0x1]  ;;  %v8084_v29 = vld [vmem:[%s8675_s5 + $0x18] sm:$0xff]  }
 0x1cd   :  { %v3038_v16 = vsel %vm6707_vm2, %v3033_v11, %v3037_v3  ;;  %v5433_v34 = vcombine.low %v2897_v63, %v2901_v19  ;;  %v3045_v12 = vrot.slane %v3043_v28, 5  ;;  %v3056_v14 = vrot.slane %v3054_v62, 4  ;;  %6299 = vmatpush3.bf16.msra.mxu1 %v8050_v53  ;;  %8716 = vst [vmem:[#allocation12_spill] sm:$0xff] %v8084_v29  ;;  %v8717_v63 = vld [vmem:[#allocation4_spill] sm:$0xff]  ;;  %v8091_v19 = vld [vmem:[#allocation2 + $0x34] sm:$0x1] }
 0x1ce   :  { %v5449_v6 = vcombine.low %v3024_v38, %v3038_v16  ;;  %v3063_v5 = vshll.u32 %v8056_v31, 16  ;;  %v2649_v3 = vor.u32 %v7571_v33, %v7569_v24  ;;  %v2652_v11 = vshll.u32 %v8006_v37, 16  ;;  %v2843_v62 = vld [vmem:[#allocation2 + $0x30] sm:$0xe]  ;;  %6292 = vmatprep.subr.bf16.mxu1 %v8063_v4  ;;  %v8097_v38 = vld [vmem:[%s8675_s5 + $0x60] sm:$0xff]  }
 0x1cf   :  { %4465 = vmatmul.mubr.bf16.vlgmr.msra.gmra.mrb[96].mxu0 %v5424_v44  ;;  %v3046_v36 = vor.u32 %v3045_v12, %v3042_v46  ;;  %v2663_v28 = vor.u32 %v8717_v63, %v7573_v2  ;;  %8718 = vst [vmem:[#allocation4_spill] sm:$0xff] %v8097_v38  ;;  %v3051_v44 = vrot.slane %v3049_v18, 5  ;;  %v3059_v46 = vrot.slane %v3057_v17, 5  ;;  %v1793_v37 = vld [vmem:[#allocation2 + $0x48] sm:$0x1]  ;;  %v8103_v2 = vld [vmem:[%s8673_s2 + $0x210] sm:$0xff]  }
 0x1d0   :  { %4569 = vmatprep.mubr.bf16.mxu1 %v5449_v6  ;;  %4472 = vmatprep.mubr.bf16.mxu0 %v5433_v34  ;;  %v2666_v24 = vshll.u32 %v8012_v47, 16  ;;  %v5364_v33 = vrot.slane %v2842_v25, 9  ;;  %v2650_v12 = vrot.slane %v2649_v3, 4  ;;  %v2654_v63 = vrot.slane %v2652_v11, 5  ;;  %v1855_v6 = vld [vmem:[#allocation2 + $0x4c] sm:$0x1] }
 0x1d1   :  { %4570 = vmatmul.mubr.bf16.gmra.mrb[100].mxu1 %v5441_v60  ;;  %6258 = vmatpush3.bf16.msra.mxu0 %v7810_v8  ;;  %v3047_v16 = vrot.slane %v3046_v36, 4  ;;  %v2664_v4 = vrot.slane %v2663_v28, 4  ;;  %v3060_v34 = vor.u32 %v3059_v46, %v3056_v14  ;;  %v2904_v47 = vrot.slane %v8078_v9, 5  ;;  %v8107_v17 = vld [vmem:[#allocation2 + $0x40] sm:$0xf]  ;;  %v8126_v28 = vld [vmem:[%s8675_s5 + $0x68] sm:$0xff]  }
 0x1d2   :  { %v2668_v18 = vrot.slane %v2666_v24, 5  ;;  %6259 = vmatprep.subr.bf16.mxu0 %v6487_v1  ;;  %v5365_v25 = vrot.slane %v2843_v62, 9  ;;  %6300 = vmatpush3.bf16.msra.mxu1 %v8084_v29  ;;  %v8113_v60 = vld [vmem:[%s8675_s5 + $0x20] sm:$0xff]   ;;  %v3065_v36 = vrot.slane %v3063_v5, 5  ;;  %v2655_v14 = vsel %vm6707_vm2, %v2650_v12, %v2654_v63  ;;  %8720 = vst [vmem:[#allocation14_spill] sm:$0xff] %v8126_v28 }
 0x1d3   :  { %8719 = vst [vmem:[#allocation13_spill] sm:$0xff] %v8113_v60  ;;  %v3052_v8 = vsel %vm6707_vm2, %v3047_v16, %v3051_v44  ;;  %v2908_v3 = vrot.slane %v8091_v19, 5  ;;  %v8120_v11 = vld [vmem:[#allocation2 + $0x44] sm:$0x1]  ;;  %6293 = vmatprep.subr.bf16.mxu1 %v8097_v38  ;;  %v3061_v62 = vrot.slane %v3060_v34, 4  ;;  %v2905_v5 = vsel %vm7437_vm12, %v5364_v33, %v2904_v47  ;;  %v8145_v33 = vld [vmem:[%s8675_s5 + $0x28] sm:$0xff]  }
 0x1d4   :  { %v2669_v46 = vsel %vm6707_vm2, %v2664_v4, %v2668_v18  ;;  %v1794_v44 = vsel %vm7219_vm5, 0, %v1793_v37  ;;  %v1856_v63 = vsel %vm7226_vm7, 0, %v1855_v6  ;;  %v3068_v34 = vshrl.u32 %v8107_v17, 16  ;;  %v6495_v4 = vld [vmem:[%s8673_s2 + $0x218] sm:$0xff]   ;;  %8722 = vst [vmem:[#allocation3_spill] sm:$0xff] %v8145_v33  ;;  %v8725_v29 = vld [vmem:[#allocation7_spill] sm:$0xff] }
 0x1d5   :  { %v5425_v24 = vcombine.low %v2655_v14, %v2669_v46  ;;  %v2909_v16 = vsel %vm7437_vm12, %v5365_v25, %v2908_v3  ;;  %6260 = vmatpush3.bf16.msra.mxu0 %v6487_v1  ;;  %1795 = vst [vmem:[#allocation2 + $0x48] sm:$0x1] %v1794_v44  ;;  %v3066_v37 = vsel %vm6707_vm2, %v3061_v62, %v3065_v36  ;;  %1857 = vst [vmem:[#allocation2 + $0x4c] sm:$0x1] %v1856_v63  ;;  %v8152_v47 = vld [vmem:[#allocation2 + $0x3c] sm:$0x1] }
 0x1d6   :  { %v5434_v18 = vcombine.low %v2905_v5, %v2909_v16  ;;  %v3071_v1 = vshll.u32 %v8107_v17, 16  ;;  %v3077_v6 = vshll.u32 %v8120_v11, 16  ;;  %6261 = vmatprep.subr.bf16.mxu0 %v8103_v2  ;;  %v2844_v25 = vld [vmem:[#allocation2 + $0x38] sm:$0xe]  ;;  %6301 = vmatpush3.bf16.msra.mxu1 %v8113_v60  ;;  %v5450_v14 = vcombine.low %v3052_v8, %v3066_v37  ;;  %v8723_v46 = vld [vmem:[#allocation5_spill] sm:$0xff] }
 0x1d7   :  { %4473 = vmatmul.mubr.bf16.gmra.mrb[100].mxu0 %v5425_v24  ;;  %v3070_v3 = vrot.slane %v3068_v34, 4  ;;  %v8724_v44 = vld [vmem:[#allocation6_spill] sm:$0xff]  ;;  %v2680_v36 = vshll.u32 %v8078_v9, 16  ;;  %v8158_v62 = vld [vmem:[#allocation2 + $0x44] sm:$0x1]  ;;  %6294 = vmatprep.subr.bf16.mxu1 %v8126_v28  ;;  %v5442_v16 = vcombine.low %v8030_v40, %v8040_v30  ;;  %v2691_v8 = vor.u32 %v7712_v48, %v8725_v29  ;;  %v8171_v9 = vld [vmem:[%s8675_s5 + $0x70] sm:$0xff]  }
 0x1d8   :  { %v2677_v38 = vor.u32 %v8724_v44, %v8723_v46  ;;  %v2845_v5 = vld [vmem:[#allocation2 + $0x40] sm:$0xe]  ;;  %4480 = vmatprep.mubr.bf16.mxu0 %v5434_v18  ;;  %v3073_v63 = vrot.slane %v3071_v1, 5  ;;  %v2694_v24 = vshll.u32 %v8091_v19, 16  ;;  %8726 = vst [vmem:[#allocation5_spill] sm:$0xff] %v8171_v9  ;;  %4577 = vmatprep.mubr.bf16.mxu1 %v5450_v14  ;;  %v5366_v18 = vrot.slane %v2844_v25, 9 }
 0x1d9   :  { %v8166_v34 = vld [vmem:[#allocation2 + $0x60] sm:$0xf]  ;;  %v2682_v46 = vrot.slane %v2680_v36, 5  ;;  %v2912_v44 = vrot.slane %v8152_v47, 5  ;;  %6262 = vmatpush3.bf16.msra.mxu0 %v8103_v2  ;;  %4578 = vmatmul.mubr.bf16.gmra.mrb[104].mxu1 %v5442_v16  ;;  %v2692_v48 = vrot.slane %v2691_v8, 4  ;;  %v5367_v29 = vrot.slane %v2845_v5, 9 }
 0x1da   :  { %v2678_v37 = vrot.slane %v2677_v38, 4  ;;  %v3074_v40 = vor.u32 %v3073_v63, %v3070_v3  ;;  %v2696_v30 = vrot.slane %v2694_v24, 5  ;;  %6263 = vmatprep.subr.bf16.mxu0 %v6495_v4  ;;  %v6499_v19 = vld [vmem:[%s8673_s2 + $0x220] sm:$0xff]   ;;  %v8178_v1 = vrot.slane %v3077_v6, 5  ;;  %6302 = vmatpush3.bf16.msra.mxu1 %v8145_v33  ;;  %v8190_v3 = vld [vmem:[%s8675_s5 + $0x30] sm:$0xff]   ;;  %v8205_v8 = vld [vmem:[%s8675_s5 + $0x78] sm:$0xff]  }
 0x1db   :  { %v2916_v25 = vrot.slane %v8158_v62, 5  ;;  %v8183_v14 = vld [vmem:[#allocation2 + $0x64] sm:$0x1]  ;;  %v3096_v2 = vshrl.u32 %v8166_v34, 16  ;;  %8727 = vst [vmem:[#allocation6_spill] sm:$0xff] %v8190_v3  ;;  %v2913_v16 = vsel %vm7437_vm12, %v5366_v18, %v2912_v44  ;;  %v3099_v63 = vshll.u32 %v8166_v34, 16  ;;  %6295 = vmatprep.subr.bf16.mxu1 %v8171_v9 }
 0x1dc   :  { %v2683_v38 = vsel %vm6707_vm2, %v2678_v37, %v2682_v46  ;;  %v8192_v36 = vld [vmem:[#allocation2 + $0x48] sm:$0xf]  ;;  %v8194_v6 = vrot.slane %v3074_v40, 4  ;;  %v2697_v5 = vsel %vm6707_vm2, %v2692_v48, %v2696_v30  ;;  %8728 = vst [vmem:[#allocation7_spill] sm:$0xff] %v8205_v8  ;;  %v8207_v24 = vld [vmem:[#allocation2 + $0x4c] sm:$0x1] }
 0x1dd   :  { %v3082_v37 = vshrl.u32 %v8192_v36, 16  ;;  %v3085_v46 = vshll.u32 %v8192_v36, 16  ;;  %v5426_v40 = vcombine.low %v2683_v38, %v2697_v5  ;;  %v2917_v48 = vsel %vm7437_vm12, %v5367_v29, %v2916_v25  ;;  %v8213_v18 = vld [vmem:[#allocation2 + $0x68] sm:$0xf]  ;;  %6264 = vmatpush3.bf16.msra.mxu0 %v6495_v4  ;;  %v8220_v33 = vld [vmem:[#allocation2 + $0x6c] sm:$0x1] }
 0x1de   :  { %v3080_v44 = vsel %vm6707_vm2, %v8194_v6, %v8178_v1  ;;  %v3091_v30 = vshll.u32 %v8207_v24, 16  ;;  %v5435_v9 = vcombine.low %v2913_v16, %v2917_v48  ;;  %v3105_v28 = vshll.u32 %v8183_v14, 16  ;;  %6265 = vmatprep.subr.bf16.mxu0 %v6499_v19  ;;  %v6503_v29 = vld [vmem:[%s8673_s2 + $0x228] sm:$0xff]   ;;  %6303 = vmatpush3.bf16.msra.mxu1 %v8190_v3  ;;  %v8230_v1 = vld [vmem:[%s8675_s5 + $0x38] sm:$0xff]  }
 0x1df   :  { %v3084_v38 = vrot.slane %v3082_v37, 4  ;;  %v3087_v25 = vrot.slane %v3085_v46, 5  ;;  %4481 = vmatmul.mubr.bf16.gmra.mrb[104].mxu0 %v5426_v40  ;;  %v3098_v4 = vrot.slane %v3096_v2, 4  ;;  %v3101_v5 = vrot.slane %v3099_v63, 5  ;;  %6296 = vmatprep.subr.bf16.mxu1 %v8205_v8  ;;  %v8240_v3 = vld [vmem:[#allocation2 + $0x5c] sm:$0x1] }
 0x1e0   :  { %v3093_v6 = vrot.slane %v3091_v30, 5  ;;  %4488 = vmatprep.mubr.bf16.mxu0 %v5435_v9  ;;  %v5443_v16 = vcombine.low %v8107_v17, %v8192_v36  ;;  %v3110_v48 = vshrl.u32 %v8213_v18, 16  ;;  %v3113_v37 = vshll.u32 %v8213_v18, 16  ;;  %v2846_v60 = vld [vmem:[#allocation2 + $0x58] sm:$0xe] }
 0x1e1   :  { %v3088_v2 = vor.u32 %v3087_v25, %v3084_v38  ;;  %v3102_v63 = vor.u32 %v3101_v5, %v3098_v4  ;;  %v3119_v46 = vshll.u32 %v8220_v33, 16  ;;  %v2705_v40 = vor.u32 %v7790_v20, %v7788_v7  ;;  %6266 = vmatpush3.bf16.msra.mxu0 %v6499_v19  ;;  %v6507_v38 = vld [vmem:[%s8673_s2 + $0x230] sm:$0xff]   ;;  %v8248_v20 = vld [vmem:[#allocation2 + $0x64] sm:$0x1] }
 0x1e2   :  { %v3112_v9 = vrot.slane %v3110_v48, 4  ;;  %v3115_v30 = vrot.slane %v3113_v37, 5  ;;  %v2708_v17 = vshll.u32 %v8152_v47, 16  ;;  %v2719_v36 = vor.u32 %v7803_v39, %v7792_v15  ;;  %6267 = vmatprep.subr.bf16.mxu0 %v6503_v29  ;;  %6304 = vmatpush3.bf16.msra.mxu1 %v8230_v1  ;;  %v2847_v15 = vld [vmem:[#allocation2 + $0x60] sm:$0xe] }
 0x1e3   :  { %v3089_v25 = vrot.slane %v3088_v2, 4  ;;  %v3103_v4 = vrot.slane %v3102_v63, 4  ;;  %v3107_v5 = vrot.slane %v3105_v28, 5  ;;  %v2706_v7 = vrot.slane %v2705_v40, 4  ;;  %v8255_v63 = vld [vmem:[#allocation2 + $0x70] sm:$0xf] }
 0x1e4   :  { %v3116_v19 = vor.u32 %v3115_v30, %v3112_v9  ;;  %v3121_v48 = vrot.slane %v3119_v46, 5  ;;  %v2720_v47 = vrot.slane %v2719_v36, 4  ;;  %v2722_v37 = vshll.u32 %v8158_v62, 16  ;;  %v8259_v30 = vld [vmem:[#allocation2 + $0x74] sm:$0x1]  ;;  %v6513_v62 = vld [vmem:[%s8673_s2 + $0x238] sm:$0xff]  }
 0x1e5   :  { %v3094_v39 = vsel %vm6707_vm2, %v3089_v25, %v3093_v6  ;;  %v2710_v8 = vrot.slane %v2708_v17, 5  ;;  %v5368_v53 = vrot.slane %v2846_v60, 9  ;;  %v2920_v2 = vrot.slane %v8240_v3, 5  ;;  %6268 = vmatpush3.bf16.msra.mxu0 %v6503_v29  ;;  %v8269_v17 = vld [vmem:[#allocation2 + $0x78] sm:$0xf] }
 0x1e6   :  { %v5451_v28 = vcombine.low %v3080_v44, %v3094_v39  ;;  %v3108_v40 = vsel %vm6707_vm2, %v3103_v4, %v3107_v5  ;;  %v3117_v9 = vrot.slane %v3116_v19, 4  ;;  %v2724_v46 = vrot.slane %v2722_v37, 5  ;;  %6269 = vmatprep.subr.bf16.mxu0 %v6507_v38  ;;  %v8275_v4 = vld [vmem:[#allocation2 + $0x7c] sm:$0x1] }
 0x1e7   :  { %v2711_v60 = vsel %vm6707_vm2, %v2706_v7, %v2710_v8  ;;  %v2921_v6 = vsel %vm7437_vm12, %v5368_v53, %v2920_v2  ;;  %v5369_v29 = vrot.slane %v2847_v15, 9  ;;  %v2924_v44 = vrot.slane %v8248_v20, 5 }
 0x1e8   :  { %4585 = vmatprep.mubr.bf16.mxu1 %v5451_v28  ;;  %v3122_v36 = vsel %vm6707_vm2, %v3117_v9, %v3121_v48  ;;  %v2725_v25 = vsel %vm6707_vm2, %v2720_v47, %v2724_v46  ;;  %v3124_v5 = vshrl.u32 %v8255_v63, 16  ;;  %v3127_v8 = vshll.u32 %v8255_v63, 16  ;;  %v2848_v9 = vld [vmem:[#allocation2 + $0x68] sm:$0xe] }
 0x1e9   :  { %4586 = vmatmul.mubr.bf16.gmra.mrb[108].mxu1 %v5443_v16  ;;  %v5452_v53 = vcombine.low %v3108_v40, %v3122_v36  ;;  %v5427_v7 = vcombine.low %v2711_v60, %v2725_v25  ;;  %v2925_v19 = vsel %vm7437_vm12, %v5369_v29, %v2924_v44  ;;  %v3133_v37 = vshll.u32 %v8259_v30, 16  ;;  %6270 = vmatpush3.bf16.msra.mxu0 %v6507_v38  ;;  %v2608_v29 = vld [vmem:[#allocation2 + $0x6c] sm:$0x1]  ;;  %v2849_v44 = vld [vmem:[#allocation2 + $0x70] sm:$0xe] }
 0x1ea   :  { %v5436_v15 = vcombine.low %v2921_v6, %v2925_v19  ;;  %v3126_v48 = vrot.slane %v3124_v5, 4  ;;  %v3129_v39 = vrot.slane %v3127_v8, 5  ;;  %v3138_v47 = vshrl.u32 %v8269_v17, 16  ;;  %6271 = vmatprep.subr.bf16.mxu0 %v6513_v62  ;;  %v2609_v5 = vld [vmem:[#allocation2 + $0x74] sm:$0x1] }
 0x1eb   :  { %4593 = vmatprep.mubr.bf16.mxu1 %v5452_v53  ;;  %4489 = vmatmul.mubr.bf16.gmra.mrb[108].mxu0 %v5427_v7  ;;  %v5444_v2 = vcombine.low %v8166_v34, %v8213_v18  ;;  %v3141_v16 = vshll.u32 %v8269_v17, 16  ;;  %v3147_v28 = vshll.u32 %v8275_v4, 16  ;;  %v2733_v40 = vor.u32 %v7849_v51, %v7847_v27  ;;  %v8293_v7 = vld [vmem:[#allocation2 + $0x80] sm:$0xf] }
 0x1ec   :  { %4496 = vmatprep.mubr.bf16.mxu0 %v5436_v15  ;;  %v3130_v38 = vor.u32 %v3129_v39, %v3126_v48  ;;  %v3140_v46 = vrot.slane %v3138_v47, 4  ;;  %v2736_v60 = vshll.u32 %v8240_v3, 16  ;;  %v2747_v6 = vor.u32 %v7859_v61, %v7853_v49  ;;  %v6539_v3 = vld [vmem:[%s8675_s5 + $0x40] sm:$0xff]   ;;  %v8304_v47 = vld [vmem:[#allocation2 + $0x88] sm:$0xf] }
 0x1ed   :  { %v3135_v36 = vrot.slane %v3133_v37, 5  ;;  %v3143_v34 = vrot.slane %v3141_v16, 5  ;;  %v2734_v18 = vrot.slane %v2733_v40, 4  ;;  %v2750_v25 = vshll.u32 %v8248_v20, 16  ;;  %6272 = vmatpush3.bf16.msra.mxu0 %v6513_v62  ;;  %v8298_v15 = vld [vmem:[#allocation2 + $0x84] sm:$0x1] }
 0x1ee   :  { %v3131_v8 = vrot.slane %v3130_v38, 4  ;;  %v2738_v27 = vrot.slane %v2736_v60, 5  ;;  %v2748_v51 = vrot.slane %v2747_v6, 4  ;;  %v5370_v53 = vrot.slane %v2848_v9, 9  ;;  %6193 = vmatprep.subr.bf16.mxu0 %v6539_v3  ;;  %v8313_v60 = vld [vmem:[#allocation2 + $0x8c] sm:$0x1] }
 0x1ef   :  { %v3144_v49 = vor.u32 %v3143_v34, %v3140_v46  ;;  %v2752_v61 = vrot.slane %v2750_v25, 5  ;;  %v2928_v19 = vrot.slane %v2608_v29, 5  ;;  %v5371_v37 = vrot.slane %v2849_v44, 9 }
 0x1f0   :  { %v3136_v20 = vsel %vm6707_vm2, %v3131_v8, %v3135_v36  ;;  %v3149_v62 = vrot.slane %v3147_v28, 5  ;;  %v2739_v48 = vsel %vm6707_vm2, %v2734_v18, %v2738_v27  ;;  %v2932_v39 = vrot.slane %v2609_v5, 5 }
 0x1f1   :  { %4594 = vmatmul.mubr.bf16.gmra.mrb[112].mxu1 %v5444_v2  ;;  %v3145_v16 = vrot.slane %v3144_v49, 4  ;;  %v2753_v40 = vsel %vm6707_vm2, %v2748_v51, %v2752_v61  ;;  %v2929_v9 = vsel %vm7437_vm12, %v5370_v53, %v2928_v19  ;;  %v3152_v38 = vshrl.u32 %v8293_v7, 16  ;;  %v2850_v53 = vld [vmem:[#allocation2 + $0x78] sm:$0xe] }
 0x1f2   :  { %v5428_v46 = vcombine.low %v2739_v48, %v2753_v40  ;;  %v2933_v28 = vsel %vm7437_vm12, %v5371_v37, %v2932_v39  ;;  %v3155_v6 = vshll.u32 %v8293_v7, 16  ;;  %v3161_v44 = vshll.u32 %v8298_v15, 16  ;;  %v2610_v37 = vld [vmem:[#allocation2 + $0x7c] sm:$0x1]  ;;  %v2851_v39 = vld [vmem:[#allocation2 + $0x80] sm:$0xe] }
 0x1f3   :  { %v3150_v2 = vsel %vm6707_vm2, %v3145_v16, %v3149_v62  ;;  %v5437_v36 = vcombine.low %v2929_v9, %v2933_v28  ;;  %v3154_v34 = vrot.slane %v3152_v38, 4  ;;  %v3166_v18 = vshrl.u32 %v8304_v47, 16 }
 0x1f4   :  { %v5453_v25 = vcombine.low %v3136_v20, %v3150_v2  ;;  %4497 = vmatmul.mubr.bf16.gmra.mrb[112].mxu0 %v5428_v46  ;;  %v5445_v8 = vcombine.low %v8255_v63, %v8269_v17  ;;  %v3157_v27 = vrot.slane %v3155_v6, 5  ;;  %v3169_v51 = vshll.u32 %v8304_v47, 16  ;;  %v2611_v17 = vld [vmem:[#allocation2 + $0x84] sm:$0x1]  ;;  %v1823_v46 = vld [vmem:[#allocation2 + $0x98] sm:$0x1] }
 0x1f5   :  { %4504 = vmatprep.mubr.bf16.mxu0 %v5437_v36  ;;  %v3168_v3 = vrot.slane %v3166_v18, 4  ;;  %v3175_v49 = vshll.u32 %v8313_v60, 16  ;;  %v2761_v61 = vor.u32 %v7885_v42, %v7883_v58  ;;  %v2764_v19 = vshll.u32 %v2608_v29, 16  ;;  %v1885_v42 = vld [vmem:[#allocation2 + $0x9c] sm:$0x1] }
 0x1f6   :  { %4601 = vmatprep.mubr.bf16.mxu1 %v5453_v25  ;;  %v3158_v62 = vor.u32 %v3157_v27, %v3154_v34  ;;  %v3171_v20 = vrot.slane %v3169_v51, 5  ;;  %v2775_v48 = vor.u32 %v7899_v43, %v7887_v52  ;;  %v2778_v63 = vshll.u32 %v2609_v5, 16  ;;  %v8328_v25 = vld [vmem:[#allocation2 + $0x90] sm:$0xf] }
 0x1f7   :  { %v3163_v16 = vrot.slane %v3161_v44, 5  ;;  %v2762_v40 = vrot.slane %v2761_v61, 4  ;;  %v2766_v9 = vrot.slane %v2764_v19, 5  ;;  %v5372_v38 = vrot.slane %v2850_v53, 9  ;;  %v8346_v19 = vld [vmem:[#allocation2 + $0x94] sm:$0x1] }
 0x1f8   :  { %v3159_v28 = vrot.slane %v3158_v62, 4  ;;  %v3172_v6 = vor.u32 %v3171_v20, %v3168_v3  ;;  %v2776_v2 = vrot.slane %v2775_v48, 4  ;;  %v2780_v58 = vrot.slane %v2778_v63, 5  ;;  %v2852_v20 = vld [vmem:[#allocation2 + $0x88] sm:$0xe] }
 0x1f9   :  { %4602 = vmatmul.mubr.bf16.gmra.mrb[116].mxu1 %v5445_v8  ;;  %v3177_v29 = vrot.slane %v3175_v49, 5  ;;  %v2936_v36 = vrot.slane %v2610_v37, 5  ;;  %v5373_v34 = vrot.slane %v2851_v39, 9  ;;  %v2940_v18 = vrot.slane %v2611_v17, 5 }
 0x1fa   :  { %v3164_v52 = vsel %vm6707_vm2, %v3159_v28, %v3163_v16  ;;  %v3173_v43 = vrot.slane %v3172_v6, 4  ;;  %v2767_v5 = vsel %vm6707_vm2, %v2762_v40, %v2766_v9  ;;  %v2781_v44 = vsel %vm6707_vm2, %v2776_v2, %v2780_v58  ;;  %v2612_v16 = vld [vmem:[#allocation2 + $0x8c] sm:$0x1]  ;;  %v2613_v40 = vld [vmem:[#allocation2 + $0x94] sm:$0x1] }
 0x1fb   :  { %v5429_v27 = vcombine.low %v2767_v5, %v2781_v44  ;;  %v2937_v8 = vsel %vm7437_vm12, %v5372_v38, %v2936_v36  ;;  %v2941_v51 = vsel %vm7437_vm12, %v5373_v34, %v2940_v18  ;;  %v1824_v53 = vsel %vm7219_vm5, 0, %v1823_v46  ;;  %v2853_v28 = vld [vmem:[#allocation2 + $0x90] sm:$0xe] }
 0x1fc   :  { %v3178_v3 = vsel %vm6707_vm2, %v3173_v43, %v3177_v29  ;;  %v5438_v49 = vcombine.low %v2937_v8, %v2941_v51  ;;  %1825 = vst [vmem:[#allocation2 + $0x98] sm:$0x1] %v1824_v53  ;;  %v1886_v61 = vsel %vm7226_vm7, 0, %v1885_v42  ;;  %v3180_v62 = vshrl.u32 %v8328_v25, 16 }
 0x1fd   :  { %v5454_v48 = vcombine.low %v3164_v52, %v3178_v3  ;;  %4505 = vmatmul.mubr.bf16.gmra.mrb[116].mxu0 %v5429_v27  ;;  %v5446_v63 = vcombine.low %v8293_v7, %v8304_v47  ;;  %1887 = vst [vmem:[#allocation2 + $0x9c] sm:$0x1] %v1886_v61  ;;  %v3183_v57 = vshll.u32 %v8328_v25, 16  ;;  %v2789_v39 = vor.u32 %v7907_v41, %v7905_v21  ;;  %v3207_v52 = vld [vmem:[#allocation2 + $0x10] sm:$0xe] }
 0x1fe   :  { %4512 = vmatprep.mubr.bf16.mxu0 %v5438_v49  ;;  %v3182_v12 = vrot.slane %v3180_v62, 4  ;;  %v2792_v9 = vshll.u32 %v2610_v37, 16  ;;  %v2803_v38 = vor.u32 %v7926_v50, %v7909_v59  ;;  %v2806_v46 = vshll.u32 %v2611_v17, 16 }
 0x1ff   :  { %4609 = vmatprep.mubr.bf16.mxu1 %v5454_v48  ;;  %v3185_v6 = vrot.slane %v3183_v57, 5  ;;  %v3189_v7 = vshll.u32 %v8346_v19, 16  ;;  %v2790_v47 = vrot.slane %v2789_v39, 4  ;;  %v5374_v2 = vrot.slane %v2852_v20, 9  ;;  %v3209_v20 = vld [vmem:[#allocation2 + $0x20] sm:$0xe] }
 0x200   :  { %v2794_v58 = vrot.slane %v2792_v9, 5  ;;  %v2804_v42 = vrot.slane %v2803_v38, 4  ;;  %v2808_v29 = vrot.slane %v2806_v46, 5  ;;  %v2944_v21 = vrot.slane %v2612_v16, 5  ;;  %v6540_v46 = vld [vmem:[#allocation2 + $0x14] sm:$0x1] }
 0x201   :  { %4610 = vmatmul.mubr.bf16.gmra.mrb[120].mxu1 %v5446_v63  ;;  %v3186_v41 = vor.u32 %v3185_v6, %v3182_v12  ;;  %v5375_v36 = vrot.slane %v2853_v28, 9  ;;  %v2948_v34 = vrot.slane %v2613_v40, 5  ;;  %v2817_v37 = vor.u32 %v7940_v0, %v7938_v35  ;;  %v3208_v0 = vld [vmem:[#allocation2 + $0x18] sm:$0xe] }
 0x202   :  { %v3265_v59 = vrot.slane %v7979_v54, 5  ;;  %v2795_v50 = vsel %vm6707_vm2, %v2790_v47, %v2794_v58  ;;  %v2809_v17 = vsel %vm6707_vm2, %v2804_v42, %v2808_v29  ;;  %v2820_v18 = vshll.u32 %v2612_v16, 16  ;;  %v3210_v16 = vld [vmem:[#allocation2 + $0x28] sm:$0xe] }
 0x203   :  { %v3269_v43 = vrot.slane %v7994_v22, 5  ;;  %v2966_v5 = vld [vmem:[#allocation2 + $0x98] sm:$0xf]  ;;  %v5430_v44 = vcombine.low %v2795_v50, %v2809_v17  ;;  %v2945_v27 = vsel %vm7437_vm12, %v5374_v2, %v2944_v21  ;;  %v2949_v35 = vsel %vm7437_vm12, %v5375_v36, %v2948_v34  ;;  %v8729_v2 = vld [vmem:[#allocation8_spill] sm:$0xff] }
 0x204   :  { %v8369_v54 = vld [vmem:[#allocation2 + $0x9c] sm:$0x1]  ;;  %v3191_v8 = vrot.slane %v3189_v7, 5  ;;  %v3194_v51 = vshrl.u32 %v2966_v5, 16  ;;  %v3197_v53 = vshll.u32 %v2966_v5, 16  ;;  %v5439_v3 = vcombine.low %v2945_v27, %v2949_v35 }
 0x205   :  { %v3187_v49 = vrot.slane %v3186_v41, 4  ;;  %v3203_v61 = vshll.u32 %v8369_v54, 16  ;;  %4513 = vmatmul.mubr.bf16.gmra.mrb[120].mxu0 %v5430_v44  ;;  %v2818_v22 = vrot.slane %v2817_v37, 4  ;;  %v2831_v62 = vor.u32 %v8028_v23, %v7942_v56  ;;  %v3212_v36 = vld [vmem:[#allocation2 + $0x38] sm:$0xe] }
 0x206   :  { %v3196_v48 = vrot.slane %v3194_v51, 4  ;;  %v3199_v63 = vrot.slane %v3197_v53, 5  ;;  %4520 = vmatprep.mubr.bf16.mxu0 %v5439_v3  ;;  %v2822_v57 = vrot.slane %v2820_v18, 5  ;;  %v2834_v39 = vshll.u32 %v2613_v40, 16  ;;  %v3211_v27 = vld [vmem:[#allocation2 + $0x30] sm:$0xe] }
 0x207   :  { %v3205_v12 = vrot.slane %v3203_v61, 5  ;;  %v2832_v9 = vrot.slane %v2831_v62, 4  ;;  %v5376_v38 = vrot.slane %v3207_v52, 9  ;;  %v3257_v28 = vrot.slane %v6540_v46, 5  ;;  %v3213_v53 = vld [vmem:[#allocation2 + $0x40] sm:$0xe] }
 0x208   :  { %v3200_v6 = vor.u32 %v3199_v63, %v3196_v48  ;;  %v2836_v7 = vrot.slane %v2834_v39, 5  ;;  %v5377_v47 = vrot.slane %v3208_v0, 9  ;;  %v3261_v58 = vrot.slane %v8729_v2, 5  ;;  %v6516_v0 = vld [vmem:[%s8672_s0 + $0x44] ss:$16 sps:$4 sm:$0xff]  }
 0x209   :  { %v3192_v56 = vsel %vm6707_vm2, %v3187_v49, %v3191_v8  ;;  %v5378_v23 = vrot.slane %v3209_v20, 9  ;;  %v5379_v42 = vrot.slane %v3210_v16, 9  ;;  %v2823_v40 = vsel %vm6707_vm2, %v2818_v22, %v2822_v57  ;;  %v3214_v49 = vld [vmem:[#allocation2 + $0x48] sm:$0xe]  ;;  %v6514_v22 = vld [vmem:[%s8672_s0 + $0x40] ss:$16 sps:$4 sm:$0xff]  }
 0x20a   :  { %v3201_v29 = vrot.slane %v3200_v6, 4  ;;  %v2837_v21 = vsel %vm6707_vm2, %v2832_v9, %v2836_v7  ;;  %v3262_v41 = vsel %vm7437_vm12, %v5377_v47, %v3261_v58  ;;  %v3258_v37 = vsel %vm7437_vm12, %v5376_v38, %v3257_v28  ;;  %v3216_v61 = vld [vmem:[#allocation2 + $0x68] sm:$0xe]  ;;  %v3215_v48 = vld [vmem:[#allocation2 + $0x60] sm:$0xe] }
 0x20b   :  { %v5431_v34 = vcombine.low %v2823_v40, %v2837_v21  ;;  %v3266_v50 = vsel %vm7437_vm12, %v5378_v23, %v3265_v59  ;;  %v3270_v17 = vsel %vm7437_vm12, %v5379_v42, %v3269_v43  ;;  %v5456_v52 = vcombine.low %v3258_v37, %v3262_v41  ;;  %v6517_v63 = vld [vmem:[%s8672_s0 + $0x64] ss:$16 sps:$4 sm:$0xff]   ;;  %v3217_v46 = vld [vmem:[#allocation2 + $0x70] sm:$0xe]  ;;  %v3219_v2 = vld [vmem:[#allocation2 + $0x80] sm:$0xe] }
 0x20c   :  { %v3206_v18 = vsel %vm6707_vm2, %v3201_v29, %v3205_v12  ;;  %v5457_v44 = vcombine.low %v3266_v50, %v3270_v17  ;;  %v5381_v8 = vrot.slane %v3212_v36, 9  ;;  %v3277_v51 = vrot.slane %v8056_v31, 5  ;;  %v6519_v28 = vld [vmem:[%s8672_s0 + $0x60] ss:$16 sps:$4 sm:$0xff]   ;;  %v8731_v23 = vld [vmem:[#allocation10_spill] sm:$0xff]  ;;  %v8733_v37 = vld [vmem:[#allocation12_spill] sm:$0xff] }
 0x20d   :  { %v5455_v35 = vcombine.low %v3192_v56, %v3206_v18  ;;  %4521 = vmatmul.mubr.bf16.gmra.mrb[124].mxu0 %v5431_v34  ;;  %v5447_v59 = vcombine.low %v8328_v25, %v2966_v5  ;;  %v5380_v43 = vrot.slane %v3211_v27, 9  ;;  %v3273_v55 = vrot.slane %v8042_v26, 5  ;;  %v8732_v40 = vld [vmem:[#allocation11_spill] sm:$0xff]  ;;  %v3221_v36 = vld [vmem:[#allocation2 + $0x90] sm:$0xe]  ;;  %v8734_v17 = vld [vmem:[#allocation4_spill] sm:$0xff] }
 0x20e   :  { %6273 = vmatprep.mubr.bf16.mxu0 %v5456_v52  ;;  %v3278_v3 = vsel %vm7437_vm12, %v5381_v8, %v3277_v51  ;;  %v5382_v25 = vrot.slane %v3213_v53, 9  ;;  %v3281_v62 = vrot.slane %v8120_v11, 5  ;;  %v5383_v26 = vrot.slane %v3214_v49, 9  ;;  %v3222_v34 = vld [vmem:[#allocation2 + $0x98] sm:$0xe]  ;;  %v8735_v51 = vld [vmem:[#allocation13_spill] sm:$0xff] }
 0x20f   :  { %4617 = vmatprep.mubr.bf16.mxu1 %v5455_v35  ;;  %v3274_v31 = vsel %vm7437_vm12, %v5380_v43, %v3273_v55  ;;  %v3285_v20 = vrot.slane %v8207_v24, 5  ;;  %v5385_v57 = vrot.slane %v3216_v61, 9  ;;  %v3293_v39 = vrot.slane %v8220_v33, 5  ;;  %v3218_v33 = vld [vmem:[#allocation2 + $0x78] sm:$0xe]  ;;  %v8737_v55 = vld [vmem:[#allocation3_spill] sm:$0xff] }
 0x210   :  { %4618 = vmatmul.mubr.bf16.gmra.mrb[124].mxu1 %v5447_v59  ;;  %v5458_v5 = vcombine.low %v3274_v31, %v3278_v3  ;;  %v5384_v16 = vrot.slane %v3215_v48, 9  ;;  %v3289_v11 = vrot.slane %v8183_v14, 5  ;;  %v3282_v24 = vsel %vm7437_vm12, %v5382_v25, %v3281_v62  ;;  %v6522_v52 = vld [vmem:[%s8672_s0 + $0x90] ss:$16 sps:$4 sm:$0xff]   ;;  %v6523_v8 = vld [vmem:[%s8672_s0 + $0xb4] ss:$16 sps:$4 sm:$0xff]  }
 0x211   :  { %5002 = vmatprep.mubr.bf16.mxu1 %v6516_v0  ;;  %v3286_v12 = vsel %vm7437_vm12, %v5383_v26, %v3285_v20  ;;  %v3294_v9 = vsel %vm7437_vm12, %v5385_v57, %v3293_v39  ;;  %v5387_v7 = vrot.slane %v3218_v33, 9  ;;  %v3301_v47 = vrot.slane %v8275_v4, 5  ;;  %v8736_v59 = vld [vmem:[#allocation14_spill] sm:$0xff]  ;;  %v8738_v3 = vld [vmem:[#allocation5_spill] sm:$0xff] }
 0x212   :  { %v5459_v38 = vcombine.low %v3282_v24, %v3286_v12  ;;  %v3290_v14 = vsel %vm7437_vm12, %v5384_v16, %v3289_v11  ;;  %v3309_v56 = vrot.slane %v8313_v60, 5  ;;  %v5386_v42 = vrot.slane %v3217_v46, 9  ;;  %v6525_v49 = vld [vmem:[%s8672_s0 + $0xb0] ss:$16 sps:$4 sm:$0xff]   ;;  %v8739_v61 = vld [vmem:[#allocation6_spill] sm:$0xff] }
 0x213   :  { %v5460_v6 = vcombine.low %v3290_v14, %v3294_v9  ;;  %v3297_v29 = vrot.slane %v8259_v30, 5  ;;  %v5388_v21 = vrot.slane %v3219_v2, 9  ;;  %v3305_v4 = vrot.slane %v8298_v15, 5  ;;  %v6529_v31 = vld [vmem:[%s8672_s0] ss:$16 sps:$4 sm:$0xff]  }
 0x214   :  { %v3302_v41 = vsel %vm7437_vm12, %v5387_v7, %v3301_v47  ;;  %v5390_v18 = vrot.slane %v3221_v36, 9  ;;  %v3313_v27 = vrot.slane %v8346_v19, 5  ;;  %v5391_v35 = vrot.slane %v3222_v34, 9  ;;  %v6535_v25 = vld [vmem:[%s8672_s0 + $0x24] ss:$16 sps:$4 sm:$0xff]  }
 0x215   :  { %6274 = vmatmul.mubr.bf16.vlgmr.msra.gmra.mrb[128].mxu0 %v5457_v44  ;;  %v3298_v30 = vsel %vm7437_vm12, %v5386_v42, %v3297_v29  ;;  %v3306_v15 = vsel %vm7437_vm12, %v5388_v21, %v3305_v4  ;;  %v3317_v0 = vrot.slane %v8369_v54, 5  ;;  %v6531_v54 = vld [vmem:[%s8672_s0 + $0x4] ss:$16 sps:$4 sm:$0xff]   ;;  %v6534_v39 = vld [vmem:[%s8672_s0 + $0xf0] ss:$16 sps:$4 sm:$0xff]  }
 0x216   :  { %6277 = vmatprep.mubr.bf16.mxu0 %v5458_v5  ;;  %6194 = vmatpush3.bf16.msra.mxu0 %v7984_v10  ;;  %v3220_v10 = vld [vmem:[#allocation2 + $0x88] sm:$0xe]  ;;  %v5461_v50 = vcombine.low %v3298_v30, %v3302_v41  ;;  %v3314_v43 = vsel %vm7437_vm12, %v5390_v18, %v3313_v27  ;;  %v6528_v5 = vld [vmem:[%s8672_s0 + $0xd0] ss:$16 sps:$4 sm:$0xff]   ;;  %v6532_v62 = vld [vmem:[%s8672_s0 + $0xf4] ss:$16 sps:$4 sm:$0xff]  }
 0x217   :  { %6195 = vmatprep.subr.bf16.mxu0 %v8000_v32  ;;  %v8730_v32 = vld [vmem:[#allocation9_spill] sm:$0xff]  ;;  %v5389_v58 = vrot.slane %v3220_v10, 9  ;;  %v3318_v19 = vsel %vm7437_vm12, %v5391_v35, %v3317_v0  ;;  %v8494_v24 = vld [vmem:[%s8676_s4] ss:$0 sm:$0xff] }
 0x218   :  { %5003 = vmatmul.mubr.bf16.vlgmr.msra.gmra.mrb[128].mxu1 %v6514_v22  ;;  %v5463_v53 = vcombine.low %v3314_v43, %v3318_v19  ;;  %v8740_v22 = vld [vmem:[#allocation7_spill] sm:$0xff] }
 0x219   :  { %5010 = vmatprep.mubr.bf16.mxu1 %v6517_v63  ;;  %v3310_v60 = vsel %vm7437_vm12, %v5389_v58, %v3309_v56 }
 0x21a   :  { %6196 = vmatpush3.bf16.msra.mxu0 %v8017_v45  ;;  %v6520_v45 = vld [vmem:[%s8672_s0 + $0x94] ss:$16 sps:$4 sm:$0xff]   ;;  %v5462_v44 = vcombine.low %v3306_v15, %v3310_v60 }
 0x21b   :  { %6197 = vmatprep.subr.bf16.mxu0 %v8730_v32 }
 0x21d   :  { %6278 = vmatmul.mubr.bf16.gmra.mrb[132].mxu0 %v5459_v38 }
 0x21e   :  { %6281 = vmatprep.mubr.bf16.mxu0 %v5460_v6  ;;  %6198 = vmatpush3.bf16.msra.mxu0 %v8731_v23 }
 0x21f   :  { %6199 = vmatprep.subr.bf16.mxu0 %v8732_v40 }
 0x220   :  { %5011 = vmatmul.mubr.bf16.gmra.mrb[132].mxu1 %v6519_v28 }
 0x221   :  { %5018 = vmatprep.mubr.bf16.mxu1 %v6520_v45 }
 0x222   :  { %6200 = vmatpush3.bf16.msra.mxu0 %v8733_v37 }
 0x223   :  { %6201 = vmatprep.subr.bf16.mxu0 %v8734_v17 }
 0x225   :  { %6282 = vmatmul.mubr.bf16.gmra.mrb[136].mxu0 %v5461_v50 }
 0x226   :  { %6285 = vmatprep.mubr.bf16.mxu0 %v5462_v44  ;;  %6202 = vmatpush3.bf16.msra.mxu0 %v8735_v51 }
 0x227   :  { %6203 = vmatprep.subr.bf16.mxu0 %v8736_v59 }
 0x228   :  { %5019 = vmatmul.mubr.bf16.gmra.mrb[136].mxu1 %v6522_v52 }
 0x229   :  { %5026 = vmatprep.mubr.bf16.mxu1 %v6523_v8 }
 0x22a   :  { %6204 = vmatpush3.bf16.msra.mxu0 %v8737_v55 }
 0x22b   :  { %6205 = vmatprep.subr.bf16.mxu0 %v8738_v3 }
 0x22d   :  { %6286 = vmatmul.mubr.bf16.gmra.mrb[140].mxu0 %v5463_v53 }
 0x22e   :  { %6206 = vmatpush3.bf16.msra.mxu0 %v8739_v61  ;;  %4986 = vmatprep.mubr.bf16.mxu0 %v6531_v54 }
 0x22f   :  { %6207 = vmatprep.subr.bf16.mxu0 %v8740_v22 }
 0x230   :  { %5027 = vmatmul.mubr.bf16.gmra.mrb[140].mxu1 %v6525_v49 }
 0x231   :  { %5034 = vmatprep.mubr.bf16.mxu1 %v6526_v13 }
 0x232   :  { %6208 = vmatpush3.bf16.msra.mxu0 %v8230_v1  ;;  %v6537_v1 = vld [vmem:[%s8672_s0 + $0x20] ss:$16 sps:$4 sm:$0xff]  }
 0x235   :  { %4987 = vmatmul.mubr.bf16.vlgmr.msra.gmra.mrb[144].mxu0 %v6529_v31 }
 0x236   :  { %4994 = vmatprep.mubr.bf16.mxu0 %v6535_v25  ;;  %v6001_v26 = vpop.f32.mrb[64].mxu1 }
 0x237   :  { %v6002_v20 = vpop.f32.mrb[65].mxu1 }
 0x238   :  { %5035 = vmatmul.mubr.bf16.gmra.mrb[144].mxu1 %v6528_v5  ;;  %v6003_v48 = vadd.f32 %v6002_v20, %v6001_v26  ;;  %v6004_v63 = vpop.f32.mrb[66].mxu1 }
 0x239   :  { %5042 = vmatprep.mubr.bf16.mxu1 %v6532_v62  ;;  %v6005_v57 = vpop.f32.mrb[67].mxu1 }
 0x23a   :  { %v6006_v16 = vadd.f32 %v6005_v57, %v6004_v63 }
 0x23d   :  { %4995 = vmatmul.mubr.bf16.gmra.mrb[148].mxu0 %v6537_v1 }
 0x240   :  { %5043 = vmatmul.mubr.bf16.gmra.mrb[148].mxu1 %v6534_v39 }
 0x246   :  { %v5937_v11 = vpop.f32.mrb[64].mxu0  ;;  %v6007_v33 = vpop.f32.mrb[68].mxu1 }
 0x247   :  { %v5938_v12 = vpop.f32.mrb[65].mxu0  ;;  %v6008_v38 = vpop.f32.mrb[69].mxu1 }
 0x248   :  { %v5939_v9 = vadd.f32 %v5938_v12, %v5937_v11  ;;  %v5940_v10 = vpop.f32.mrb[66].mxu0  ;;  %v6009_v46 = vadd.f32 %v6008_v38, %v6007_v33  ;;  %v6010_v6 = vpop.f32.mrb[70].mxu1 }
 0x249   :  { %v5941_v32 = vpop.f32.mrb[67].mxu0  ;;  %v6011_v7 = vpop.f32.mrb[71].mxu1 }
 0x24a   :  { %v4273_v14 = vadd.f32 %v5939_v9, %v8494_v24  ;;  %v5942_v28 = vadd.f32 %v5941_v32, %v5940_v10  ;;  %v6012_v2 = vadd.f32 %v6011_v7, %v6010_v6 }
 0x24c   :  { %v4276_v47 = vadd.f32 %v5942_v28, %v8494_v24  ;;  %v8498_v45 = vadd.f32 %v6003_v48, %v4273_v14 }
 0x24e   :  { %v8500_v58 = vadd.f32 %v6006_v16, %v4276_v47 }
 0x254   :  { %v5943_v56 = vpop.f32.mrb[68].mxu0 }
 0x255   :  { %v5944_v23 = vpop.f32.mrb[69].mxu0  ;;  %v6013_v40 = vpop.f32.mrb[72].mxu1 }
 0x256   :  { %v5945_v42 = vadd.f32 %v5944_v23, %v5943_v56  ;;  %v5946_v29 = vpop.f32.mrb[70].mxu0  ;;  %v6014_v41 = vpop.f32.mrb[73].mxu1 }
 0x257   :  { %v5947_v21 = vpop.f32.mrb[71].mxu0  ;;  %v6015_v60 = vadd.f32 %v6014_v41, %v6013_v40  ;;  %v6016_v34 = vpop.f32.mrb[74].mxu1 }
 0x258   :  { %v4281_v4 = vadd.f32 %v5945_v42, %v8494_v24  ;;  %v5948_v36 = vadd.f32 %v5947_v21, %v5946_v29  ;;  %v6017_v30 = vpop.f32.mrb[75].mxu1 }
 0x259   :  { %v6018_v17 = vadd.f32 %v6017_v30, %v6016_v34 }
 0x25a   :  { %v4284_v37 = vadd.f32 %v5948_v36, %v8494_v24  ;;  %v8504_v50 = vadd.f32 %v6009_v46, %v4281_v4 }
 0x25c   :  { %v8506_v15 = vadd.f32 %v6012_v2, %v4284_v37 }
 0x262   :  { %v5949_v18 = vpop.f32.mrb[72].mxu0 }
 0x263   :  { %v5950_v52 = vpop.f32.mrb[73].mxu0 }
 0x264   :  { %v5951_v44 = vadd.f32 %v5950_v52, %v5949_v18  ;;  %v5952_v27 = vpop.f32.mrb[74].mxu0 }
 0x265   :  { %v6019_v35 = vpop.f32.mrb[76].mxu1  ;;  %v5953_v0 = vpop.f32.mrb[75].mxu0 }
 0x266   :  { %v4289_v8 = vadd.f32 %v5951_v44, %v8494_v24  ;;  %v6020_v51 = vpop.f32.mrb[77].mxu1  ;;  %v5954_v59 = vadd.f32 %v5953_v0, %v5952_v27 }
 0x267   :  { %v6021_v43 = vadd.f32 %v6020_v51, %v6019_v35  ;;  %v6022_v19 = vpop.f32.mrb[78].mxu1 }
 0x268   :  { %v4292_v55 = vadd.f32 %v5954_v59, %v8494_v24  ;;  %v6023_v54 = vpop.f32.mrb[79].mxu1  ;;  %v8510_v53 = vadd.f32 %v6015_v60, %v4289_v8 }
 0x269   :  { %v6024_v3 = vadd.f32 %v6023_v54, %v6022_v19 }
 0x26a   :  { %v8512_v49 = vadd.f32 %v6018_v17, %v4292_v55 }
 0x271   :  { %v5955_v13 = vpop.f32.mrb[76].mxu0 }
 0x272   :  { %v5956_v61 = vpop.f32.mrb[77].mxu0 }
 0x273   :  { %v5957_v22 = vadd.f32 %v5956_v61, %v5955_v13  ;;  %v5958_v31 = vpop.f32.mrb[78].mxu0 }
 0x274   :  { %v6025_v25 = vpop.f32.mrb[80].mxu1  ;;  %v5959_v5 = vpop.f32.mrb[79].mxu0 }
 0x275   :  { %v4297_v62 = vadd.f32 %v5957_v22, %v8494_v24  ;;  %v6026_v26 = vpop.f32.mrb[81].mxu1  ;;  %v5960_v1 = vadd.f32 %v5959_v5, %v5958_v31 }
 0x276   :  { %v6027_v20 = vadd.f32 %v6026_v26, %v6025_v25  ;;  %v6028_v48 = vpop.f32.mrb[82].mxu1 }
 0x277   :  { %v4300_v63 = vadd.f32 %v5960_v1, %v8494_v24  ;;  %v6029_v57 = vpop.f32.mrb[83].mxu1  ;;  %v8516_v39 = vadd.f32 %v6021_v43, %v4297_v62 }
 0x278   :  { %v6030_v16 = vadd.f32 %v6029_v57, %v6028_v48 }
 0x279   :  { %v8518_v11 = vadd.f32 %v6024_v3, %v4300_v63 }
 0x27c   :  { %v5961_v12 = vpop.f32.mrb[80].mxu0  ;;  %v6031_v9 = vpop.f32.mrb[84].mxu1 }
 0x27d   :  { %v5962_v33 = vpop.f32.mrb[81].mxu0  ;;  %v6032_v10 = vpop.f32.mrb[85].mxu1 }
 0x27e   :  { %v5963_v38 = vadd.f32 %v5962_v33, %v5961_v12  ;;  %v5964_v32 = vpop.f32.mrb[82].mxu0  ;;  %v6033_v14 = vadd.f32 %v6032_v10, %v6031_v9  ;;  %v6034_v46 = vpop.f32.mrb[86].mxu1 }
 0x27f   :  { %v5965_v28 = vpop.f32.mrb[83].mxu0  ;;  %v6035_v6 = vpop.f32.mrb[87].mxu1 }
 0x280   :  { %v4305_v7 = vadd.f32 %v5963_v38, %v8494_v24  ;;  %v5966_v47 = vadd.f32 %v5965_v28, %v5964_v32  ;;  %v6036_v2 = vadd.f32 %v6035_v6, %v6034_v46 }
 0x282   :  { %v4308_v56 = vadd.f32 %v5966_v47, %v8494_v24  ;;  %v8522_v23 = vadd.f32 %v6027_v20, %v4305_v7 }
 0x284   :  { %v8524_v42 = vadd.f32 %v6030_v16, %v4308_v56 }
 0x285   :  { %v5967_v29 = vpop.f32.mrb[84].mxu0  ;;  %v6037_v40 = vpop.f32.mrb[88].mxu1 }
 0x286   :  { %v5968_v21 = vpop.f32.mrb[85].mxu0  ;;  %v6038_v4 = vpop.f32.mrb[89].mxu1 }
 0x287   :  { %v5969_v41 = vadd.f32 %v5968_v21, %v5967_v29  ;;  %v5970_v36 = vpop.f32.mrb[86].mxu0  ;;  %v6039_v60 = vadd.f32 %v6038_v4, %v6037_v40  ;;  %v6040_v34 = vpop.f32.mrb[90].mxu1 }
 0x288   :  { %v5971_v37 = vpop.f32.mrb[87].mxu0  ;;  %v6041_v30 = vpop.f32.mrb[91].mxu1 }
 0x289   :  { %v4313_v17 = vadd.f32 %v5969_v41, %v8494_v24  ;;  %v5972_v18 = vadd.f32 %v5971_v37, %v5970_v36  ;;  %v6042_v52 = vadd.f32 %v6041_v30, %v6040_v34 }
 0x28b   :  { %v4316_v44 = vadd.f32 %v5972_v18, %v8494_v24  ;;  %v8528_v27 = vadd.f32 %v6033_v14, %v4313_v17 }
 0x28d   :  { %v8530_v35 = vadd.f32 %v6036_v2, %v4316_v44  ;;  %v6043_v0 = vpop.f32.mrb[92].mxu1 }
 0x28e   :  { %v6044_v51 = vpop.f32.mrb[93].mxu1 }
 0x28f   :  { %v5973_v8 = vpop.f32.mrb[88].mxu0  ;;  %v6045_v43 = vadd.f32 %v6044_v51, %v6043_v0  ;;  %v6046_v19 = vpop.f32.mrb[94].mxu1 }
 0x290   :  { %v5974_v59 = vpop.f32.mrb[89].mxu0  ;;  %v6047_v3 = vpop.f32.mrb[95].mxu1 }
 0x291   :  { %v5975_v55 = vadd.f32 %v5974_v59, %v5973_v8  ;;  %v5976_v54 = vpop.f32.mrb[90].mxu0  ;;  %v6048_v61 = vadd.f32 %v6047_v3, %v6046_v19 }
 0x292   :  { %v5977_v13 = vpop.f32.mrb[91].mxu0 }
 0x293   :  { %v4321_v22 = vadd.f32 %v5975_v55, %v8494_v24  ;;  %v5978_v31 = vadd.f32 %v5977_v13, %v5976_v54 }
 0x295   :  { %v4324_v25 = vadd.f32 %v5978_v31, %v8494_v24  ;;  %v8534_v5 = vadd.f32 %v6039_v60, %v4321_v22 }
 0x297   :  { %v8536_v62 = vadd.f32 %v6042_v52, %v4324_v25  ;;  %v6129_v26 = vpop.f32.mrb[96].mxu1 }
 0x298   :  { %v6130_v1 = vpop.f32.mrb[97].mxu1 }
 0x299   :  { %v6131_v48 = vadd.f32 %v6130_v1, %v6129_v26  ;;  %v6132_v63 = vpop.f32.mrb[98].mxu1 }
 0x29a   :  { %v5979_v20 = vpop.f32.mrb[92].mxu0  ;;  %v6133_v16 = vpop.f32.mrb[99].mxu1 }
 0x29b   :  { %v5980_v57 = vpop.f32.mrb[93].mxu0  ;;  %v6134_v33 = vadd.f32 %v6133_v16, %v6132_v63 }
 0x29c   :  { %v5981_v12 = vadd.f32 %v5980_v57, %v5979_v20  ;;  %v5982_v9 = vpop.f32.mrb[94].mxu0 }
 0x29d   :  { %v5983_v10 = vpop.f32.mrb[95].mxu0 }
 0x29e   :  { %v4329_v38 = vadd.f32 %v5981_v12, %v8494_v24  ;;  %v5984_v32 = vadd.f32 %v5983_v10, %v5982_v9 }
 0x2a0   :  { %v4332_v14 = vadd.f32 %v5984_v32, %v8494_v24  ;;  %v8540_v46 = vadd.f32 %v6045_v43, %v4329_v38 }
 0x2a2   :  { %v6065_v28 = vpop.f32.mrb[96].mxu0  ;;  %v8542_v6 = vadd.f32 %v6048_v61, %v4332_v14 }
 0x2a3   :  { %v6066_v7 = vpop.f32.mrb[97].mxu0 }
 0x2a4   :  { %v6067_v47 = vadd.f32 %v6066_v7, %v6065_v28  ;;  %v6135_v2 = vpop.f32.mrb[100].mxu1  ;;  %v6068_v56 = vpop.f32.mrb[98].mxu0 }
 0x2a5   :  { %v6136_v29 = vpop.f32.mrb[101].mxu1  ;;  %v6069_v40 = vpop.f32.mrb[99].mxu0 }
 0x2a6   :  { %v4467_v21 = vadd.f32 %v6067_v47, %v8498_v45  ;;  %v6137_v4 = vadd.f32 %v6136_v29, %v6135_v2  ;;  %v6070_v41 = vadd.f32 %v6069_v40, %v6068_v56  ;;  %v6138_v36 = vpop.f32.mrb[102].mxu1 }
 0x2a7   :  { %v6139_v60 = vpop.f32.mrb[103].mxu1 }
 0x2a8   :  { %v4470_v34 = vadd.f32 %v6070_v41, %v8500_v58  ;;  %v6140_v24 = vadd.f32 %v6139_v60, %v6138_v36  ;;  %v8546_v37 = vadd.f32 %v6131_v48, %v4467_v21 }
 0x2aa   :  { %v6071_v30 = vpop.f32.mrb[100].mxu0  ;;  %v8548_v17 = vadd.f32 %v6134_v33, %v4470_v34 }
 0x2ab   :  { %v6072_v18 = vpop.f32.mrb[101].mxu0 }
 0x2ac   :  { %v6073_v52 = vadd.f32 %v6072_v18, %v6071_v30  ;;  %v6074_v44 = vpop.f32.mrb[102].mxu0  ;;  %v6141_v0 = vpop.f32.mrb[104].mxu1 }
 0x2ad   :  { %v6075_v8 = vpop.f32.mrb[103].mxu0  ;;  %v6142_v45 = vpop.f32.mrb[105].mxu1 }
 0x2ae   :  { %v4475_v51 = vadd.f32 %v6073_v52, %v8504_v50  ;;  %v6076_v59 = vadd.f32 %v6075_v8, %v6074_v44  ;;  %v6143_v43 = vadd.f32 %v6142_v45, %v6141_v0  ;;  %v6144_v19 = vpop.f32.mrb[106].mxu1 }
 0x2af   :  { %v6145_v58 = vpop.f32.mrb[107].mxu1 }
 0x2b0   :  { %v4478_v55 = vadd.f32 %v6076_v59, %v8506_v15  ;;  %v8552_v54 = vadd.f32 %v6137_v4, %v4475_v51  ;;  %v6146_v3 = vadd.f32 %v6145_v58, %v6144_v19 }
 0x2b2   :  { %v6077_v13 = vpop.f32.mrb[104].mxu0  ;;  %v8554_v61 = vadd.f32 %v6140_v24, %v4478_v55 }
 0x2b3   :  { %v6078_v22 = vpop.f32.mrb[105].mxu0 }
 0x2b4   :  { %v6079_v31 = vadd.f32 %v6078_v22, %v6077_v13  ;;  %v6080_v25 = vpop.f32.mrb[106].mxu0 }
 0x2b5   :  { %v6081_v26 = vpop.f32.mrb[107].mxu0 }
 0x2b6   :  { %v4483_v1 = vadd.f32 %v6079_v31, %v8510_v53  ;;  %v6082_v50 = vadd.f32 %v6081_v26, %v6080_v25 }
 0x2b8   :  { %v4486_v20 = vadd.f32 %v6082_v50, %v8512_v49  ;;  %v8558_v48 = vadd.f32 %v6143_v43, %v4483_v1 }
 0x2ba   :  { %v8560_v63 = vadd.f32 %v6146_v3, %v4486_v20 }
 0x2bc   :  { %v6147_v15 = vpop.f32.mrb[108].mxu1 }
 0x2bd   :  { %v6148_v57 = vpop.f32.mrb[109].mxu1 }
 0x2be   :  { %v6149_v16 = vadd.f32 %v6148_v57, %v6147_v15  ;;  %v6150_v12 = vpop.f32.mrb[110].mxu1  ;;  %v6083_v9 = vpop.f32.mrb[108].mxu0 }
 0x2bf   :  { %v6151_v33 = vpop.f32.mrb[111].mxu1  ;;  %v6084_v10 = vpop.f32.mrb[109].mxu0 }
 0x2c0   :  { %v6152_v38 = vadd.f32 %v6151_v33, %v6150_v12  ;;  %v6085_v32 = vadd.f32 %v6084_v10, %v6083_v9  ;;  %v6086_v14 = vpop.f32.mrb[110].mxu0 }
 0x2c1   :  { %v6087_v28 = vpop.f32.mrb[111].mxu0 }
 0x2c2   :  { %v4491_v53 = vadd.f32 %v6085_v32, %v8516_v39  ;;  %v6088_v7 = vadd.f32 %v6087_v28, %v6086_v14 }
 0x2c4   :  { %v6153_v47 = vpop.f32.mrb[112].mxu1  ;;  %v4494_v49 = vadd.f32 %v6088_v7, %v8518_v11  ;;  %v8564_v2 = vadd.f32 %v6149_v16, %v4491_v53 }
 0x2c5   :  { %v6154_v56 = vpop.f32.mrb[113].mxu1 }
 0x2c6   :  { %v6155_v29 = vadd.f32 %v6154_v56, %v6153_v47  ;;  %v6156_v40 = vpop.f32.mrb[114].mxu1  ;;  %v8566_v21 = vadd.f32 %v6152_v38, %v4494_v49 }
 0x2c7   :  { %v6157_v4 = vpop.f32.mrb[115].mxu1  ;;  %v6089_v41 = vpop.f32.mrb[112].mxu0 }
 0x2c8   :  { %v6158_v36 = vadd.f32 %v6157_v4, %v6156_v40  ;;  %v6090_v60 = vpop.f32.mrb[113].mxu0 }
 0x2c9   :  { %v6091_v34 = vadd.f32 %v6090_v60, %v6089_v41  ;;  %v6092_v24 = vpop.f32.mrb[114].mxu0 }
 0x2ca   :  { %v6093_v30 = vpop.f32.mrb[115].mxu0 }
 0x2cb   :  { %v4499_v39 = vadd.f32 %v6091_v34, %v8522_v23  ;;  %v6094_v18 = vadd.f32 %v6093_v30, %v6092_v24 }
 0x2cc   :  { %v6159_v52 = vpop.f32.mrb[116].mxu1 }
 0x2cd   :  { %v6160_v44 = vpop.f32.mrb[117].mxu1  ;;  %v4502_v11 = vadd.f32 %v6094_v18, %v8524_v42  ;;  %v8570_v0 = vadd.f32 %v6155_v29, %v4499_v39 }
 0x2ce   :  { %v6161_v8 = vadd.f32 %v6160_v44, %v6159_v52  ;;  %v6162_v51 = vpop.f32.mrb[118].mxu1 }
 0x2cf   :  { %v6163_v45 = vpop.f32.mrb[119].mxu1  ;;  %v8572_v59 = vadd.f32 %v6158_v36, %v4502_v11 }
 0x2d0   :  { %v6164_v43 = vadd.f32 %v6163_v45, %v6162_v51  ;;  %v6095_v19 = vpop.f32.mrb[116].mxu0 }
 0x2d1   :  { %v6096_v55 = vpop.f32.mrb[117].mxu0 }
 0x2d2   :  { %v6097_v58 = vadd.f32 %v6096_v55, %v6095_v19  ;;  %v6098_v3 = vpop.f32.mrb[118].mxu0  ;;  %v8607_v19 = vld [vmem:[%s8677_s6] ss:$0 sm:$0xff] }
 0x2d3   :  { %v6099_v13 = vpop.f32.mrb[119].mxu0 }
 0x2d4   :  { %v4507_v23 = vadd.f32 %v6097_v58, %v8528_v27  ;;  %v6165_v22 = vpop.f32.mrb[120].mxu1  ;;  %v6100_v31 = vadd.f32 %v6099_v13, %v6098_v3 }
 0x2d5   :  { %v6166_v25 = vpop.f32.mrb[121].mxu1 }
 0x2d6   :  { %v6167_v26 = vadd.f32 %v6166_v25, %v6165_v22  ;;  %v4510_v42 = vadd.f32 %v6100_v31, %v8530_v35  ;;  %v6168_v1 = vpop.f32.mrb[122].mxu1  ;;  %v8576_v50 = vadd.f32 %v6161_v8, %v4507_v23 }
 0x2d7   :  { %v6169_v20 = vpop.f32.mrb[123].mxu1 }
 0x2d8   :  { %v6170_v15 = vadd.f32 %v6169_v20, %v6168_v1  ;;  %v6101_v57 = vpop.f32.mrb[120].mxu0  ;;  %v8578_v16 = vadd.f32 %v6164_v43, %v4510_v42 }
 0x2d9   :  { %v6102_v12 = vpop.f32.mrb[121].mxu0 }
 0x2da   :  { %v6103_v9 = vadd.f32 %v6102_v12, %v6101_v57  ;;  %v6104_v33 = vpop.f32.mrb[122].mxu0 }
 0x2db   :  { %v6105_v10 = vpop.f32.mrb[123].mxu0 }
 0x2dc   :  { %v4515_v27 = vadd.f32 %v6103_v9, %v8534_v5  ;;  %v6106_v38 = vadd.f32 %v6105_v10, %v6104_v33 }
 0x2de   :  { %v4518_v32 = vadd.f32 %v6106_v38, %v8536_v62  ;;  %v8582_v14 = vadd.f32 %v6167_v26, %v4515_v27 }
 0x2e0   :  { %v6107_v35 = vpop.f32.mrb[124].mxu0  ;;  %v8584_v28 = vadd.f32 %v6170_v15, %v4518_v32 }
 0x2e1   :  { %v6108_v53 = vpop.f32.mrb[125].mxu0 }
 0x2e2   :  { %v6109_v7 = vadd.f32 %v6108_v53, %v6107_v35  ;;  %v6110_v47 = vpop.f32.mrb[126].mxu0 }
 0x2e3   :  { %v6171_v49 = vpop.f32.mrb[124].mxu1  ;;  %v6111_v56 = vpop.f32.mrb[127].mxu0 }
 0x2e4   :  { %v6172_v29 = vpop.f32.mrb[125].mxu1  ;;  %v4523_v40 = vadd.f32 %v6109_v7, %v8540_v46  ;;  %v6112_v4 = vadd.f32 %v6111_v56, %v6110_v47 }
 0x2e5   :  { %v6173_v41 = vadd.f32 %v6172_v29, %v6171_v49  ;;  %v6174_v36 = vpop.f32.mrb[126].mxu1 }
 0x2e6   :  { %v6175_v5 = vpop.f32.mrb[127].mxu1  ;;  %v4526_v60 = vadd.f32 %v6112_v4, %v8542_v6 }
 0x2e7   :  { %v6176_v62 = vadd.f32 %v6175_v5, %v6174_v36  ;;  %v8588_v34 = vadd.f32 %v6173_v41, %v4523_v40 }
 0x2e8   :  { %v6275_v24 = vpop.f32.mrb[128].mxu0 }
 0x2e9   :  { %v8591_v30 = vadd.f32 %v6275_v24, %v8552_v54  ;;  %v4660_v39 = vpop.f32.mrb[129].mxu0  ;;  %v8593_v18 = vadd.f32 %v6176_v62, %v4526_v60 }
 0x2ea   :  { %v8596_v52 = vadd.f32 %v4660_v39, %v8546_v37  ;;  %v6276_v46 = vpop.f32.mrb[130].mxu0 }
 0x2eb   :  { %v6221_v44 = vpop.f32.mrb[128].mxu1  ;;  %v8599_v11 = vadd.f32 %v6276_v46, %v8554_v61  ;;  %v4663_v8 = vpop.f32.mrb[131].mxu0 }
 0x2ec   :  { %v6222_v6 = vpop.f32.mrb[129].mxu1  ;;  %v8602_v51 = vadd.f32 %v4663_v8, %v8548_v17 }
 0x2ed   :  { %v6223_v45 = vadd.f32 %v6222_v6, %v6221_v44  ;;  %v6224_v43 = vpop.f32.mrb[130].mxu1 }
 0x2ee   :  { %v6225_v54 = vpop.f32.mrb[131].mxu1 }
 0x2ef   :  { %v6226_v37 = vadd.f32 %v6225_v54, %v6224_v43  ;;  %v5005_v61 = vadd.f32 %v6223_v45, %v8607_v19 }
 0x2f0   :  { %v6279_v55 = vpop.f32.mrb[132].mxu0 }
 0x2f1   :  { %v4685_v58 = vadd.f32 %v6279_v55, %v8564_v2  ;;  %v4676_v3 = vpop.f32.mrb[133].mxu0  ;;  %v5008_v25 = vadd.f32 %v6226_v37, %v8607_v19 }
 0x2f2   :  { %v4677_v13 = vadd.f32 %v4676_v3, %v8558_v48  ;;  %v6280_v23 = vpop.f32.mrb[134].mxu0 }
 0x2f3   :  { %v6227_v17 = vpop.f32.mrb[132].mxu1  ;;  %v4688_v22 = vadd.f32 %v6280_v23, %v8566_v21  ;;  %v4679_v31 = vpop.f32.mrb[135].mxu0 }
 0x2f4   :  { %v6228_v26 = vpop.f32.mrb[133].mxu1  ;;  %v5055_v42 = vadd.f32 %v5005_v61, %v4677_v13  ;;  %v4680_v1 = vadd.f32 %v4679_v31, %v8560_v63 }
 0x2f5   :  { %v6229_v20 = vadd.f32 %v6228_v26, %v6227_v17  ;;  %v6230_v15 = vpop.f32.mrb[134].mxu1 }
 0x2f6   :  { %v6231_v57 = vpop.f32.mrb[135].mxu1  ;;  %v5056_v2 = vadd.f32 %v5008_v25, %v4680_v1  ;;  %v5071_v33 = vmax.f32 %v5055_v42, 0.0 }
 0x2f7   :  { %v5013_v12 = vadd.f32 %v6229_v20, %v8607_v19  ;;  %v6232_v9 = vadd.f32 %v6231_v57, %v6230_v15 }
 0x2f8   :  { %v5072_v48 = vmax.f32 %v5056_v2, 0.0  ;;  %v6283_v10 = vpop.f32.mrb[136].mxu0 }
 0x2f9   :  { %v5057_v27 = vadd.f32 %v5013_v12, %v4685_v58  ;;  %v5016_v21 = vadd.f32 %v6232_v9, %v8607_v19  ;;  %v4701_v38 = vadd.f32 %v6283_v10, %v8576_v50  ;;  %v4692_v32 = vpop.f32.mrb[137].mxu0 }
 0x2fa   :  { %v5631_v35 = vpack.c.bf16 %v5072_v48, %v5071_v33  ;;  %v4693_v53 = vadd.f32 %v4692_v32, %v8570_v0  ;;  %v6284_v63 = vpop.f32.mrb[138].mxu0 }
 0x2fb   :  { %v5058_v7 = vadd.f32 %v5016_v21, %v4688_v22  ;;  %v6233_v47 = vpop.f32.mrb[136].mxu1  ;;  %v4704_v49 = vadd.f32 %v6284_v63, %v8578_v16  ;;  %v4695_v56 = vpop.f32.mrb[139].mxu0  ;;  %v5073_v4 = vmax.f32 %v5057_v27, 0.0 }
 0x2fc   :  { %5659 = vst [vmem:[%s8678_s7 + $0x10] sm:$0xff] %v5631_v35   ;;  %v6234_v29 = vpop.f32.mrb[137].mxu1  ;;  %v4696_v40 = vadd.f32 %v4695_v56, %v8572_v59 }
 0x2fd   :  { %v5074_v41 = vmax.f32 %v5058_v7, 0.0  ;;  %v6235_v50 = vadd.f32 %v6234_v29, %v6233_v47  ;;  %v6236_v36 = vpop.f32.mrb[138].mxu1 }
 0x2fe   :  { %v6237_v5 = vpop.f32.mrb[139].mxu1 }
 0x2ff   :  { %v5636_v60 = vpack.c.bf16 %v5074_v41, %v5073_v4  ;;  %v5021_v0 = vadd.f32 %v6235_v50, %v8607_v19  ;;  %v6238_v62 = vadd.f32 %v6237_v5, %v6236_v36 }
 0x300   :  { %v6287_v24 = vpop.f32.mrb[140].mxu0 }
 0x301   :  { %5660 = vst [vmem:[%s8678_s7 + $0x18] sm:$0xff] %v5636_v60   ;;  %v5024_v16 = vadd.f32 %v6238_v62, %v8607_v19  ;;  %v5059_v39 = vadd.f32 %v5021_v0, %v4693_v53  ;;  %v8630_v46 = vadd.f32 %v6287_v24, %v8588_v34  ;;  %v4708_v59 = vpop.f32.mrb[141].mxu0 }
 0x302   :  { %v4709_v44 = vadd.f32 %v4708_v59, %v8582_v14  ;;  %v6288_v8 = vpop.f32.mrb[142].mxu0 }
 0x303   :  { %v6239_v6 = vpop.f32.mrb[140].mxu1  ;;  %v5060_v45 = vadd.f32 %v5024_v16, %v4696_v40  ;;  %v8634_v43 = vadd.f32 %v6288_v8, %v8593_v18  ;;  %v4711_v54 = vpop.f32.mrb[143].mxu0  ;;  %v5075_v58 = vmax.f32 %v5059_v39, 0.0 }
 0x304   :  { %v6240_v37 = vpop.f32.mrb[141].mxu1  ;;  %v4712_v55 = vadd.f32 %v4711_v54, %v8584_v28 }
 0x305   :  { %v6241_v3 = vadd.f32 %v6240_v37, %v6239_v6  ;;  %v5076_v61 = vmax.f32 %v5060_v45, 0.0  ;;  %v6242_v13 = vpop.f32.mrb[142].mxu1 }
 0x306   :  { %v6243_v23 = vpop.f32.mrb[143].mxu1 }
 0x307   :  { %v5029_v34 = vadd.f32 %v6241_v3, %v8607_v19  ;;  %v5641_v17 = vpack.c.bf16 %v5076_v61, %v5075_v58  ;;  %v6244_v22 = vadd.f32 %v6243_v23, %v6242_v13 }
 0x308   :  { %v6209_v14 = vpop.f32.mrb[144].mxu0 }
 0x309   :  { %v5061_v31 = vadd.f32 %v5029_v34, %v4701_v38  ;;  %5661 = vst [vmem:[%s8678_s7 + $0x20] sm:$0xff] %v5641_v17   ;;  %v5032_v18 = vadd.f32 %v6244_v22, %v8607_v19  ;;  %v6210_v25 = vpop.f32.mrb[145].mxu0 }
 0x30a   :  { %v6211_v26 = vadd.f32 %v6210_v25, %v6209_v14  ;;  %v6212_v28 = vpop.f32.mrb[146].mxu0 }
 0x30b   :  { %v5062_v42 = vadd.f32 %v5032_v18, %v4704_v49  ;;  %v6245_v1 = vpop.f32.mrb[144].mxu1  ;;  %v6213_v20 = vpop.f32.mrb[147].mxu0  ;;  %v5077_v12 = vmax.f32 %v5061_v31, 0.0 }
 0x30c   :  { %v6246_v15 = vpop.f32.mrb[145].mxu1  ;;  %v4989_v57 = vadd.f32 %v6211_v26, %v8607_v19  ;;  %v6214_v2 = vadd.f32 %v6213_v20, %v6212_v28 }
 0x30d   :  { %v5078_v9 = vmax.f32 %v5062_v42, 0.0  ;;  %v6247_v33 = vadd.f32 %v6246_v15, %v6245_v1  ;;  %v6248_v48 = vpop.f32.mrb[146].mxu1 }
 0x30e   :  { %v6249_v10 = vpop.f32.mrb[147].mxu1  ;;  %v5051_v27 = vadd.f32 %v4989_v57, %v8596_v52  ;;  %v4992_v21 = vadd.f32 %v6214_v2, %v8607_v19 }
 0x30f   :  { %v5646_v38 = vpack.c.bf16 %v5078_v9, %v5077_v12  ;;  %v5037_v32 = vadd.f32 %v6247_v33, %v8607_v19  ;;  %v6250_v35 = vadd.f32 %v6249_v10, %v6248_v48 }
 0x310   :  { %v5052_v53 = vadd.f32 %v4992_v21, %v8602_v51  ;;  %v6215_v63 = vpop.f32.mrb[148].mxu0  ;;  %v5067_v56 = vmax.f32 %v5051_v27, 0.0 }
 0x311   :  { %5662 = vst [vmem:[%s8678_s7 + $0x28] sm:$0xff] %v5646_v38   ;;  %v5063_v7 = vadd.f32 %v5037_v32, %v4709_v44  ;;  %v5040_v47 = vadd.f32 %v6250_v35, %v8607_v19  ;;  %v6216_v49 = vpop.f32.mrb[149].mxu0 }
 0x312   :  { %v5068_v29 = vmax.f32 %v5052_v53, 0.0  ;;  %v6217_v52 = vadd.f32 %v6216_v49, %v6215_v63  ;;  %v6218_v40 = vpop.f32.mrb[150].mxu0 }
 0x313   :  { %v5064_v4 = vadd.f32 %v5040_v47, %v4712_v55  ;;  %v6251_v41 = vpop.f32.mrb[148].mxu1  ;;  %v6219_v50 = vpop.f32.mrb[151].mxu0  ;;  %v5079_v0 = vmax.f32 %v5063_v7, 0.0 }
 0x314   :  { %v6252_v36 = vpop.f32.mrb[149].mxu1  ;;  %v5621_v5 = vpack.c.bf16 %v5068_v29, %v5067_v56  ;;  %v4997_v51 = vadd.f32 %v6217_v52, %v8607_v19  ;;  %v6220_v60 = vadd.f32 %v6219_v50, %v6218_v40 }
 0x315   :  { %v5080_v62 = vmax.f32 %v5064_v4, 0.0  ;;  %v6253_v24 = vadd.f32 %v6252_v36, %v6251_v41  ;;  %v6254_v16 = vpop.f32.mrb[150].mxu1 }
 0x316   :  { %5622 = vst [vmem:[%s8678_s7] sm:$0xff] %v5621_v5   ;;  %v6255_v39 = vpop.f32.mrb[151].mxu1  ;;  %v5053_v59 = vadd.f32 %v4997_v51, %v8591_v30  ;;  %v5000_v44 = vadd.f32 %v6220_v60, %v8607_v19 }
 0x317   :  { %v5651_v8 = vpack.c.bf16 %v5080_v62, %v5079_v0  ;;  %v5045_v6 = vadd.f32 %v6253_v24, %v8607_v19  ;;  %v6256_v45 = vadd.f32 %v6255_v39, %v6254_v16 }
 0x318   :  { %v5054_v54 = vadd.f32 %v5000_v44, %v8599_v11  ;;  %v5069_v58 = vmax.f32 %v5053_v59, 0.0 }
 0x319   :  { %5663 = vst [vmem:[%s8678_s7 + $0x30] sm:$0xff] %v5651_v8   ;;  %v5065_v37 = vadd.f32 %v5045_v6, %v8630_v46  ;;  %v5048_v55 = vadd.f32 %v6256_v45, %v8607_v19 }
 0x31a   :  { %v5070_v3 = vmax.f32 %v5054_v54, 0.0 }
 0x31b   :  { %v5066_v30 = vadd.f32 %v5048_v55, %v8634_v43  ;;  %v5081_v13 = vmax.f32 %v5065_v37, 0.0 }
 0x31c   :  { %v5626_v61 = vpack.c.bf16 %v5070_v3, %v5069_v58 }
 0x31d   :  { %v5082_v23 = vmax.f32 %v5066_v30, 0.0 }
 0x31e   :  { %5658 = vst [vmem:[%s8678_s7 + $0x8] sm:$0xff] %v5626_v61  }
 0x31f   :  { %v5656_v11 = vpack.c.bf16 %v5082_v23, %v5081_v13 }
 0x321   :  { %5664 = vst [vmem:[%s8678_s7 + $0x38] sm:$0xff] %v5656_v11  }

</bundles_post_ra>
